<compile_context>
chip_gen: v7x
topology: tpu7x:2x2x1
jax: 0.10.0
libtpu: 0.0.40
codegen_flags: <defaults>
</compile_context>

<pallas_src>
import math
import numpy as np
import jax
import jax.numpy as jnp
from jax.experimental import pallas as pl
from jax.experimental.pallas import tpu as pltpu


REVIN_EPS = 1e-5
LN_EPS = 1e-5
NEG_INF = -1e30


# --------------------------- model configuration ---------------------------

class Configs:
    is_pretrain = False
    pretrained_model = None
    enc_in = 4          # n_vars / channels
    seq_len = 16
    pred_len = 8
    patch_len = 4
    stride = 4
    d_model = 32
    n_heads = 4
    d_ff = 64
    e_layers = 2
    dropout = 0.0       # eval mode -> identity
    factor = 1
    output_attention = False
    activation = "relu"


def sinusoidal_pos_embedding(L, D):
    position = np.arange(L, dtype=np.float32)[:, None]
    div_term = np.exp(np.arange(0, D, 2, dtype=np.float32) * -(math.log(10000.0) / D))
    pe = np.zeros((L, D), dtype=np.float32)
    pe[:, 0::2] = np.sin(position * div_term)
    pe[:, 1::2] = np.cos(position * div_term)
    return jnp.asarray(pe)


def init_params(cfg, key):
    D, Dff = cfg.d_model, cfg.d_ff
    padding = cfg.stride
    num_patch = (max(cfg.seq_len, cfg.patch_len) - cfg.patch_len + padding) // cfg.stride + 1

    def lin(k, fan_in, fan_out):
        return 0.02 * jax.random.normal(k, (fan_in, fan_out), dtype=jnp.float32)

    keys = list(jax.random.split(key, 2 + 6 * cfg.e_layers))
    ki = iter(keys)

    params = {
        "revin_w": jnp.ones((cfg.enc_in,), jnp.float32),
        "revin_b": jnp.zeros((cfg.enc_in,), jnp.float32),
        # value embedding: Linear(patch_len, d_model, bias=False)
        "W_val": lin(next(ki), cfg.patch_len, D),
        "pos": sinusoidal_pos_embedding(num_patch, D),
        "enc_norm_g": jnp.ones((D,), jnp.float32),
        "enc_norm_b": jnp.zeros((D,), jnp.float32),
        # FlattenHead: Linear(d_model * num_patch, pred_len); row index = d*NP + p
        "W_head": lin(next(ki), D * num_patch, cfg.pred_len),
        "b_head": jnp.zeros((cfg.pred_len,), jnp.float32),
        "layers": [],
    }
    for _ in range(cfg.e_layers):
        layer = {
            "Wq": lin(next(ki), D, D), "bq": jnp.zeros((D,), jnp.float32),
            "Wk": lin(next(ki), D, D), "bk": jnp.zeros((D,), jnp.float32),
            "Wv": lin(next(ki), D, D), "bv": jnp.zeros((D,), jnp.float32),
            "Wo": lin(next(ki), D, D), "bo": jnp.zeros((D,), jnp.float32),
            "W1": lin(next(ki), D, Dff), "b1": jnp.zeros((Dff,), jnp.float32),
            "W2": lin(next(ki), Dff, D), "b2": jnp.zeros((D,), jnp.float32),
            "ln1_g": jnp.ones((D,), jnp.float32), "ln1_b": jnp.zeros((D,), jnp.float32),
            "ln2_g": jnp.ones((D,), jnp.float32), "ln2_b": jnp.zeros((D,), jnp.float32),
        }
        params["layers"].append(layer)
    return params, num_patch


def pack_params(params, cfg, num_patch):
    """One-time repacking of weights into kernel-friendly layouts.

    * Q/K/V projections merged into a single [D, 3D] weight per layer
      (attention scale 1/sqrt(head_dim) folded into the Q block).
    * bo / b2 / LayerNorm gammas+betas stacked into one [e_layers, 6, D] array.
    * FlattenHead weight reshaped to [D, NP*P] with column-blocks per patch.
    """
    D, Dff, P = cfg.d_model, cfg.d_ff, cfg.pred_len
    H = cfg.n_heads
    dh = D // H
    scale = 1.0 / math.sqrt(dh)

    Wqkv, bqkv, Wo, W1, b1, W2, vecD = [], [], [], [], [], [], []
    for lp in params["layers"]:
        Wqkv.append(jnp.concatenate([lp["Wq"] * scale, lp["Wk"], lp["Wv"]], axis=1))
        bqkv.append(jnp.concatenate([lp["bq"] * scale, lp["bk"], lp["bv"]]).reshape(1, 3 * D))
        Wo.append(lp["Wo"])
        W1.append(lp["W1"])
        b1.append(lp["b1"].reshape(1, Dff))
        W2.append(lp["W2"])
        vecD.append(jnp.stack([lp["bo"], lp["b2"],
                               lp["ln1_g"], lp["ln1_b"],
                               lp["ln2_g"], lp["ln2_b"]]))          # [6, D]

    packed = dict(
        W_val=params["W_val"],
        pos=params["pos"],
        Wqkv=jnp.stack(Wqkv),            # [EL, D, 3D]
        bqkv=jnp.stack(bqkv),            # [EL, 1, 3D]
        Wo=jnp.stack(Wo),                # [EL, D, D]
        W1=jnp.stack(W1),                # [EL, D, Dff]
        b1=jnp.stack(b1),                # [EL, 1, Dff]
        W2=jnp.stack(W2),                # [EL, Dff, D]
        vecD=jnp.stack(vecD),            # [EL, 6, D]
        encnorm=jnp.stack([params["enc_norm_g"], params["enc_norm_b"]]),   # [2, D]
        # W_head[d*NP + p, t]  ->  Whead[d, p*P + t]
        Whead=params["W_head"].reshape(D, num_patch * P),
        bhead=params["b_head"].reshape(1, P),
        revw=params["revin_w"],
        revb=params["revin_b"],
    )
    return packed


# ------------------------------ fused forward -------------------------------

def make_forward(cfg, num_patch):
    D, H, Dff, P = cfg.d_model, cfg.n_heads, cfg.d_ff, cfg.pred_len
    dh = D // H
    EL = cfg.e_layers
    NP = num_patch
    PLN = cfg.patch_len
    act = cfg.activation
    f32 = jnp.float32

    def _ln(x, g, b):
        mu = jnp.mean(x, axis=-1, keepdims=True)
        var = jnp.mean((x - mu) ** 2, axis=-1, keepdims=True)
        return (x - mu) * jax.lax.rsqrt(var + LN_EPS) * g + b

    def _act(x):
        if act == "relu":
            return jnp.maximum(x, 0.0)
        return jax.nn.gelu(x, approximate=False)

    def _dual_core_chip():
        # v4 / v5p / v7x have 2 TensorCores per chip; use a 2-wide parallel
        # grid there.  Single-TC chips (v5e / v6e) get grid=(1,).
        try:
            kind = jax.devices()[0].device_kind.lower()
            return any(t in kind for t in ("v4", "v5p", "v7"))
        except Exception:
            return False

    def kernel(patch_ref, tokst_ref, rowdn_ref,
               wval_ref, pos_ref, bias_ref,
               wqkv_ref, bqkv_ref, wo_ref, w1_ref, b1_ref, w2_ref,
               vecd_ref, encn_ref, whead_ref, hmask_ref, bsum_ref,
               out_ref):
        # ---- RevIN 'norm' applied to the raw patches (per-token affine) ----
        ts = tokst_ref[...]                                        # [RT, 2]
        a = ts[:, 0:1]
        c = ts[:, 1:2]
        pn = patch_ref[...] * a + c                                # [RT, PLN]

        # ---- PatchEmbedding: value embedding (no bias) + positional emb ----
        h = jnp.dot(pn, wval_ref[...], preferred_element_type=f32) + pos_ref[...]

        bias = bias_ref[...]                                       # block-diag mask
        # ---- Encoder layers ----
        for l in range(EL):
            vec = vecd_ref[l]                                      # [6, D]
            bo, b2 = vec[0:1, :], vec[1:2, :]
            g1, be1 = vec[2:3, :], vec[3:4, :]
            g2, be2 = vec[4:5, :], vec[5:6, :]

            # merged QKV projection (scale folded into the Q block)
            qkv = jnp.dot(h, wqkv_ref[l], preferred_element_type=f32) + bqkv_ref[l]

            heads = []
            for hh in range(H):
                q = qkv[:, hh * dh:(hh + 1) * dh]
                k = qkv[:, D + hh * dh:D + (hh + 1) * dh]
                v = qkv[:, 2 * D + hh * dh:2 * D + (hh + 1) * dh]
                # all rows at once; off-row-block pairs masked to -1e30
                s = jnp.dot(q, k.T, preferred_element_type=f32) + bias
                s = s - jnp.max(s, axis=-1, keepdims=True)
                e = jnp.exp(s)
                p = e * pl.reciprocal(jnp.sum(e, axis=-1, keepdims=True), approx=False)
                heads.append(jnp.dot(p, v, preferred_element_type=f32))
            attn = jnp.dot(jnp.concatenate(heads, axis=-1), wo_ref[l],
                           preferred_element_type=f32) + bo

            x1 = h + attn                                          # residual
            xn = _ln(x1, g1, be1)                                  # norm1
            y = _act(jnp.dot(xn, w1_ref[l], preferred_element_type=f32) + b1_ref[l])
            y = jnp.dot(y, w2_ref[l], preferred_element_type=f32) + b2
            h = _ln(xn + y, g2, be2)                               # norm2

        # ---- final encoder LayerNorm ----
        enc = encn_ref[...]
        h = _ln(h, enc[0:1, :], enc[1:2, :])                       # [RT, D]

        # ---- FlattenHead (merged): one matmul + patch-select mask + block-sum
        sel = jnp.dot(h, whead_ref[...], preferred_element_type=f32) * hmask_ref[...]
        acc = sel[:, 0:P]
        for p_ in range(1, NP):
            acc = acc + sel[:, p_ * P:(p_ + 1) * P]                # [RT, P]
        head = jnp.dot(bsum_ref[...], acc, preferred_element_type=f32)  # [R, P]

        # ---- RevIN 'denorm' folded into per-row scale / shift (incl. b_head)
        rd = rowdn_ref[...]                                        # [R, 1+P]
        out_ref[...] = (head * rd[:, 0:1] + rd[:, 1:]).astype(out_ref.dtype)

    def forward(packed, x_enc, x_mark_enc=None, x_dec=None, x_mark_dec=None, mask=None):
        B, L, C = x_enc.shape
        BN = B * C
        G = 2 if (BN % 2 == 0 and _dual_core_chip()) else 1
        R = BN // G            # rows (b, channel) per grid step
        RT = R * NP            # tokens per grid step

        # ---- XLA glue: layout plumbing + tiny per-row RevIN coefficients ----
        x_bcl = jnp.transpose(x_enc, (0, 2, 1))                    # [B, C, L]
        x_rows = x_bcl.reshape(BN, L)
        mu = jnp.mean(x_rows, axis=-1, keepdims=True)
        var = jnp.mean((x_rows - mu) ** 2, axis=-1, keepdims=True)  # unbiased=False
        std = jnp.sqrt(var + REVIN_EPS)
        inv_std = jax.lax.rsqrt(var + REVIN_EPS)
        rw = jnp.broadcast_to(packed["revw"][None, :], (B, C)).reshape(BN, 1)
        rb = jnp.broadcast_to(packed["revb"][None, :], (B, C)).reshape(BN, 1)
        a = inv_std * rw                                           # norm scale
        c = rb - mu * a                                            # norm shift
        tokstats = jnp.repeat(jnp.concatenate([a, c], axis=-1), NP, axis=0)  # [BN*NP, 2]
        dscale = std / (rw + REVIN_EPS * REVIN_EPS)                # denorm scale
        dshift = mu + (packed["bhead"] - rb) * dscale              # denorm shift (+ head bias)
        rowdn = jnp.concatenate([dscale, dshift], axis=-1)         # [BN, 1+P]

        # ReplicationPad1d((0, stride)) + unfold(patch_len, stride) on RAW data
        # (padding replicates the last sample; per-channel affine normalization
        #  commutes with it).
        padded = jnp.concatenate(
            [x_bcl, jnp.repeat(x_bcl[..., -1:], cfg.stride, axis=-1)], axis=-1)
        patches = jnp.stack(
            [padded[..., i * cfg.stride:i * cfg.stride + PLN] for i in range(NP)],
            axis=2).reshape(BN * NP, PLN)

        pos_tiled = jnp.tile(packed["pos"], (R, 1))                # [RT, D]

        # trace-time constant masks (token i belongs to row-block i // NP)
        tok_blk = np.arange(RT) // NP
        attn_bias = jnp.asarray(
            np.where(np.equal.outer(tok_blk, tok_blk), 0.0, NEG_INF), jnp.float32)
        hmask = jnp.asarray(
            (np.arange(RT)[:, None] % NP == (np.arange(NP * P) // P)[None, :]
             ).astype(np.float32))                                 # [RT, NP*P]
        bsum = jnp.asarray(
            (np.arange(R)[:, None] == tok_blk[None, :]).astype(np.float32))  # [R, RT]

        def cspec(shape):
            n = len(shape)
            return pl.BlockSpec(shape, lambda i, _n=n: (0,) * _n)

        def rspec(tail):
            n = len(tail)
            return pl.BlockSpec((None,) + tail, lambda i, _n=n: (i,) + (0,) * _n)

        in_specs = [
            rspec((RT, PLN)),          # patches (raw)
            rspec((RT, 2)),            # per-token RevIN norm scale/shift
            rspec((R, 1 + P)),         # per-row denorm scale/shift
            cspec((PLN, D)),           # W_val
            cspec((RT, D)),            # positional embedding (tiled)
            cspec((RT, RT)),           # block-diagonal attention bias
            cspec((EL, D, 3 * D)),     # Wqkv
            cspec((EL, 1, 3 * D)),     # bqkv
            cspec((EL, D, D)),         # Wo
            cspec((EL, D, Dff)),       # W1
            cspec((EL, 1, Dff)),       # b1
            cspec((EL, Dff, D)),       # W2
            cspec((EL, 6, D)),         # bo/b2/ln1g/ln1b/ln2g/ln2b
            cspec((2, D)),             # final encoder norm gamma/beta
            cspec((D, NP * P)),        # head weight (column block per patch)
            cspec((RT, NP * P)),       # head patch-selection mask
            cspec((R, RT)),            # block-sum matrix
        ]

        out = pl.pallas_call(
            kernel,
            grid=(G,),
            in_specs=in_specs,
            out_specs=rspec((R, P)),
            out_shape=jax.ShapeDtypeStruct((G, R, P), jnp.float32),
            compiler_params=pltpu.CompilerParams(
                dimension_semantics=("parallel",)),
        )(patches.reshape(G, RT, PLN),
          tokstats.reshape(G, RT, 2),
          rowdn.reshape(G, R, 1 + P),
          packed["W_val"], pos_tiled, attn_bias,
          packed["Wqkv"], packed["bqkv"], packed["Wo"],
          packed["W1"], packed["b1"], packed["W2"],
          packed["vecD"], packed["encnorm"],
          packed["Whead"], hmask, bsum)

        # [G, R, P] -> [B, C, P] -> permute(0, 2, 1) -> [B, pred_len, C]
        return jnp.transpose(out.reshape(B, C, P), (0, 2, 1))

    return forward


# ----------------------------------- main -----------------------------------

if __name__ == "__main__":
    cfg = Configs()
    key = jax.random.PRNGKey(0)
    k_param, k_x, k_xm, k_xd, k_xmd = jax.random.split(key, 5)

    params, num_patch = init_params(cfg, k_param)
    packed = pack_params(params, cfg, num_patch)

    B = 2
    x_enc = jax.random.normal(k_x, (B, cfg.seq_len, cfg.enc_in), dtype=jnp.float32)
    x_mark_enc = jax.random.normal(k_xm, (B, cfg.seq_len, 4), dtype=jnp.float32)       # unused
    x_dec = jax.random.normal(k_xd, (B, cfg.pred_len, cfg.enc_in), dtype=jnp.float32)  # unused
    x_mark_dec = jax.random.normal(k_xmd, (B, cfg.pred_len, 4), dtype=jnp.float32)     # unused

    forward = make_forward(cfg, num_patch)
    fwd = jax.jit(lambda p, xe: forward(p, xe, x_mark_enc, x_dec, x_mark_dec))

    y = fwd(packed, x_enc)
    jax.block_until_ready(y)
    assert y.shape == (B, cfg.pred_len, cfg.enc_in)
    assert bool(jnp.all(jnp.isfinite(y)))
    print("KERNEL_OK")
</pallas_src>

<mosaic_0001>
module attributes {stable_mosaic.version = 11 : i64} {
  func.func @kernel(%arg0: i32, %arg1: memref<1x40x4xf32, #tpu.memory_space<vmem>>, %arg2: memref<1x40x2xf32, #tpu.memory_space<vmem>>, %arg3: memref<1x8x9xf32, #tpu.memory_space<vmem>>, %arg4: memref<4x32xf32, #tpu.memory_space<vmem>>, %arg5: memref<40x32xf32, #tpu.memory_space<vmem>>, %arg6: memref<40x40xf32, #tpu.memory_space<vmem>>, %arg7: memref<2x32x96xf32, #tpu.memory_space<vmem>>, %arg8: memref<2x1x96xf32, #tpu.memory_space<vmem>>, %arg9: memref<2x32x32xf32, #tpu.memory_space<vmem>>, %arg10: memref<2x32x64xf32, #tpu.memory_space<vmem>>, %arg11: memref<2x1x64xf32, #tpu.memory_space<vmem>>, %arg12: memref<2x64x32xf32, #tpu.memory_space<vmem>>, %arg13: memref<2x6x32xf32, #tpu.memory_space<vmem>>, %arg14: memref<2x32xf32, #tpu.memory_space<vmem>>, %arg15: memref<32x40xf32, #tpu.memory_space<vmem>>, %arg16: memref<40x40xf32, #tpu.memory_space<vmem>>, %arg17: memref<8x40xf32, #tpu.memory_space<vmem>>, %arg18: memref<1x8x8xf32, #tpu.memory_space<vmem>>) attributes {dimension_semantics = [#tpu.dimension_semantics<parallel>], iteration_bounds = array<i64: 1>, scalar_prefetch = 0 : i64, scratch_operands = 0 : i64, tpu.core_type = #tpu.core_type<tc>, window_params = [{transform_indices = @transform_0, window_bounds = array<i64: 1, 40, 4>}, {transform_indices = @transform_1, window_bounds = array<i64: 1, 40, 2>}, {transform_indices = @transform_2, window_bounds = array<i64: 1, 8, 9>}, {pipeline_mode = #tpu.pipeline_mode<synchronous>, transform_indices = @transform_3, window_bounds = array<i64: 4, 32>}, {pipeline_mode = #tpu.pipeline_mode<synchronous>, transform_indices = @transform_4, window_bounds = array<i64: 40, 32>}, {pipeline_mode = #tpu.pipeline_mode<synchronous>, transform_indices = @transform_5, window_bounds = array<i64: 40, 40>}, {pipeline_mode = #tpu.pipeline_mode<synchronous>, transform_indices = @transform_6, window_bounds = array<i64: 2, 32, 96>}, {pipeline_mode = #tpu.pipeline_mode<synchronous>, transform_indices = @transform_7, window_bounds = array<i64: 2, 1, 96>}, {pipeline_mode = #tpu.pipeline_mode<synchronous>, transform_indices = @transform_8, window_bounds = array<i64: 2, 32, 32>}, {pipeline_mode = #tpu.pipeline_mode<synchronous>, transform_indices = @transform_9, window_bounds = array<i64: 2, 32, 64>}, {pipeline_mode = #tpu.pipeline_mode<synchronous>, transform_indices = @transform_10, window_bounds = array<i64: 2, 1, 64>}, {pipeline_mode = #tpu.pipeline_mode<synchronous>, transform_indices = @transform_11, window_bounds = array<i64: 2, 64, 32>}, {pipeline_mode = #tpu.pipeline_mode<synchronous>, transform_indices = @transform_12, window_bounds = array<i64: 2, 6, 32>}, {pipeline_mode = #tpu.pipeline_mode<synchronous>, transform_indices = @transform_13, window_bounds = array<i64: 2, 32>}, {pipeline_mode = #tpu.pipeline_mode<synchronous>, transform_indices = @transform_14, window_bounds = array<i64: 32, 40>}, {pipeline_mode = #tpu.pipeline_mode<synchronous>, transform_indices = @transform_15, window_bounds = array<i64: 40, 40>}, {pipeline_mode = #tpu.pipeline_mode<synchronous>, transform_indices = @transform_16, window_bounds = array<i64: 8, 40>}, {transform_indices = @transform_17, window_bounds = array<i64: 1, 8, 8>}]} {
    %c0 = arith.constant 0 : index
    %c0_0 = arith.constant 0 : index
    %c0_1 = arith.constant 0 : index
    %0 = vector.load %arg2[%c0, %c0_0, %c0_1] : memref<1x40x2xf32, #tpu.memory_space<vmem>>, vector<1x40x2xf32>
    %1 = vector.shape_cast %0 : vector<1x40x2xf32> to vector<40x2xf32>
    %2 = vector.extract_strided_slice %1 {offsets = [0, 0], sizes = [40, 1], strides = [1, 1]} : vector<40x2xf32> to vector<40x1xf32>
    %3 = vector.extract_strided_slice %1 {offsets = [0, 1], sizes = [40, 1], strides = [1, 1]} : vector<40x2xf32> to vector<40x1xf32>
    %c0_2 = arith.constant 0 : index
    %c0_3 = arith.constant 0 : index
    %c0_4 = arith.constant 0 : index
    %4 = vector.load %arg1[%c0_2, %c0_3, %c0_4] : memref<1x40x4xf32, #tpu.memory_space<vmem>>, vector<1x40x4xf32>
    %5 = vector.shape_cast %4 : vector<1x40x4xf32> to vector<40x4xf32>
    %6 = vector.broadcast %2 : vector<40x1xf32> to vector<40x4xf32>
    %7 = arith.mulf %5, %6 : vector<40x4xf32>
    %8 = vector.broadcast %3 : vector<40x1xf32> to vector<40x4xf32>
    %9 = arith.addf %7, %8 : vector<40x4xf32>
    %c0_5 = arith.constant 0 : index
    %c0_6 = arith.constant 0 : index
    %10 = vector.load %arg4[%c0_5, %c0_6] : memref<4x32xf32, #tpu.memory_space<vmem>>, vector<4x32xf32>
    %cst = arith.constant dense<0.000000e+00> : vector<40x32xf32>
    %11 = tpu.matmul %9, %10, %cst {dimension_numbers = #tpu.dot_dimension_numbers<[1], [0], [0], [1], [0, 0, 1, 1], [], []>} : vector<40x4xf32>, vector<4x32xf32>, vector<40x32xf32> -> vector<40x32xf32>
    %c0_7 = arith.constant 0 : index
    %c0_8 = arith.constant 0 : index
    %12 = vector.load %arg5[%c0_7, %c0_8] : memref<40x32xf32, #tpu.memory_space<vmem>>, vector<40x32xf32>
    %13 = arith.addf %11, %12 : vector<40x32xf32>
    %c0_9 = arith.constant 0 : index
    %c0_10 = arith.constant 0 : index
    %14 = vector.load %arg6[%c0_9, %c0_10] : memref<40x40xf32, #tpu.memory_space<vmem>>, vector<40x40xf32>
    %c0_11 = arith.constant 0 : index
    %c0_12 = arith.constant 0 : index
    %c0_13 = arith.constant 0 : index
    %15 = vector.load %arg13[%c0_11, %c0_12, %c0_13] : memref<2x6x32xf32, #tpu.memory_space<vmem>>, vector<1x6x32xf32>
    %16 = vector.shape_cast %15 : vector<1x6x32xf32> to vector<6x32xf32>
    %17 = vector.extract_strided_slice %16 {offsets = [0, 0], sizes = [1, 32], strides = [1, 1]} : vector<6x32xf32> to vector<1x32xf32>
    %18 = vector.extract_strided_slice %16 {offsets = [1, 0], sizes = [1, 32], strides = [1, 1]} : vector<6x32xf32> to vector<1x32xf32>
    %19 = vector.extract_strided_slice %16 {offsets = [2, 0], sizes = [1, 32], strides = [1, 1]} : vector<6x32xf32> to vector<1x32xf32>
    %20 = vector.extract_strided_slice %16 {offsets = [3, 0], sizes = [1, 32], strides = [1, 1]} : vector<6x32xf32> to vector<1x32xf32>
    %21 = vector.extract_strided_slice %16 {offsets = [4, 0], sizes = [1, 32], strides = [1, 1]} : vector<6x32xf32> to vector<1x32xf32>
    %22 = vector.extract_strided_slice %16 {offsets = [5, 0], sizes = [1, 32], strides = [1, 1]} : vector<6x32xf32> to vector<1x32xf32>
    %c0_14 = arith.constant 0 : index
    %c0_15 = arith.constant 0 : index
    %c0_16 = arith.constant 0 : index
    %23 = vector.load %arg7[%c0_14, %c0_15, %c0_16] : memref<2x32x96xf32, #tpu.memory_space<vmem>>, vector<1x32x96xf32>
    %24 = vector.shape_cast %23 : vector<1x32x96xf32> to vector<32x96xf32>
    %cst_17 = arith.constant dense<0.000000e+00> : vector<40x96xf32>
    %25 = tpu.matmul %13, %24, %cst_17 {dimension_numbers = #tpu.dot_dimension_numbers<[1], [0], [0], [1], [0, 0, 1, 1], [], []>} : vector<40x32xf32>, vector<32x96xf32>, vector<40x96xf32> -> vector<40x96xf32>
    %c0_18 = arith.constant 0 : index
    %c0_19 = arith.constant 0 : index
    %c0_20 = arith.constant 0 : index
    %26 = vector.load %arg8[%c0_18, %c0_19, %c0_20] : memref<2x1x96xf32, #tpu.memory_space<vmem>>, vector<1x1x96xf32>
    %27 = vector.shape_cast %26 : vector<1x1x96xf32> to vector<1x96xf32>
    %28 = vector.broadcast %27 : vector<1x96xf32> to vector<40x96xf32>
    %29 = arith.addf %25, %28 : vector<40x96xf32>
    %30 = vector.extract_strided_slice %29 {offsets = [0, 0], sizes = [40, 8], strides = [1, 1]} : vector<40x96xf32> to vector<40x8xf32>
    %31 = vector.extract_strided_slice %29 {offsets = [0, 32], sizes = [40, 8], strides = [1, 1]} : vector<40x96xf32> to vector<40x8xf32>
    %32 = vector.extract_strided_slice %29 {offsets = [0, 64], sizes = [40, 8], strides = [1, 1]} : vector<40x96xf32> to vector<40x8xf32>
    %33 = tpu.transpose %31, [1, 0] : vector<40x8xf32> -> vector<8x40xf32>
    %cst_21 = arith.constant dense<0.000000e+00> : vector<40x40xf32>
    %34 = tpu.matmul %30, %33, %cst_21 {dimension_numbers = #tpu.dot_dimension_numbers<[1], [0], [0], [1], [0, 0, 1, 1], [], []>} : vector<40x8xf32>, vector<8x40xf32>, vector<40x40xf32> -> vector<40x40xf32>
    %35 = arith.addf %34, %14 : vector<40x40xf32>
    %cst_22 = arith.constant dense<0xFF800000> : vector<40xf32>
    %36 = vector.multi_reduction <maximumf>, %35, %cst_22 [1] : vector<40x40xf32> to vector<40xf32>
    %37 = vector.shape_cast %36 : vector<40xf32> to vector<40x1xf32>
    %38 = vector.broadcast %37 : vector<40x1xf32> to vector<40x40xf32>
    %39 = arith.subf %35, %38 : vector<40x40xf32>
    %40 = math.exp %39 : vector<40x40xf32>
    %cst_23 = arith.constant dense<0.000000e+00> : vector<40xf32>
    %41 = vector.multi_reduction <add>, %40, %cst_23 [1] : vector<40x40xf32> to vector<40xf32>
    %42 = vector.shape_cast %41 : vector<40xf32> to vector<40x1xf32>
    %43 = tpu.reciprocal %42 : vector<40x1xf32> -> vector<40x1xf32>
    %44 = vector.broadcast %43 : vector<40x1xf32> to vector<40x40xf32>
    %45 = arith.mulf %40, %44 : vector<40x40xf32>
    %cst_24 = arith.constant dense<0.000000e+00> : vector<40x8xf32>
    %46 = tpu.matmul %45, %32, %cst_24 {dimension_numbers = #tpu.dot_dimension_numbers<[1], [0], [0], [1], [0, 0, 1, 1], [], []>} : vector<40x40xf32>, vector<40x8xf32>, vector<40x8xf32> -> vector<40x8xf32>
    %47 = vector.extract_strided_slice %29 {offsets = [0, 8], sizes = [40, 8], strides = [1, 1]} : vector<40x96xf32> to vector<40x8xf32>
    %48 = vector.extract_strided_slice %29 {offsets = [0, 40], sizes = [40, 8], strides = [1, 1]} : vector<40x96xf32> to vector<40x8xf32>
    %49 = vector.extract_strided_slice %29 {offsets = [0, 72], sizes = [40, 8], strides = [1, 1]} : vector<40x96xf32> to vector<40x8xf32>
    %50 = tpu.transpose %48, [1, 0] : vector<40x8xf32> -> vector<8x40xf32>
    %cst_25 = arith.constant dense<0.000000e+00> : vector<40x40xf32>
    %51 = tpu.matmul %47, %50, %cst_25 {dimension_numbers = #tpu.dot_dimension_numbers<[1], [0], [0], [1], [0, 0, 1, 1], [], []>} : vector<40x8xf32>, vector<8x40xf32>, vector<40x40xf32> -> vector<40x40xf32>
    %52 = arith.addf %51, %14 : vector<40x40xf32>
    %cst_26 = arith.constant dense<0xFF800000> : vector<40xf32>
    %53 = vector.multi_reduction <maximumf>, %52, %cst_26 [1] : vector<40x40xf32> to vector<40xf32>
    %54 = vector.shape_cast %53 : vector<40xf32> to vector<40x1xf32>
    %55 = vector.broadcast %54 : vector<40x1xf32> to vector<40x40xf32>
    %56 = arith.subf %52, %55 : vector<40x40xf32>
    %57 = math.exp %56 : vector<40x40xf32>
    %cst_27 = arith.constant dense<0.000000e+00> : vector<40xf32>
    %58 = vector.multi_reduction <add>, %57, %cst_27 [1] : vector<40x40xf32> to vector<40xf32>
    %59 = vector.shape_cast %58 : vector<40xf32> to vector<40x1xf32>
    %60 = tpu.reciprocal %59 : vector<40x1xf32> -> vector<40x1xf32>
    %61 = vector.broadcast %60 : vector<40x1xf32> to vector<40x40xf32>
    %62 = arith.mulf %57, %61 : vector<40x40xf32>
    %cst_28 = arith.constant dense<0.000000e+00> : vector<40x8xf32>
    %63 = tpu.matmul %62, %49, %cst_28 {dimension_numbers = #tpu.dot_dimension_numbers<[1], [0], [0], [1], [0, 0, 1, 1], [], []>} : vector<40x40xf32>, vector<40x8xf32>, vector<40x8xf32> -> vector<40x8xf32>
    %64 = vector.extract_strided_slice %29 {offsets = [0, 16], sizes = [40, 8], strides = [1, 1]} : vector<40x96xf32> to vector<40x8xf32>
    %65 = vector.extract_strided_slice %29 {offsets = [0, 48], sizes = [40, 8], strides = [1, 1]} : vector<40x96xf32> to vector<40x8xf32>
    %66 = vector.extract_strided_slice %29 {offsets = [0, 80], sizes = [40, 8], strides = [1, 1]} : vector<40x96xf32> to vector<40x8xf32>
    %67 = tpu.transpose %65, [1, 0] : vector<40x8xf32> -> vector<8x40xf32>
    %cst_29 = arith.constant dense<0.000000e+00> : vector<40x40xf32>
    %68 = tpu.matmul %64, %67, %cst_29 {dimension_numbers = #tpu.dot_dimension_numbers<[1], [0], [0], [1], [0, 0, 1, 1], [], []>} : vector<40x8xf32>, vector<8x40xf32>, vector<40x40xf32> -> vector<40x40xf32>
    %69 = arith.addf %68, %14 : vector<40x40xf32>
    %cst_30 = arith.constant dense<0xFF800000> : vector<40xf32>
    %70 = vector.multi_reduction <maximumf>, %69, %cst_30 [1] : vector<40x40xf32> to vector<40xf32>
    %71 = vector.shape_cast %70 : vector<40xf32> to vector<40x1xf32>
    %72 = vector.broadcast %71 : vector<40x1xf32> to vector<40x40xf32>
    %73 = arith.subf %69, %72 : vector<40x40xf32>
    %74 = math.exp %73 : vector<40x40xf32>
    %cst_31 = arith.constant dense<0.000000e+00> : vector<40xf32>
    %75 = vector.multi_reduction <add>, %74, %cst_31 [1] : vector<40x40xf32> to vector<40xf32>
    %76 = vector.shape_cast %75 : vector<40xf32> to vector<40x1xf32>
    %77 = tpu.reciprocal %76 : vector<40x1xf32> -> vector<40x1xf32>
    %78 = vector.broadcast %77 : vector<40x1xf32> to vector<40x40xf32>
    %79 = arith.mulf %74, %78 : vector<40x40xf32>
    %cst_32 = arith.constant dense<0.000000e+00> : vector<40x8xf32>
    %80 = tpu.matmul %79, %66, %cst_32 {dimension_numbers = #tpu.dot_dimension_numbers<[1], [0], [0], [1], [0, 0, 1, 1], [], []>} : vector<40x40xf32>, vector<40x8xf32>, vector<40x8xf32> -> vector<40x8xf32>
    %81 = vector.extract_strided_slice %29 {offsets = [0, 24], sizes = [40, 8], strides = [1, 1]} : vector<40x96xf32> to vector<40x8xf32>
    %82 = vector.extract_strided_slice %29 {offsets = [0, 56], sizes = [40, 8], strides = [1, 1]} : vector<40x96xf32> to vector<40x8xf32>
    %83 = vector.extract_strided_slice %29 {offsets = [0, 88], sizes = [40, 8], strides = [1, 1]} : vector<40x96xf32> to vector<40x8xf32>
    %84 = tpu.transpose %82, [1, 0] : vector<40x8xf32> -> vector<8x40xf32>
    %cst_33 = arith.constant dense<0.000000e+00> : vector<40x40xf32>
    %85 = tpu.matmul %81, %84, %cst_33 {dimension_numbers = #tpu.dot_dimension_numbers<[1], [0], [0], [1], [0, 0, 1, 1], [], []>} : vector<40x8xf32>, vector<8x40xf32>, vector<40x40xf32> -> vector<40x40xf32>
    %86 = arith.addf %85, %14 : vector<40x40xf32>
    %cst_34 = arith.constant dense<0xFF800000> : vector<40xf32>
    %87 = vector.multi_reduction <maximumf>, %86, %cst_34 [1] : vector<40x40xf32> to vector<40xf32>
    %88 = vector.shape_cast %87 : vector<40xf32> to vector<40x1xf32>
    %89 = vector.broadcast %88 : vector<40x1xf32> to vector<40x40xf32>
    %90 = arith.subf %86, %89 : vector<40x40xf32>
    %91 = math.exp %90 : vector<40x40xf32>
    %cst_35 = arith.constant dense<0.000000e+00> : vector<40xf32>
    %92 = vector.multi_reduction <add>, %91, %cst_35 [1] : vector<40x40xf32> to vector<40xf32>
    %93 = vector.shape_cast %92 : vector<40xf32> to vector<40x1xf32>
    %94 = tpu.reciprocal %93 : vector<40x1xf32> -> vector<40x1xf32>
    %95 = vector.broadcast %94 : vector<40x1xf32> to vector<40x40xf32>
    %96 = arith.mulf %91, %95 : vector<40x40xf32>
    %cst_36 = arith.constant dense<0.000000e+00> : vector<40x8xf32>
    %97 = tpu.matmul %96, %83, %cst_36 {dimension_numbers = #tpu.dot_dimension_numbers<[1], [0], [0], [1], [0, 0, 1, 1], [], []>} : vector<40x40xf32>, vector<40x8xf32>, vector<40x8xf32> -> vector<40x8xf32>
    %98 = tpu.concatenate %46, %63, %80, %97 in 1 : vector<40x8xf32>, vector<40x8xf32>, vector<40x8xf32>, vector<40x8xf32> -> vector<40x32xf32>
    %c0_37 = arith.constant 0 : index
    %c0_38 = arith.constant 0 : index
    %c0_39 = arith.constant 0 : index
    %99 = vector.load %arg9[%c0_37, %c0_38, %c0_39] : memref<2x32x32xf32, #tpu.memory_space<vmem>>, vector<1x32x32xf32>
    %100 = vector.shape_cast %99 : vector<1x32x32xf32> to vector<32x32xf32>
    %cst_40 = arith.constant dense<0.000000e+00> : vector<40x32xf32>
    %101 = tpu.matmul %98, %100, %cst_40 {dimension_numbers = #tpu.dot_dimension_numbers<[1], [0], [0], [1], [0, 0, 1, 1], [], []>} : vector<40x32xf32>, vector<32x32xf32>, vector<40x32xf32> -> vector<40x32xf32>
    %102 = vector.broadcast %17 : vector<1x32xf32> to vector<40x32xf32>
    %103 = arith.addf %101, %102 : vector<40x32xf32>
    %104 = arith.addf %13, %103 : vector<40x32xf32>
    %cst_41 = arith.constant dense<0.000000e+00> : vector<40xf32>
    %105 = vector.multi_reduction <add>, %104, %cst_41 [1] : vector<40x32xf32> to vector<40xf32>
    %106 = vector.shape_cast %105 : vector<40xf32> to vector<40x1xf32>
    %cst_42 = arith.constant 3.200000e+01 : f32
    %107 = vector.broadcast %cst_42 : f32 to vector<40x1xf32>
    %108 = arith.divf %106, %107 : vector<40x1xf32>
    %109 = vector.broadcast %108 : vector<40x1xf32> to vector<40x32xf32>
    %110 = arith.subf %104, %109 : vector<40x32xf32>
    %111 = arith.mulf %110, %110 : vector<40x32xf32>
    %cst_43 = arith.constant dense<0.000000e+00> : vector<40xf32>
    %112 = vector.multi_reduction <add>, %111, %cst_43 [1] : vector<40x32xf32> to vector<40xf32>
    %113 = vector.shape_cast %112 : vector<40xf32> to vector<40x1xf32>
    %cst_44 = arith.constant 3.200000e+01 : f32
    %114 = vector.broadcast %cst_44 : f32 to vector<40x1xf32>
    %115 = arith.divf %113, %114 : vector<40x1xf32>
    %116 = vector.broadcast %108 : vector<40x1xf32> to vector<40x32xf32>
    %117 = arith.subf %104, %116 : vector<40x32xf32>
    %cst_45 = arith.constant 9.99999974E-6 : f32
    %118 = vector.broadcast %cst_45 : f32 to vector<40x1xf32>
    %119 = arith.addf %115, %118 : vector<40x1xf32>
    %120 = math.rsqrt %119 : vector<40x1xf32>
    %121 = vector.broadcast %120 : vector<40x1xf32> to vector<40x32xf32>
    %122 = arith.mulf %117, %121 : vector<40x32xf32>
    %123 = vector.broadcast %19 : vector<1x32xf32> to vector<40x32xf32>
    %124 = arith.mulf %122, %123 : vector<40x32xf32>
    %125 = vector.broadcast %20 : vector<1x32xf32> to vector<40x32xf32>
    %126 = arith.addf %124, %125 : vector<40x32xf32>
    %c0_46 = arith.constant 0 : index
    %c0_47 = arith.constant 0 : index
    %c0_48 = arith.constant 0 : index
    %127 = vector.load %arg10[%c0_46, %c0_47, %c0_48] : memref<2x32x64xf32, #tpu.memory_space<vmem>>, vector<1x32x64xf32>
    %128 = vector.shape_cast %127 : vector<1x32x64xf32> to vector<32x64xf32>
    %cst_49 = arith.constant dense<0.000000e+00> : vector<40x64xf32>
    %129 = tpu.matmul %126, %128, %cst_49 {dimension_numbers = #tpu.dot_dimension_numbers<[1], [0], [0], [1], [0, 0, 1, 1], [], []>} : vector<40x32xf32>, vector<32x64xf32>, vector<40x64xf32> -> vector<40x64xf32>
    %c0_50 = arith.constant 0 : index
    %c0_51 = arith.constant 0 : index
    %c0_52 = arith.constant 0 : index
    %130 = vector.load %arg11[%c0_50, %c0_51, %c0_52] : memref<2x1x64xf32, #tpu.memory_space<vmem>>, vector<1x1x64xf32>
    %131 = vector.shape_cast %130 : vector<1x1x64xf32> to vector<1x64xf32>
    %132 = vector.broadcast %131 : vector<1x64xf32> to vector<40x64xf32>
    %133 = arith.addf %129, %132 : vector<40x64xf32>
    %cst_53 = arith.constant 0.000000e+00 : f32
    %134 = vector.broadcast %cst_53 : f32 to vector<40x64xf32>
    %135 = arith.maximumf %133, %134 : vector<40x64xf32>
    %c0_54 = arith.constant 0 : index
    %c0_55 = arith.constant 0 : index
    %c0_56 = arith.constant 0 : index
    %136 = vector.load %arg12[%c0_54, %c0_55, %c0_56] : memref<2x64x32xf32, #tpu.memory_space<vmem>>, vector<1x64x32xf32>
    %137 = vector.shape_cast %136 : vector<1x64x32xf32> to vector<64x32xf32>
    %cst_57 = arith.constant dense<0.000000e+00> : vector<40x32xf32>
    %138 = tpu.matmul %135, %137, %cst_57 {dimension_numbers = #tpu.dot_dimension_numbers<[1], [0], [0], [1], [0, 0, 1, 1], [], []>} : vector<40x64xf32>, vector<64x32xf32>, vector<40x32xf32> -> vector<40x32xf32>
    %139 = vector.broadcast %18 : vector<1x32xf32> to vector<40x32xf32>
    %140 = arith.addf %138, %139 : vector<40x32xf32>
    %141 = arith.addf %126, %140 : vector<40x32xf32>
    %cst_58 = arith.constant dense<0.000000e+00> : vector<40xf32>
    %142 = vector.multi_reduction <add>, %141, %cst_58 [1] : vector<40x32xf32> to vector<40xf32>
    %143 = vector.shape_cast %142 : vector<40xf32> to vector<40x1xf32>
    %cst_59 = arith.constant 3.200000e+01 : f32
    %144 = vector.broadcast %cst_59 : f32 to vector<40x1xf32>
    %145 = arith.divf %143, %144 : vector<40x1xf32>
    %146 = vector.broadcast %145 : vector<40x1xf32> to vector<40x32xf32>
    %147 = arith.subf %141, %146 : vector<40x32xf32>
    %148 = arith.mulf %147, %147 : vector<40x32xf32>
    %cst_60 = arith.constant dense<0.000000e+00> : vector<40xf32>
    %149 = vector.multi_reduction <add>, %148, %cst_60 [1] : vector<40x32xf32> to vector<40xf32>
    %150 = vector.shape_cast %149 : vector<40xf32> to vector<40x1xf32>
    %cst_61 = arith.constant 3.200000e+01 : f32
    %151 = vector.broadcast %cst_61 : f32 to vector<40x1xf32>
    %152 = arith.divf %150, %151 : vector<40x1xf32>
    %153 = vector.broadcast %145 : vector<40x1xf32> to vector<40x32xf32>
    %154 = arith.subf %141, %153 : vector<40x32xf32>
    %cst_62 = arith.constant 9.99999974E-6 : f32
    %155 = vector.broadcast %cst_62 : f32 to vector<40x1xf32>
    %156 = arith.addf %152, %155 : vector<40x1xf32>
    %157 = math.rsqrt %156 : vector<40x1xf32>
    %158 = vector.broadcast %157 : vector<40x1xf32> to vector<40x32xf32>
    %159 = arith.mulf %154, %158 : vector<40x32xf32>
    %160 = vector.broadcast %21 : vector<1x32xf32> to vector<40x32xf32>
    %161 = arith.mulf %159, %160 : vector<40x32xf32>
    %162 = vector.broadcast %22 : vector<1x32xf32> to vector<40x32xf32>
    %163 = arith.addf %161, %162 : vector<40x32xf32>
    %c1 = arith.constant 1 : index
    %c0_63 = arith.constant 0 : index
    %c0_64 = arith.constant 0 : index
    %164 = vector.load %arg13[%c1, %c0_63, %c0_64] : memref<2x6x32xf32, #tpu.memory_space<vmem>>, vector<1x6x32xf32>
    %165 = vector.shape_cast %164 : vector<1x6x32xf32> to vector<6x32xf32>
    %166 = vector.extract_strided_slice %165 {offsets = [0, 0], sizes = [1, 32], strides = [1, 1]} : vector<6x32xf32> to vector<1x32xf32>
    %167 = vector.extract_strided_slice %165 {offsets = [1, 0], sizes = [1, 32], strides = [1, 1]} : vector<6x32xf32> to vector<1x32xf32>
    %168 = vector.extract_strided_slice %165 {offsets = [2, 0], sizes = [1, 32], strides = [1, 1]} : vector<6x32xf32> to vector<1x32xf32>
    %169 = vector.extract_strided_slice %165 {offsets = [3, 0], sizes = [1, 32], strides = [1, 1]} : vector<6x32xf32> to vector<1x32xf32>
    %170 = vector.extract_strided_slice %165 {offsets = [4, 0], sizes = [1, 32], strides = [1, 1]} : vector<6x32xf32> to vector<1x32xf32>
    %171 = vector.extract_strided_slice %165 {offsets = [5, 0], sizes = [1, 32], strides = [1, 1]} : vector<6x32xf32> to vector<1x32xf32>
    %c1_65 = arith.constant 1 : index
    %c0_66 = arith.constant 0 : index
    %c0_67 = arith.constant 0 : index
    %172 = vector.load %arg7[%c1_65, %c0_66, %c0_67] : memref<2x32x96xf32, #tpu.memory_space<vmem>>, vector<1x32x96xf32>
    %173 = vector.shape_cast %172 : vector<1x32x96xf32> to vector<32x96xf32>
    %cst_68 = arith.constant dense<0.000000e+00> : vector<40x96xf32>
    %174 = tpu.matmul %163, %173, %cst_68 {dimension_numbers = #tpu.dot_dimension_numbers<[1], [0], [0], [1], [0, 0, 1, 1], [], []>} : vector<40x32xf32>, vector<32x96xf32>, vector<40x96xf32> -> vector<40x96xf32>
    %c1_69 = arith.constant 1 : index
    %c0_70 = arith.constant 0 : index
    %c0_71 = arith.constant 0 : index
    %175 = vector.load %arg8[%c1_69, %c0_70, %c0_71] : memref<2x1x96xf32, #tpu.memory_space<vmem>>, vector<1x1x96xf32>
    %176 = vector.shape_cast %175 : vector<1x1x96xf32> to vector<1x96xf32>
    %177 = vector.broadcast %176 : vector<1x96xf32> to vector<40x96xf32>
    %178 = arith.addf %174, %177 : vector<40x96xf32>
    %179 = vector.extract_strided_slice %178 {offsets = [0, 0], sizes = [40, 8], strides = [1, 1]} : vector<40x96xf32> to vector<40x8xf32>
    %180 = vector.extract_strided_slice %178 {offsets = [0, 32], sizes = [40, 8], strides = [1, 1]} : vector<40x96xf32> to vector<40x8xf32>
    %181 = vector.extract_strided_slice %178 {offsets = [0, 64], sizes = [40, 8], strides = [1, 1]} : vector<40x96xf32> to vector<40x8xf32>
    %182 = tpu.transpose %180, [1, 0] : vector<40x8xf32> -> vector<8x40xf32>
    %cst_72 = arith.constant dense<0.000000e+00> : vector<40x40xf32>
    %183 = tpu.matmul %179, %182, %cst_72 {dimension_numbers = #tpu.dot_dimension_numbers<[1], [0], [0], [1], [0, 0, 1, 1], [], []>} : vector<40x8xf32>, vector<8x40xf32>, vector<40x40xf32> -> vector<40x40xf32>
    %184 = arith.addf %183, %14 : vector<40x40xf32>
    %cst_73 = arith.constant dense<0xFF800000> : vector<40xf32>
    %185 = vector.multi_reduction <maximumf>, %184, %cst_73 [1] : vector<40x40xf32> to vector<40xf32>
    %186 = vector.shape_cast %185 : vector<40xf32> to vector<40x1xf32>
    %187 = vector.broadcast %186 : vector<40x1xf32> to vector<40x40xf32>
    %188 = arith.subf %184, %187 : vector<40x40xf32>
    %189 = math.exp %188 : vector<40x40xf32>
    %cst_74 = arith.constant dense<0.000000e+00> : vector<40xf32>
    %190 = vector.multi_reduction <add>, %189, %cst_74 [1] : vector<40x40xf32> to vector<40xf32>
    %191 = vector.shape_cast %190 : vector<40xf32> to vector<40x1xf32>
    %192 = tpu.reciprocal %191 : vector<40x1xf32> -> vector<40x1xf32>
    %193 = vector.broadcast %192 : vector<40x1xf32> to vector<40x40xf32>
    %194 = arith.mulf %189, %193 : vector<40x40xf32>
    %cst_75 = arith.constant dense<0.000000e+00> : vector<40x8xf32>
    %195 = tpu.matmul %194, %181, %cst_75 {dimension_numbers = #tpu.dot_dimension_numbers<[1], [0], [0], [1], [0, 0, 1, 1], [], []>} : vector<40x40xf32>, vector<40x8xf32>, vector<40x8xf32> -> vector<40x8xf32>
    %196 = vector.extract_strided_slice %178 {offsets = [0, 8], sizes = [40, 8], strides = [1, 1]} : vector<40x96xf32> to vector<40x8xf32>
    %197 = vector.extract_strided_slice %178 {offsets = [0, 40], sizes = [40, 8], strides = [1, 1]} : vector<40x96xf32> to vector<40x8xf32>
    %198 = vector.extract_strided_slice %178 {offsets = [0, 72], sizes = [40, 8], strides = [1, 1]} : vector<40x96xf32> to vector<40x8xf32>
    %199 = tpu.transpose %197, [1, 0] : vector<40x8xf32> -> vector<8x40xf32>
    %cst_76 = arith.constant dense<0.000000e+00> : vector<40x40xf32>
    %200 = tpu.matmul %196, %199, %cst_76 {dimension_numbers = #tpu.dot_dimension_numbers<[1], [0], [0], [1], [0, 0, 1, 1], [], []>} : vector<40x8xf32>, vector<8x40xf32>, vector<40x40xf32> -> vector<40x40xf32>
    %201 = arith.addf %200, %14 : vector<40x40xf32>
    %cst_77 = arith.constant dense<0xFF800000> : vector<40xf32>
    %202 = vector.multi_reduction <maximumf>, %201, %cst_77 [1] : vector<40x40xf32> to vector<40xf32>
    %203 = vector.shape_cast %202 : vector<40xf32> to vector<40x1xf32>
    %204 = vector.broadcast %203 : vector<40x1xf32> to vector<40x40xf32>
    %205 = arith.subf %201, %204 : vector<40x40xf32>
    %206 = math.exp %205 : vector<40x40xf32>
    %cst_78 = arith.constant dense<0.000000e+00> : vector<40xf32>
    %207 = vector.multi_reduction <add>, %206, %cst_78 [1] : vector<40x40xf32> to vector<40xf32>
    %208 = vector.shape_cast %207 : vector<40xf32> to vector<40x1xf32>
    %209 = tpu.reciprocal %208 : vector<40x1xf32> -> vector<40x1xf32>
    %210 = vector.broadcast %209 : vector<40x1xf32> to vector<40x40xf32>
    %211 = arith.mulf %206, %210 : vector<40x40xf32>
    %cst_79 = arith.constant dense<0.000000e+00> : vector<40x8xf32>
    %212 = tpu.matmul %211, %198, %cst_79 {dimension_numbers = #tpu.dot_dimension_numbers<[1], [0], [0], [1], [0, 0, 1, 1], [], []>} : vector<40x40xf32>, vector<40x8xf32>, vector<40x8xf32> -> vector<40x8xf32>
    %213 = vector.extract_strided_slice %178 {offsets = [0, 16], sizes = [40, 8], strides = [1, 1]} : vector<40x96xf32> to vector<40x8xf32>
    %214 = vector.extract_strided_slice %178 {offsets = [0, 48], sizes = [40, 8], strides = [1, 1]} : vector<40x96xf32> to vector<40x8xf32>
    %215 = vector.extract_strided_slice %178 {offsets = [0, 80], sizes = [40, 8], strides = [1, 1]} : vector<40x96xf32> to vector<40x8xf32>
    %216 = tpu.transpose %214, [1, 0] : vector<40x8xf32> -> vector<8x40xf32>
    %cst_80 = arith.constant dense<0.000000e+00> : vector<40x40xf32>
    %217 = tpu.matmul %213, %216, %cst_80 {dimension_numbers = #tpu.dot_dimension_numbers<[1], [0], [0], [1], [0, 0, 1, 1], [], []>} : vector<40x8xf32>, vector<8x40xf32>, vector<40x40xf32> -> vector<40x40xf32>
    %218 = arith.addf %217, %14 : vector<40x40xf32>
    %cst_81 = arith.constant dense<0xFF800000> : vector<40xf32>
    %219 = vector.multi_reduction <maximumf>, %218, %cst_81 [1] : vector<40x40xf32> to vector<40xf32>
    %220 = vector.shape_cast %219 : vector<40xf32> to vector<40x1xf32>
    %221 = vector.broadcast %220 : vector<40x1xf32> to vector<40x40xf32>
    %222 = arith.subf %218, %221 : vector<40x40xf32>
    %223 = math.exp %222 : vector<40x40xf32>
    %cst_82 = arith.constant dense<0.000000e+00> : vector<40xf32>
    %224 = vector.multi_reduction <add>, %223, %cst_82 [1] : vector<40x40xf32> to vector<40xf32>
    %225 = vector.shape_cast %224 : vector<40xf32> to vector<40x1xf32>
    %226 = tpu.reciprocal %225 : vector<40x1xf32> -> vector<40x1xf32>
    %227 = vector.broadcast %226 : vector<40x1xf32> to vector<40x40xf32>
    %228 = arith.mulf %223, %227 : vector<40x40xf32>
    %cst_83 = arith.constant dense<0.000000e+00> : vector<40x8xf32>
    %229 = tpu.matmul %228, %215, %cst_83 {dimension_numbers = #tpu.dot_dimension_numbers<[1], [0], [0], [1], [0, 0, 1, 1], [], []>} : vector<40x40xf32>, vector<40x8xf32>, vector<40x8xf32> -> vector<40x8xf32>
    %230 = vector.extract_strided_slice %178 {offsets = [0, 24], sizes = [40, 8], strides = [1, 1]} : vector<40x96xf32> to vector<40x8xf32>
    %231 = vector.extract_strided_slice %178 {offsets = [0, 56], sizes = [40, 8], strides = [1, 1]} : vector<40x96xf32> to vector<40x8xf32>
    %232 = vector.extract_strided_slice %178 {offsets = [0, 88], sizes = [40, 8], strides = [1, 1]} : vector<40x96xf32> to vector<40x8xf32>
    %233 = tpu.transpose %231, [1, 0] : vector<40x8xf32> -> vector<8x40xf32>
    %cst_84 = arith.constant dense<0.000000e+00> : vector<40x40xf32>
    %234 = tpu.matmul %230, %233, %cst_84 {dimension_numbers = #tpu.dot_dimension_numbers<[1], [0], [0], [1], [0, 0, 1, 1], [], []>} : vector<40x8xf32>, vector<8x40xf32>, vector<40x40xf32> -> vector<40x40xf32>
    %235 = arith.addf %234, %14 : vector<40x40xf32>
    %cst_85 = arith.constant dense<0xFF800000> : vector<40xf32>
    %236 = vector.multi_reduction <maximumf>, %235, %cst_85 [1] : vector<40x40xf32> to vector<40xf32>
    %237 = vector.shape_cast %236 : vector<40xf32> to vector<40x1xf32>
    %238 = vector.broadcast %237 : vector<40x1xf32> to vector<40x40xf32>
    %239 = arith.subf %235, %238 : vector<40x40xf32>
    %240 = math.exp %239 : vector<40x40xf32>
    %cst_86 = arith.constant dense<0.000000e+00> : vector<40xf32>
    %241 = vector.multi_reduction <add>, %240, %cst_86 [1] : vector<40x40xf32> to vector<40xf32>
    %242 = vector.shape_cast %241 : vector<40xf32> to vector<40x1xf32>
    %243 = tpu.reciprocal %242 : vector<40x1xf32> -> vector<40x1xf32>
    %244 = vector.broadcast %243 : vector<40x1xf32> to vector<40x40xf32>
    %245 = arith.mulf %240, %244 : vector<40x40xf32>
    %cst_87 = arith.constant dense<0.000000e+00> : vector<40x8xf32>
    %246 = tpu.matmul %245, %232, %cst_87 {dimension_numbers = #tpu.dot_dimension_numbers<[1], [0], [0], [1], [0, 0, 1, 1], [], []>} : vector<40x40xf32>, vector<40x8xf32>, vector<40x8xf32> -> vector<40x8xf32>
    %247 = tpu.concatenate %195, %212, %229, %246 in 1 : vector<40x8xf32>, vector<40x8xf32>, vector<40x8xf32>, vector<40x8xf32> -> vector<40x32xf32>
    %c1_88 = arith.constant 1 : index
    %c0_89 = arith.constant 0 : index
    %c0_90 = arith.constant 0 : index
    %248 = vector.load %arg9[%c1_88, %c0_89, %c0_90] : memref<2x32x32xf32, #tpu.memory_space<vmem>>, vector<1x32x32xf32>
    %249 = vector.shape_cast %248 : vector<1x32x32xf32> to vector<32x32xf32>
    %cst_91 = arith.constant dense<0.000000e+00> : vector<40x32xf32>
    %250 = tpu.matmul %247, %249, %cst_91 {dimension_numbers = #tpu.dot_dimension_numbers<[1], [0], [0], [1], [0, 0, 1, 1], [], []>} : vector<40x32xf32>, vector<32x32xf32>, vector<40x32xf32> -> vector<40x32xf32>
    %251 = vector.broadcast %166 : vector<1x32xf32> to vector<40x32xf32>
    %252 = arith.addf %250, %251 : vector<40x32xf32>
    %253 = arith.addf %163, %252 : vector<40x32xf32>
    %cst_92 = arith.constant dense<0.000000e+00> : vector<40xf32>
    %254 = vector.multi_reduction <add>, %253, %cst_92 [1] : vector<40x32xf32> to vector<40xf32>
    %255 = vector.shape_cast %254 : vector<40xf32> to vector<40x1xf32>
    %cst_93 = arith.constant 3.200000e+01 : f32
    %256 = vector.broadcast %cst_93 : f32 to vector<40x1xf32>
    %257 = arith.divf %255, %256 : vector<40x1xf32>
    %258 = vector.broadcast %257 : vector<40x1xf32> to vector<40x32xf32>
    %259 = arith.subf %253, %258 : vector<40x32xf32>
    %260 = arith.mulf %259, %259 : vector<40x32xf32>
    %cst_94 = arith.constant dense<0.000000e+00> : vector<40xf32>
    %261 = vector.multi_reduction <add>, %260, %cst_94 [1] : vector<40x32xf32> to vector<40xf32>
    %262 = vector.shape_cast %261 : vector<40xf32> to vector<40x1xf32>
    %cst_95 = arith.constant 3.200000e+01 : f32
    %263 = vector.broadcast %cst_95 : f32 to vector<40x1xf32>
    %264 = arith.divf %262, %263 : vector<40x1xf32>
    %265 = vector.broadcast %257 : vector<40x1xf32> to vector<40x32xf32>
    %266 = arith.subf %253, %265 : vector<40x32xf32>
    %cst_96 = arith.constant 9.99999974E-6 : f32
    %267 = vector.broadcast %cst_96 : f32 to vector<40x1xf32>
    %268 = arith.addf %264, %267 : vector<40x1xf32>
    %269 = math.rsqrt %268 : vector<40x1xf32>
    %270 = vector.broadcast %269 : vector<40x1xf32> to vector<40x32xf32>
    %271 = arith.mulf %266, %270 : vector<40x32xf32>
    %272 = vector.broadcast %168 : vector<1x32xf32> to vector<40x32xf32>
    %273 = arith.mulf %271, %272 : vector<40x32xf32>
    %274 = vector.broadcast %169 : vector<1x32xf32> to vector<40x32xf32>
    %275 = arith.addf %273, %274 : vector<40x32xf32>
    %c1_97 = arith.constant 1 : index
    %c0_98 = arith.constant 0 : index
    %c0_99 = arith.constant 0 : index
    %276 = vector.load %arg10[%c1_97, %c0_98, %c0_99] : memref<2x32x64xf32, #tpu.memory_space<vmem>>, vector<1x32x64xf32>
    %277 = vector.shape_cast %276 : vector<1x32x64xf32> to vector<32x64xf32>
    %cst_100 = arith.constant dense<0.000000e+00> : vector<40x64xf32>
    %278 = tpu.matmul %275, %277, %cst_100 {dimension_numbers = #tpu.dot_dimension_numbers<[1], [0], [0], [1], [0, 0, 1, 1], [], []>} : vector<40x32xf32>, vector<32x64xf32>, vector<40x64xf32> -> vector<40x64xf32>
    %c1_101 = arith.constant 1 : index
    %c0_102 = arith.constant 0 : index
    %c0_103 = arith.constant 0 : index
    %279 = vector.load %arg11[%c1_101, %c0_102, %c0_103] : memref<2x1x64xf32, #tpu.memory_space<vmem>>, vector<1x1x64xf32>
    %280 = vector.shape_cast %279 : vector<1x1x64xf32> to vector<1x64xf32>
    %281 = vector.broadcast %280 : vector<1x64xf32> to vector<40x64xf32>
    %282 = arith.addf %278, %281 : vector<40x64xf32>
    %cst_104 = arith.constant 0.000000e+00 : f32
    %283 = vector.broadcast %cst_104 : f32 to vector<40x64xf32>
    %284 = arith.maximumf %282, %283 : vector<40x64xf32>
    %c1_105 = arith.constant 1 : index
    %c0_106 = arith.constant 0 : index
    %c0_107 = arith.constant 0 : index
    %285 = vector.load %arg12[%c1_105, %c0_106, %c0_107] : memref<2x64x32xf32, #tpu.memory_space<vmem>>, vector<1x64x32xf32>
    %286 = vector.shape_cast %285 : vector<1x64x32xf32> to vector<64x32xf32>
    %cst_108 = arith.constant dense<0.000000e+00> : vector<40x32xf32>
    %287 = tpu.matmul %284, %286, %cst_108 {dimension_numbers = #tpu.dot_dimension_numbers<[1], [0], [0], [1], [0, 0, 1, 1], [], []>} : vector<40x64xf32>, vector<64x32xf32>, vector<40x32xf32> -> vector<40x32xf32>
    %288 = vector.broadcast %167 : vector<1x32xf32> to vector<40x32xf32>
    %289 = arith.addf %287, %288 : vector<40x32xf32>
    %290 = arith.addf %275, %289 : vector<40x32xf32>
    %cst_109 = arith.constant dense<0.000000e+00> : vector<40xf32>
    %291 = vector.multi_reduction <add>, %290, %cst_109 [1] : vector<40x32xf32> to vector<40xf32>
    %292 = vector.shape_cast %291 : vector<40xf32> to vector<40x1xf32>
    %cst_110 = arith.constant 3.200000e+01 : f32
    %293 = vector.broadcast %cst_110 : f32 to vector<40x1xf32>
    %294 = arith.divf %292, %293 : vector<40x1xf32>
    %295 = vector.broadcast %294 : vector<40x1xf32> to vector<40x32xf32>
    %296 = arith.subf %290, %295 : vector<40x32xf32>
    %297 = arith.mulf %296, %296 : vector<40x32xf32>
    %cst_111 = arith.constant dense<0.000000e+00> : vector<40xf32>
    %298 = vector.multi_reduction <add>, %297, %cst_111 [1] : vector<40x32xf32> to vector<40xf32>
    %299 = vector.shape_cast %298 : vector<40xf32> to vector<40x1xf32>
    %cst_112 = arith.constant 3.200000e+01 : f32
    %300 = vector.broadcast %cst_112 : f32 to vector<40x1xf32>
    %301 = arith.divf %299, %300 : vector<40x1xf32>
    %302 = vector.broadcast %294 : vector<40x1xf32> to vector<40x32xf32>
    %303 = arith.subf %290, %302 : vector<40x32xf32>
    %cst_113 = arith.constant 9.99999974E-6 : f32
    %304 = vector.broadcast %cst_113 : f32 to vector<40x1xf32>
    %305 = arith.addf %301, %304 : vector<40x1xf32>
    %306 = math.rsqrt %305 : vector<40x1xf32>
    %307 = vector.broadcast %306 : vector<40x1xf32> to vector<40x32xf32>
    %308 = arith.mulf %303, %307 : vector<40x32xf32>
    %309 = vector.broadcast %170 : vector<1x32xf32> to vector<40x32xf32>
    %310 = arith.mulf %308, %309 : vector<40x32xf32>
    %311 = vector.broadcast %171 : vector<1x32xf32> to vector<40x32xf32>
    %312 = arith.addf %310, %311 : vector<40x32xf32>
    %c0_114 = arith.constant 0 : index
    %c0_115 = arith.constant 0 : index
    %313 = vector.load %arg14[%c0_114, %c0_115] : memref<2x32xf32, #tpu.memory_space<vmem>>, vector<2x32xf32>
    %314 = vector.extract_strided_slice %313 {offsets = [0, 0], sizes = [1, 32], strides = [1, 1]} : vector<2x32xf32> to vector<1x32xf32>
    %315 = vector.extract_strided_slice %313 {offsets = [1, 0], sizes = [1, 32], strides = [1, 1]} : vector<2x32xf32> to vector<1x32xf32>
    %cst_116 = arith.constant dense<0.000000e+00> : vector<40xf32>
    %316 = vector.multi_reduction <add>, %312, %cst_116 [1] : vector<40x32xf32> to vector<40xf32>
    %317 = vector.shape_cast %316 : vector<40xf32> to vector<40x1xf32>
    %cst_117 = arith.constant 3.200000e+01 : f32
    %318 = vector.broadcast %cst_117 : f32 to vector<40x1xf32>
    %319 = arith.divf %317, %318 : vector<40x1xf32>
    %320 = vector.broadcast %319 : vector<40x1xf32> to vector<40x32xf32>
    %321 = arith.subf %312, %320 : vector<40x32xf32>
    %322 = arith.mulf %321, %321 : vector<40x32xf32>
    %cst_118 = arith.constant dense<0.000000e+00> : vector<40xf32>
    %323 = vector.multi_reduction <add>, %322, %cst_118 [1] : vector<40x32xf32> to vector<40xf32>
    %324 = vector.shape_cast %323 : vector<40xf32> to vector<40x1xf32>
    %cst_119 = arith.constant 3.200000e+01 : f32
    %325 = vector.broadcast %cst_119 : f32 to vector<40x1xf32>
    %326 = arith.divf %324, %325 : vector<40x1xf32>
    %327 = vector.broadcast %319 : vector<40x1xf32> to vector<40x32xf32>
    %328 = arith.subf %312, %327 : vector<40x32xf32>
    %cst_120 = arith.constant 9.99999974E-6 : f32
    %329 = vector.broadcast %cst_120 : f32 to vector<40x1xf32>
    %330 = arith.addf %326, %329 : vector<40x1xf32>
    %331 = math.rsqrt %330 : vector<40x1xf32>
    %332 = vector.broadcast %331 : vector<40x1xf32> to vector<40x32xf32>
    %333 = arith.mulf %328, %332 : vector<40x32xf32>
    %334 = vector.broadcast %314 : vector<1x32xf32> to vector<40x32xf32>
    %335 = arith.mulf %333, %334 : vector<40x32xf32>
    %336 = vector.broadcast %315 : vector<1x32xf32> to vector<40x32xf32>
    %337 = arith.addf %335, %336 : vector<40x32xf32>
    %c0_121 = arith.constant 0 : index
    %c0_122 = arith.constant 0 : index
    %338 = vector.load %arg15[%c0_121, %c0_122] : memref<32x40xf32, #tpu.memory_space<vmem>>, vector<32x40xf32>
    %cst_123 = arith.constant dense<0.000000e+00> : vector<40x40xf32>
    %339 = tpu.matmul %337, %338, %cst_123 {dimension_numbers = #tpu.dot_dimension_numbers<[1], [0], [0], [1], [0, 0, 1, 1], [], []>} : vector<40x32xf32>, vector<32x40xf32>, vector<40x40xf32> -> vector<40x40xf32>
    %c0_124 = arith.constant 0 : index
    %c0_125 = arith.constant 0 : index
    %340 = vector.load %arg16[%c0_124, %c0_125] : memref<40x40xf32, #tpu.memory_space<vmem>>, vector<40x40xf32>
    %341 = arith.mulf %339, %340 : vector<40x40xf32>
    %342 = vector.extract_strided_slice %341 {offsets = [0, 0], sizes = [40, 8], strides = [1, 1]} : vector<40x40xf32> to vector<40x8xf32>
    %343 = vector.extract_strided_slice %341 {offsets = [0, 8], sizes = [40, 8], strides = [1, 1]} : vector<40x40xf32> to vector<40x8xf32>
    %344 = arith.addf %342, %343 : vector<40x8xf32>
    %345 = vector.extract_strided_slice %341 {offsets = [0, 16], sizes = [40, 8], strides = [1, 1]} : vector<40x40xf32> to vector<40x8xf32>
    %346 = arith.addf %344, %345 : vector<40x8xf32>
    %347 = vector.extract_strided_slice %341 {offsets = [0, 24], sizes = [40, 8], strides = [1, 1]} : vector<40x40xf32> to vector<40x8xf32>
    %348 = arith.addf %346, %347 : vector<40x8xf32>
    %349 = vector.extract_strided_slice %341 {offsets = [0, 32], sizes = [40, 8], strides = [1, 1]} : vector<40x40xf32> to vector<40x8xf32>
    %350 = arith.addf %348, %349 : vector<40x8xf32>
    %c0_126 = arith.constant 0 : index
    %c0_127 = arith.constant 0 : index
    %351 = vector.load %arg17[%c0_126, %c0_127] : memref<8x40xf32, #tpu.memory_space<vmem>>, vector<8x40xf32>
    %cst_128 = arith.constant dense<0.000000e+00> : vector<8x8xf32>
    %352 = tpu.matmul %351, %350, %cst_128 {dimension_numbers = #tpu.dot_dimension_numbers<[1], [0], [0], [1], [0, 0, 1, 1], [], []>} : vector<8x40xf32>, vector<40x8xf32>, vector<8x8xf32> -> vector<8x8xf32>
    %c0_129 = arith.constant 0 : index
    %c0_130 = arith.constant 0 : index
    %c0_131 = arith.constant 0 : index
    %353 = vector.load %arg3[%c0_129, %c0_130, %c0_131] : memref<1x8x9xf32, #tpu.memory_space<vmem>>, vector<1x8x9xf32>
    %354 = vector.shape_cast %353 : vector<1x8x9xf32> to vector<8x9xf32>
    %355 = vector.extract_strided_slice %354 {offsets = [0, 0], sizes = [8, 1], strides = [1, 1]} : vector<8x9xf32> to vector<8x1xf32>
    %356 = vector.broadcast %355 : vector<8x1xf32> to vector<8x8xf32>
    %357 = arith.mulf %352, %356 : vector<8x8xf32>
    %358 = vector.extract_strided_slice %354 {offsets = [0, 1], sizes = [8, 8], strides = [1, 1]} : vector<8x9xf32> to vector<8x8xf32>
    %359 = arith.addf %357, %358 : vector<8x8xf32>
    %c0_132 = arith.constant 0 : index
    %c0_133 = arith.constant 0 : index
    %c0_134 = arith.constant 0 : index
    %360 = vector.load %arg18[%c0_132, %c0_133, %c0_134] : memref<1x8x8xf32, #tpu.memory_space<vmem>>, vector<1x8x8xf32>
    %361 = vector.shape_cast %360 : vector<1x8x8xf32> to vector<8x8xf32>
    %362 = vector.shape_cast %359 : vector<8x8xf32> to vector<1x8x8xf32>
    tpu.vector_store %arg18[%c0_132, %c0_133, %c0_134], %362 {strides = array<i32>} : memref<1x8x8xf32, #tpu.memory_space<vmem>>, vector<1x8x8xf32>,
    return
  }
  func.func @transform_0(%arg0: i32) -> (i32, i32, i32) {
    %c0_i32 = arith.constant 0 : i32
    %c0_i32_0 = arith.constant 0 : i32
    %c0_i32_1 = arith.constant 0 : i32
    return %arg0, %c0_i32, %c0_i32_0 : i32, i32, i32
  }
  func.func @transform_1(%arg0: i32) -> (i32, i32, i32) {
    %c0_i32 = arith.constant 0 : i32
    %c0_i32_0 = arith.constant 0 : i32
    %c0_i32_1 = arith.constant 0 : i32
    return %arg0, %c0_i32, %c0_i32_0 : i32, i32, i32
  }
  func.func @transform_2(%arg0: i32) -> (i32, i32, i32) {
    %c0_i32 = arith.constant 0 : i32
    %c0_i32_0 = arith.constant 0 : i32
    %c0_i32_1 = arith.constant 0 : i32
    return %arg0, %c0_i32, %c0_i32_0 : i32, i32, i32
  }
  func.func @transform_3(%arg0: i32) -> (i32, i32) {
    %c0_i32 = arith.constant 0 : i32
    %c0_i32_0 = arith.constant 0 : i32
    %c0_i32_1 = arith.constant 0 : i32
    return %c0_i32, %c0_i32_0 : i32, i32
  }
  func.func @transform_4(%arg0: i32) -> (i32, i32) {
    %c0_i32 = arith.constant 0 : i32
    %c0_i32_0 = arith.constant 0 : i32
    %c0_i32_1 = arith.constant 0 : i32
    return %c0_i32, %c0_i32_0 : i32, i32
  }
  func.func @transform_5(%arg0: i32) -> (i32, i32) {
    %c0_i32 = arith.constant 0 : i32
    %c0_i32_0 = arith.constant 0 : i32
    %c0_i32_1 = arith.constant 0 : i32
    return %c0_i32, %c0_i32_0 : i32, i32
  }
  func.func @transform_6(%arg0: i32) -> (i32, i32, i32) {
    %c0_i32 = arith.constant 0 : i32
    %c0_i32_0 = arith.constant 0 : i32
    %c0_i32_1 = arith.constant 0 : i32
    %c0_i32_2 = arith.constant 0 : i32
    return %c0_i32, %c0_i32_0, %c0_i32_1 : i32, i32, i32
  }
  func.func @transform_7(%arg0: i32) -> (i32, i32, i32) {
    %c0_i32 = arith.constant 0 : i32
    %c0_i32_0 = arith.constant 0 : i32
    %c0_i32_1 = arith.constant 0 : i32
    %c0_i32_2 = arith.constant 0 : i32
    return %c0_i32, %c0_i32_0, %c0_i32_1 : i32, i32, i32
  }
  func.func @transform_8(%arg0: i32) -> (i32, i32, i32) {
    %c0_i32 = arith.constant 0 : i32
    %c0_i32_0 = arith.constant 0 : i32
    %c0_i32_1 = arith.constant 0 : i32
    %c0_i32_2 = arith.constant 0 : i32
    return %c0_i32, %c0_i32_0, %c0_i32_1 : i32, i32, i32
  }
  func.func @transform_9(%arg0: i32) -> (i32, i32, i32) {
    %c0_i32 = arith.constant 0 : i32
    %c0_i32_0 = arith.constant 0 : i32
    %c0_i32_1 = arith.constant 0 : i32
    %c0_i32_2 = arith.constant 0 : i32
    return %c0_i32, %c0_i32_0, %c0_i32_1 : i32, i32, i32
  }
  func.func @transform_10(%arg0: i32) -> (i32, i32, i32) {
    %c0_i32 = arith.constant 0 : i32
    %c0_i32_0 = arith.constant 0 : i32
    %c0_i32_1 = arith.constant 0 : i32
    %c0_i32_2 = arith.constant 0 : i32
    return %c0_i32, %c0_i32_0, %c0_i32_1 : i32, i32, i32
  }
  func.func @transform_11(%arg0: i32) -> (i32, i32, i32) {
    %c0_i32 = arith.constant 0 : i32
    %c0_i32_0 = arith.constant 0 : i32
    %c0_i32_1 = arith.constant 0 : i32
    %c0_i32_2 = arith.constant 0 : i32
    return %c0_i32, %c0_i32_0, %c0_i32_1 : i32, i32, i32
  }
  func.func @transform_12(%arg0: i32) -> (i32, i32, i32) {
    %c0_i32 = arith.constant 0 : i32
    %c0_i32_0 = arith.constant 0 : i32
    %c0_i32_1 = arith.constant 0 : i32
    %c0_i32_2 = arith.constant 0 : i32
    return %c0_i32, %c0_i32_0, %c0_i32_1 : i32, i32, i32
  }
  func.func @transform_13(%arg0: i32) -> (i32, i32) {
    %c0_i32 = arith.constant 0 : i32
    %c0_i32_0 = arith.constant 0 : i32
    %c0_i32_1 = arith.constant 0 : i32
    return %c0_i32, %c0_i32_0 : i32, i32
  }
  func.func @transform_14(%arg0: i32) -> (i32, i32) {
    %c0_i32 = arith.constant 0 : i32
    %c0_i32_0 = arith.constant 0 : i32
    %c0_i32_1 = arith.constant 0 : i32
    return %c0_i32, %c0_i32_0 : i32, i32
  }
  func.func @transform_15(%arg0: i32) -> (i32, i32) {
    %c0_i32 = arith.constant 0 : i32
    %c0_i32_0 = arith.constant 0 : i32
    %c0_i32_1 = arith.constant 0 : i32
    return %c0_i32, %c0_i32_0 : i32, i32
  }
  func.func @transform_16(%arg0: i32) -> (i32, i32) {
    %c0_i32 = arith.constant 0 : i32
    %c0_i32_0 = arith.constant 0 : i32
    %c0_i32_1 = arith.constant 0 : i32
    return %c0_i32, %c0_i32_0 : i32, i32
  }
  func.func @transform_17(%arg0: i32) -> (i32, i32, i32) {
    %c0_i32 = arith.constant 0 : i32
    %c0_i32_0 = arith.constant 0 : i32
    %c0_i32_1 = arith.constant 0 : i32
    return %arg0, %c0_i32, %c0_i32_0 : i32, i32, i32
  }
}

</mosaic_0001>

<bundles_post_ra>
// kernel: sub.21
= control target key start
LH: loop header
LB: loop body
LE: loop exit
PB: predicated region body
PF: predicated region fallthrough
CT: control target
= control target key end

     0   :  { %vm7_vm0 = vcmask 31744   ;;  %vm13_vm1 = vcmask 64544   ;;  %s39_s0 = inlined_call_operand.vmem [shape: f32[2,4], index: 0, kind: input, shape index: {}]   ;;  %s40_s1 = inlined_call_operand.vmem [shape: f32[8], index: 1, kind: output, shape index: {}]  }
   0x1   :  { %v4_v0 = vld [vmem:[%s39_s0] sm:$0x3]  ;;  %s22_s0 = smov 4  }
   0x2   :  { %5 = vst [vmem:[#allocation1] sm:$0x3] %v4_v0 }
   0x9   :  { %v10_v1 = vld [vmem:[#allocation1 + $0x1] sm:$0x1]   ;;  %v6_v2 = vld [vmem:[#allocation1] sm:$0x1]  }
   0xa   :  { %11 = vrot.lane.b32.xlu0 %v10_v1, %s22_s0  ;;  %8 = vst.msk [vmem:[#allocation0] sm:$0x1] %vm7_vm0, %v6_v2  }
  0x7c   :  { %v12_v3 = vpop.permute.xlu0 %11  }
  0x7d   :  { %14 = vst.msk [vmem:[#allocation0] sm:$0x1] %vm13_vm1, %v12_v3  }
  0x84   :  { %v18_v4 = vld [vmem:[#allocation0] sm:$0x1] }
  0x85   :  { %20 = vst [vmem:[%s40_s1] sm:$0x1] %v18_v4 }

// kernel: tile.9
= control target key start
LH: loop header
LB: loop body
LE: loop exit
PB: predicated region body
PF: predicated region fallthrough
CT: control target
= control target key end

     0   :  { %vm3_vm0 = vcmask 261120   ;;  %s120_s0 = inlined_call_operand.vmem [shape: f32[8,5,32], index: 0, kind: input, shape index: {}]   ;;  %s121_s1 = inlined_call_operand.vmem [shape: f32[40,32], index: 1, kind: output, shape index: {}]  }
   0x1   :  { %v2_v0 = vld [vmem:[%s120_s0] sm:$0x1f]   ;;  %v40_v1 = vld [vmem:[%s120_s0 + $0x8] sm:$0x1f]   ;;  %v42_v2 = vld [vmem:[%s120_s0 + $0x10] sm:$0x1f]  }
   0x2   :  { %4 = vst.msk [vmem:[%s121_s1] sm:$0x1f] %vm3_vm0, %v2_v0   ;;  %41 = vst.msk [vmem:[%s121_s1 + $0x5] sm:$0x1f] %vm3_vm0, %v40_v1   ;;  %v44_v3 = vld [vmem:[%s120_s0 + $0x18] sm:$0x1f]  }
   0x3   :  { %43 = vst.msk [vmem:[%s121_s1 + $0xa] sm:$0x1f] %vm3_vm0, %v42_v2   ;;  %v46_v4 = vld [vmem:[%s120_s0 + $0x20] sm:$0x1f]   ;;  %v48_v5 = vld [vmem:[%s120_s0 + $0x28] sm:$0x1f]  }
   0x4   :  { %45 = vst.msk [vmem:[%s121_s1 + $0xf] sm:$0x1f] %vm3_vm0, %v44_v3   ;;  %47 = vst.msk [vmem:[%s121_s1 + $0x14] sm:$0x1f] %vm3_vm0, %v46_v4   ;;  %v50_v6 = vld [vmem:[%s120_s0 + $0x30] sm:$0x1f]  }
   0x5   :  { %49 = vst.msk [vmem:[%s121_s1 + $0x19] sm:$0x1f] %vm3_vm0, %v48_v5   ;;  %v52_v7 = vld [vmem:[%s120_s0 + $0x38] sm:$0x1f]   ;;  %51 = vst.msk [vmem:[%s121_s1 + $0x1e] sm:$0x1f] %vm3_vm0, %v50_v6  }
   0x6   :  { %53 = vst.msk [vmem:[%s121_s1 + $0x23] sm:$0x1f] %vm3_vm0, %v52_v7  }

// kernel: _lambda_.1
= control target key start
LH: loop header
LB: loop body
LE: loop exit
PB: predicated region body
PF: predicated region fallthrough
CT: control target
= control target key end

     0   :  { %s8178_s0 = inlined_call_operand.vmem [shape: f32[1,40,4], index: 0, kind: input, shape index: {}]   ;;  %s8179_s1 = inlined_call_operand.vmem [shape: f32[1,40,2], index: 1, kind: input, shape index: {}]   ;;  %s8180_s2 = inlined_call_operand.vmem [shape: f32[1,8,9], index: 2, kind: input, shape index: {}]   ;;  %s8181_s3 = inlined_call_operand.vmem [shape: f32[4,32], index: 3, kind: input, shape index: {}]   ;;  %s8182_s4 = inlined_call_operand.vmem [shape: f32[40,32], index: 4, kind: input, shape index: {}]   ;;  %s8183_s5 = inlined_call_operand.vmem [shape: f32[40,40], index: 5, kind: input, shape index: {}]   ;;  %s8184_s6 = inlined_call_operand.vmem [shape: f32[2,32,96], index: 6, kind: input, shape index: {}]   ;;  %s8185_s7 = inlined_call_operand.vmem [shape: f32[2,1,96], index: 7, kind: input, shape index: {}]   ;;  %s8186_s8 = inlined_call_operand.vmem [shape: f32[2,32,32], index: 8, kind: input, shape index: {}]   ;;  %s8187_s9 = inlined_call_operand.vmem [shape: f32[2,32,64], index: 9, kind: input, shape index: {}]   ;;  %s8188_s10 = inlined_call_operand.vmem [shape: f32[2,1,64], index: 10, kind: input, shape index: {}]   ;;  %s8189_s11 = inlined_call_operand.vmem [shape: f32[2,64,32], index: 11, kind: input, shape index: {}]   ;;  %s8190_s12 = inlined_call_operand.vmem [shape: f32[2,6,32], index: 12, kind: input, shape index: {}]   ;;  %s8191_s13 = inlined_call_operand.vmem [shape: f32[2,32], index: 13, kind: input, shape index: {}]   ;;  %s8192_s14 = inlined_call_operand.vmem [shape: f32[32,40], index: 14, kind: input, shape index: {}]   ;;  %s8193_s15 = inlined_call_operand.vmem [shape: f32[40,40], index: 15, kind: input, shape index: {}]   ;;  %s8194_s16 = inlined_call_operand.vmem [shape: f32[8,40], index: 16, kind: input, shape index: {}]   ;;  %s8195_s17 = inlined_call_operand.hbm [shape: f32[1,8,8], index: 17, kind: output, shape index: {}]  }
   0x1   :  { %8212 = sst [smem:[#allocation5_spill]] %s8178_s0 }
   0x2   :  { %8213 = sst [smem:[#allocation6_spill]] %s8179_s1 }
   0x3   :  { %s8214_s26 = sld [smem:[#allocation6_spill]]  ;;  %v6236_v2 = vmov 0  }
   0x4   :  { %5833 = vset.pattern.permute.xlu1 %v6236_v2  ;;  %5831 = vset.pattern.permute.xlu0 %v6236_v2 }
   0x9   :  { %v58_v0 = vld [vmem:[%s8214_s26 + $0x8] sm:$0xff]  ;;  %v57_v1 = vld [vmem:[%s8214_s26] sm:$0xff] }
   0xa   :  { %74 = vperm.xlu1 %5833, %v58_v0   ;;  %69 = vperm.xlu0 %5831, %v57_v1  }
   0xb   :  { %22 = vsyncpa [#allocation3], 0  ;;  %v6237_v3 = vmov 1   ;;  %v122_v4 = vld [vmem:[%s8181_s3] sm:$0xf]  ;;  %vm144_vm0 = vcmask 1043456  }
   0xc   :  { %v59_v5 = vld [vmem:[%s8214_s26 + $0x10] sm:$0xff]  ;;  %v6238_v6 = vmov 0.0   ;;  %vm6239_vm1 = vmmov 0   ;;  %v60_v7 = vld [vmem:[%s8214_s26 + $0x18] sm:$0xff]  ;;  %v61_v8 = vld [vmem:[%s8214_s26 + $0x20] sm:$0xff]  ;;  %v6240_v11 = vmov 0.0|0.0  }
   0xd   :  { %4973 = vmatprep.subr.mxu0 %v6238_v6  ;;  %4975 = vmatprep.mubr.msk.f32.mxu0 %vm6239_vm1, %v6238_v6  ;;  %v244_v9 = vld [vmem:[%s8184_s6] sm:$0xff]  ;;  %v245_v10 = vld [vmem:[%s8184_s6 + $0x8] sm:$0xff]  ;;  %s8215_s27 = sld [smem:[#allocation5_spill]]  ;;  %vm128_vm2 = vcmask 31744   ;;  %v246_v38 = vld [vmem:[%s8184_s6 + $0x10] sm:$0xff]  ;;  %vm255_vm3 = vcmask 261120  }
   0xe   :  { %5834 = vset.pattern.permute.xlu1 %v6237_v3  ;;  %5832 = vset.pattern.permute.xlu0 %v6237_v3  ;;  %v5627_v12 = vpack.c.bf16 %v245_v10, %v244_v9  ;;  %v247_v39 = vld [vmem:[%s8184_s6 + $0x18] sm:$0xff]  ;;  %v123_v41 = vld [vmem:[%s8182_s4] sm:$0xff]  ;;  %v124_v45 = vld [vmem:[%s8182_s4 + $0x8] sm:$0xff]  ;;  %s6241_s1 = smov 96   ;;  %s6242_s20 = smov 88   ;;  %vm376_vm4 = vcmask 64512  }
   0xf   :  { %102 = vperm.xlu1 %5834, %v58_v0   ;;  %98 = vperm.xlu0 %5832, %v57_v1   ;;  %v5630_v40 = vpack.c.bf16 %v247_v39, %v246_v38  ;;  %v125_v49 = vld [vmem:[%s8182_s4 + $0x10] sm:$0xff]  ;;  %v126_v53 = vld [vmem:[%s8182_s4 + $0x18] sm:$0xff]  ;;  %v127_v57 = vld [vmem:[%s8182_s4 + $0x20] sm:$0xff]  ;;  %s6243_s21 = smov 80   ;;  %s6244_s22 = smov 120   ;;  %vm487_vm6 = vcmask 326656  }
  0x10   :  { %4974 = vmatpush3.msk.msra.mxu0 %vm144_vm0, %v122_v4  ;;  %4998 = vmatprep.mubr.msk.f32.mxu1 %vm6239_vm1, %v6238_v6  ;;  %v4519_v63 = vld [vmem:[%s8185_s7] ss:$0 sm:$0xff]  ;;  %s6245_s23 = smov 72   ;;  %s6246_s24 = smov 112   ;;  %vm6552_vm5 = vmpackc.low %vm376_vm4, %vm376_vm4  ;;  %vm1643_vm7 = vcmask 130048   ;;  %vm1649_vm8 = vcmask 195584  }
  0x11   :  { %5626 = vmatprep.subr.bf16.mxu1 %v6240_v11  ;;  %5632 = vmatprep.subr.bf16.mxu0 %v6240_v11  ;;  %s6247_s25 = smov 104   ;;  %s8204_s26 = smov 64   ;;  %vm1990_vm9 = vcmask 523264  }
  0x12   :  { %5628 = vmatpush3.bf16.msra.mxu1 %v5627_v12  ;;  %s8200_s28 = smov 48   ;;  %s8198_s18 = smov 40  }
  0x13   :  { %5835 = vset.pattern.permute.xlu1 %v6236_v2  ;;  %106 = vperm.xlu0 %5832, %v59_v5   ;;  %v62_v15 = vld [vmem:[%s8215_s27] sm:$0xff]  ;;  %v63_v17 = vld [vmem:[%s8215_s27 + $0x8] sm:$0xff]  ;;  %v64_v22 = vld [vmem:[%s8215_s27 + $0x10] sm:$0xff]  ;;  %s8210_s3 = smov 8   ;;  %s8208_s19 = smov 16  }
  0x14   :  { %79 = vperm.xlu1 %5835, %v59_v5   ;;  %5629 = vmatprep.subr.bf16.mxu1 %v6240_v11  ;;  %v65_v27 = vld [vmem:[%s8215_s27 + $0x18] sm:$0xff]  ;;  %v66_v32 = vld [vmem:[%s8215_s27 + $0x20] sm:$0xff]  ;;  %s8202_s27 = smov 56   ;;  %s8221_s0 = smov 40  }
  0x15   :  { %s6255_s30 = smov 127  }
  0x16   :  { %5631 = vmatpush3.bf16.msra.mxu1 %v5630_v40 }
  0x17   :  { %110 = vperm.xlu0 %5832, %v60_v7   ;;  %5640 = vmatprep.subr.bf16.mxu1 %v6240_v11 }
  0x18   :  { %84 = vperm.xlu1 %5835, %v60_v7  }
  0x1b   :  { %114 = vperm.xlu0 %5832, %v61_v8  }
  0x1c   :  { %89 = vperm.xlu1 %5835, %v61_v8  }
  0x1f   :  { %5996 = vset.pattern.permute.xlu0 %v6236_v2 }
  0x89   :  { %v70_v13 = vpop.permute.xlu0 %69  ;;  %v75_v14 = vpop.permute.xlu1 %74 }
  0x8a   :  { %v92_v16 = vmul.f32 %v70_v13, %v62_v15  ;;  %v93_v21 = vmul.f32 %v75_v14, %v63_v17 }
  0x8e   :  { %v103_v18 = vpop.permute.xlu1 %102  ;;  %v99_v19 = vpop.permute.xlu0 %98 }
  0x8f   :  { %v117_v20 = vadd.f32 %v99_v19, %v92_v16  ;;  %v118_v24 = vadd.f32 %v103_v18, %v93_v21 }
  0x91   :  { %4976 = vmatmul.mubr.msk.f32.vlgmr.msra.gmra.mrb[0].mxu0 %vm128_vm2, %v117_v20 }
  0x92   :  { %v107_v23 = vpop.permute.xlu0 %106  ;;  %4978 = vmatprep.mubr.msk.f32.mxu0 %vm6239_vm1, %v6238_v6 }
  0x93   :  { %v80_v25 = vpop.permute.xlu1 %79 }
  0x94   :  { %v94_v26 = vmul.f32 %v80_v25, %v64_v22 }
  0x95   :  { %4979 = vmatmul.mubr.msk.f32.gmra.mrb[2].mxu0 %vm128_vm2, %v118_v24 }
  0x96   :  { %v119_v28 = vadd.f32 %v107_v23, %v94_v26  ;;  %4981 = vmatprep.mubr.msk.f32.mxu0 %vm6239_vm1, %v6238_v6  ;;  %v111_v29 = vpop.permute.xlu0 %110 }
  0x97   :  { %v85_v30 = vpop.permute.xlu1 %84 }
  0x98   :  { %v95_v31 = vmul.f32 %v85_v30, %v65_v27 }
  0x99   :  { %4982 = vmatmul.mubr.msk.f32.gmra.mrb[4].mxu0 %vm128_vm2, %v119_v28 }
  0x9a   :  { %v120_v33 = vadd.f32 %v111_v29, %v95_v31  ;;  %4984 = vmatprep.mubr.msk.f32.mxu0 %vm6239_vm1, %v6238_v6  ;;  %v115_v36 = vpop.permute.xlu0 %114 }
  0x9b   :  { %v90_v34 = vpop.permute.xlu1 %89 }
  0x9c   :  { %v96_v35 = vmul.f32 %v90_v34, %v66_v32 }
  0x9d   :  { %4985 = vmatmul.mubr.msk.f32.gmra.mrb[6].mxu0 %vm128_vm2, %v120_v33 }
  0x9e   :  { %v121_v37 = vadd.f32 %v115_v36, %v96_v35  ;;  %4987 = vmatprep.mubr.msk.f32.mxu0 %vm6239_vm1, %v6238_v6 }
  0xa1   :  { %4988 = vmatmul.mubr.msk.f32.gmra.mrb[8].mxu0 %vm128_vm2, %v121_v37 }
  0xa2   :  { %5023 = vmatprep.mubr.msk.f32.mxu0 %vm6239_vm1, %v6238_v6 }
 0x164   :  { %v214_v42 = vpop.f32.mrb[0].mxu0 }
 0x165   :  { %v6419_v43 = vadd.f32 %v214_v42, %v123_v41  ;;  %v4977_v44 = vpop.f32.mrb[1].mxu0 }
 0x167   :  { %4999 = vmatmul.mubr.msk.f32.vlgmr.msra.gmra.mrb[0].mxu1 %vm255_vm3, %v6419_v43 }
 0x168   :  { %v219_v46 = vpop.f32.mrb[2].mxu0  ;;  %5001 = vmatprep.mubr.msk.f32.mxu1 %vm6239_vm1, %v6238_v6 }
 0x169   :  { %v6428_v47 = vadd.f32 %v219_v46, %v124_v45  ;;  %v4980_v48 = vpop.f32.mrb[3].mxu0 }
 0x16b   :  { %5002 = vmatmul.mubr.msk.f32.gmra.mrb[2].mxu1 %vm255_vm3, %v6428_v47 }
 0x16c   :  { %v224_v50 = vpop.f32.mrb[4].mxu0  ;;  %5004 = vmatprep.mubr.msk.f32.mxu1 %vm6239_vm1, %v6238_v6 }
 0x16d   :  { %v6437_v51 = vadd.f32 %v224_v50, %v125_v49  ;;  %v4983_v52 = vpop.f32.mrb[5].mxu0 }
 0x16f   :  { %5005 = vmatmul.mubr.msk.f32.gmra.mrb[4].mxu1 %vm255_vm3, %v6437_v51 }
 0x170   :  { %v229_v54 = vpop.f32.mrb[6].mxu0  ;;  %5007 = vmatprep.mubr.msk.f32.mxu1 %vm6239_vm1, %v6238_v6 }
 0x171   :  { %v6446_v55 = vadd.f32 %v229_v54, %v126_v53  ;;  %v4986_v56 = vpop.f32.mrb[7].mxu0 }
 0x173   :  { %5008 = vmatmul.mubr.msk.f32.gmra.mrb[6].mxu1 %vm255_vm3, %v6446_v55 }
 0x174   :  { %v234_v58 = vpop.f32.mrb[8].mxu0  ;;  %5010 = vmatprep.mubr.msk.f32.mxu1 %vm6239_vm1, %v6238_v6 }
 0x175   :  { %v6455_v59 = vadd.f32 %v234_v58, %v127_v57  ;;  %v4989_v60 = vpop.f32.mrb[9].mxu0 }
 0x177   :  { %5011 = vmatmul.mubr.msk.f32.gmra.mrb[8].mxu1 %vm255_vm3, %v6455_v59 }
 0x178   :  { %5048 = vmatprep.mubr.msk.f32.mxu1 %vm6239_vm1, %v6238_v6 }
 0x23a   :  { %v337_v61 = vpop.f32.mrb[0].mxu1 }
 0x23b   :  { %v5000_v62 = vpop.f32.mrb[1].mxu1  ;;  %v6464_v1 = vadd.f32 %v4519_v63, %v337_v61 }
 0x23e   :  { %v342_v0 = vpop.f32.mrb[2].mxu1 }
 0x23f   :  { %v6466_v2 = vadd.f32 %v4519_v63, %v342_v0  ;;  %v5003_v3 = vpop.f32.mrb[3].mxu1 }
 0x241   :  { %v6470_v4 = vpack.i.bf16 %v6466_v2, %v6464_v1 }
 0x242   :  { %v347_v5 = vpop.f32.mrb[4].mxu1 }
 0x243   :  { %5837 = vrot.lane.b32.xlu1 %v6470_v4, %s6241_s1  ;;  %v5006_v7 = vpop.f32.mrb[5].mxu1  ;;  %v6474_v9 = vadd.f32 %v4519_v63, %v347_v5 }
 0x246   :  { %v352_v8 = vpop.f32.mrb[6].mxu1 }
 0x247   :  { %v6476_v10 = vadd.f32 %v4519_v63, %v352_v8  ;;  %v5009_v12 = vpop.f32.mrb[7].mxu1 }
 0x249   :  { %v6480_v13 = vpack.i.bf16 %v6476_v10, %v6474_v9 }
 0x24a   :  { %v357_v14 = vpop.f32.mrb[8].mxu1 }
 0x24b   :  { %v6482_v15 = vadd.f32 %v4519_v63, %v357_v14  ;;  %5842 = vrot.lane.b32.xlu0 %v6480_v13, %s6241_s1  ;;  %v5012_v16 = vpop.f32.mrb[9].mxu1 }
 0x24d   :  { %374 = vrot.lane.b32.xlu1 %v6482_v15, %s6241_s1 }
 0x24f   :  { %5847 = vrot.lane.b32.xlu0 %v6470_v4, %s6242_s20 }
 0x251   :  { %5852 = vrot.lane.b32.xlu1 %v6480_v13, %s6242_s20 }
 0x253   :  { %681 = vrot.lane.b32.xlu0 %v6482_v15, %s6242_s20 }
 0x255   :  { %5857 = vrot.lane.b32.xlu1 %v6470_v4, %s6243_s21 }
 0x257   :  { %663 = vrot.lane.b32.xlu0 %v6464_v1, %s6244_s22 }
 0x259   :  { %665 = vrot.lane.b32.xlu1 %v6466_v2, %s6244_s22 }
 0x25b   :  { %5862 = vrot.lane.b32.xlu0 %v6480_v13, %s6243_s21 }
 0x25d   :  { %667 = vrot.lane.b32.xlu1 %v6474_v9, %s6244_s22 }
 0x25f   :  { %669 = vrot.lane.b32.xlu0 %v6476_v10, %s6244_s22 }
 0x261   :  { %671 = vrot.lane.b32.xlu1 %v6482_v15, %s6244_s22 }
 0x263   :  { %986 = vrot.lane.b32.xlu0 %v6482_v15, %s6243_s21 }
 0x265   :  { %5867 = vrot.lane.b32.xlu1 %v6470_v4, %s6245_s23 }
 0x267   :  { %968 = vrot.lane.b32.xlu0 %v6464_v1, %s6246_s24 }
 0x269   :  { %970 = vrot.lane.b32.xlu1 %v6466_v2, %s6246_s24 }
 0x26b   :  { %5872 = vrot.lane.b32.xlu0 %v6480_v13, %s6245_s23 }
 0x26d   :  { %972 = vrot.lane.b32.xlu1 %v6474_v9, %s6246_s24 }
 0x26f   :  { %974 = vrot.lane.b32.xlu0 %v6476_v10, %s6246_s24 }
 0x271   :  { %976 = vrot.lane.b32.xlu1 %v6482_v15, %s6246_s24 }
 0x273   :  { %1291 = vrot.lane.b32.xlu0 %v6482_v15, %s6245_s23 }
 0x275   :  { %1273 = vrot.lane.b32.xlu1 %v6464_v1, %s6247_s25 }
 0x277   :  { %1275 = vrot.lane.b32.xlu0 %v6466_v2, %s6247_s25 }
 0x279   :  { %1277 = vrot.lane.b32.xlu1 %v6474_v9, %s6247_s25 }
 0x27b   :  { %1279 = vrot.lane.b32.xlu0 %v6476_v10, %s6247_s25 }
 0x27d   :  { %1281 = vrot.lane.b32.xlu1 %v6482_v15, %s6247_s25 }
 0x27f   :  { %5877 = vrot.lane.b32.xlu0 %v6470_v4, %s8204_s26 }
 0x281   :  { %5882 = vrot.lane.b32.xlu1 %v6480_v13, %s8204_s26 }
 0x283   :  { %5892 = vrot.lane.b32.xlu0 %v6480_v13, %s8202_s27 }
 0x285   :  { %5887 = vrot.lane.b32.xlu1 %v6470_v4, %s8202_s27 }
 0x287   :  { %551 = vrot.lane.b32.xlu0 %v6482_v15, %s8204_s26  ;;  %s8206_s26 = smov 24  }
 0x289   :  { %5897 = vrot.lane.b32.xlu1 %v6470_v4, %s8200_s28 }
 0x28b   :  { %856 = vrot.lane.b32.xlu0 %v6482_v15, %s8202_s27 }
 0x2b5   :  { %v5838_v17 = vpop.permute.xlu1 %5837 }
 0x2b6   :  { %v5840_v18 = vunpack.i.h.bf16 %v5838_v17  ;;  %v5839_v19 = vunpack.i.l.bf16 %v5838_v17 }
 0x2b8   :  { %v5633_v21 = vpack.c.bf16 %v5840_v18, %v5839_v19 }
 0x2ba   :  { %5635 = vmatpush3.bf16.xpose.msk.msra.mxu0 %vm6552_vm5, %v5633_v21 }
 0x2bb   :  { %5636 = vmatprep.subr.bf16.mxu0 %v6240_v11 }
 0x2bd   :  { %v5843_v22 = vpop.permute.xlu0 %5842 }
 0x2be   :  { %v5845_v23 = vunpack.i.h.bf16 %v5843_v22  ;;  %v5844_v24 = vunpack.i.l.bf16 %v5843_v22 }
 0x2bf   :  { %v375_v25 = vpop.permute.xlu1 %374 }
 0x2c0   :  { %v5637_v26 = vpack.c.bf16 %v5845_v23, %v5844_v24 }
 0x2c1   :  { %v5848_v27 = vpop.permute.xlu0 %5847 }
 0x2c2   :  { %5639 = vmatpush3.bf16.xpose.msk.msra.mxu0 %vm6552_vm5, %v5637_v26  ;;  %v5850_v31 = vunpack.i.h.bf16 %v5848_v27  ;;  %v5849_v32 = vunpack.i.l.bf16 %v5848_v27  ;;  %v6661_v26 = vld [vmem:[%s8183_s5] sm:$0xff] }
 0x2c3   :  { %v5853_v28 = vpop.permute.xlu1 %5852  ;;  %5021 = vmatprep.subr.mxu0 %v6238_v6 }
 0x2c4   :  { %v5647_v35 = vpack.c.bf16 %v5850_v31, %v5849_v32  ;;  %v5855_v38 = vunpack.i.h.bf16 %v5853_v28  ;;  %v5854_v39 = vunpack.i.l.bf16 %v5853_v28 }
 0x2c5   :  { %v682_v29 = vpop.permute.xlu0 %681 }
 0x2c6   :  { %v5651_v42 = vpack.c.bf16 %v5855_v38, %v5854_v39 }
 0x2c7   :  { %v5858_v30 = vpop.permute.xlu1 %5857 }
 0x2c8   :  { %v5860_v49 = vunpack.i.h.bf16 %v5858_v30  ;;  %v5859_v50 = vunpack.i.l.bf16 %v5858_v30  ;;  %v6669_v30 = vld [vmem:[%s8183_s5 + $0x8] sm:$0xff] }
 0x2c9   :  { %v664_v33 = vpop.permute.xlu0 %663 }
 0x2ca   :  { %5022 = vmatpush3.xpose.msk.msra.mxu0 %vm376_vm4, %v375_v25  ;;  %v5661_v54 = vpack.c.bf16 %v5860_v49, %v5859_v50 }
 0x2cb   :  { %v666_v34 = vpop.permute.xlu1 %665  ;;  %5646 = vmatprep.subr.bf16.mxu0 %v6240_v11 }
 0x2cd   :  { %v5863_v36 = vpop.permute.xlu0 %5862  ;;  %5024 = vmatmul.mubr.msk.f32.vlgmr.msra.gmra.mrb[10].mxu0 %vm376_vm4, %v6464_v1 }
 0x2ce   :  { %5649 = vmatpush3.bf16.xpose.msk.msra.mxu0 %vm6552_vm5, %v5647_v35  ;;  %5026 = vmatprep.mubr.msk.f32.mxu0 %vm6239_vm1, %v6238_v6  ;;  %v5865_v58 = vunpack.i.h.bf16 %v5863_v36  ;;  %v5864_v60 = vunpack.i.l.bf16 %v5863_v36  ;;  %v6679_v35 = vld [vmem:[%s8183_s5 + $0x10] sm:$0xff] }
 0x2cf   :  { %v668_v37 = vpop.permute.xlu1 %667  ;;  %5650 = vmatprep.subr.bf16.mxu0 %v6240_v11 }
 0x2d0   :  { %v5665_v63 = vpack.c.bf16 %v5865_v58, %v5864_v60 }
 0x2d1   :  { %v670_v40 = vpop.permute.xlu0 %669  ;;  %5027 = vmatmul.mubr.msk.f32.gmra.mrb[12].mxu0 %vm376_vm4, %v6466_v2 }
 0x2d2   :  { %5029 = vmatprep.mubr.msk.f32.mxu0 %vm6239_vm1, %v6238_v6 }
 0x2d3   :  { %v672_v41 = vpop.permute.xlu1 %671 }
 0x2d5   :  { %v987_v44 = vpop.permute.xlu0 %986  ;;  %5030 = vmatmul.mubr.msk.f32.gmra.mrb[14].mxu0 %vm376_vm4, %v6474_v9 }
 0x2d6   :  { %5653 = vmatpush3.bf16.xpose.msk.msra.mxu0 %vm6552_vm5, %v5651_v42  ;;  %5032 = vmatprep.mubr.msk.f32.mxu0 %vm6239_vm1, %v6238_v6 }
 0x2d7   :  { %v5868_v45 = vpop.permute.xlu1 %5867  ;;  %5071 = vmatprep.subr.mxu0 %v6238_v6 }
 0x2d8   :  { %v5870_v5 = vunpack.i.h.bf16 %v5868_v45  ;;  %v5869_v7 = vunpack.i.l.bf16 %v5868_v45 }
 0x2d9   :  { %v969_v46 = vpop.permute.xlu0 %968  ;;  %5033 = vmatmul.mubr.msk.f32.gmra.mrb[16].mxu0 %vm376_vm4, %v6476_v10 }
 0x2da   :  { %5035 = vmatprep.mubr.msk.f32.mxu0 %vm6239_vm1, %v6238_v6  ;;  %v5675_v14 = vpack.c.bf16 %v5870_v5, %v5869_v7 }
 0x2db   :  { %v971_v48 = vpop.permute.xlu1 %970 }
 0x2dd   :  { %v5873_v52 = vpop.permute.xlu0 %5872  ;;  %5036 = vmatmul.mubr.msk.f32.gmra.mrb[18].mxu0 %vm376_vm4, %v6482_v15 }
 0x2de   :  { %5072 = vmatpush3.xpose.msk.msra.mxu0 %vm376_vm4, %v682_v29  ;;  %5073 = vmatprep.mubr.msk.f32.mxu0 %vm6239_vm1, %v6238_v6  ;;  %v5875_v21 = vunpack.i.h.bf16 %v5873_v52  ;;  %v5874_v22 = vunpack.i.l.bf16 %v5873_v52 }
 0x2df   :  { %v973_v53 = vpop.permute.xlu1 %972  ;;  %5660 = vmatprep.subr.bf16.mxu0 %v6240_v11 }
 0x2e0   :  { %v5679_v24 = vpack.c.bf16 %v5875_v21, %v5874_v22 }
 0x2e1   :  { %v975_v56 = vpop.permute.xlu0 %974  ;;  %5074 = vmatmul.mubr.msk.f32.vlgmr.msra.gmra.mrb[20].mxu0 %vm376_vm4, %v664_v33 }
 0x2e2   :  { %5663 = vmatpush3.bf16.xpose.msk.msra.mxu0 %vm6552_vm5, %v5661_v54  ;;  %5076 = vmatprep.mubr.msk.f32.mxu0 %vm6239_vm1, %v6238_v6 }
 0x2e3   :  { %v977_v57 = vpop.permute.xlu1 %976  ;;  %5664 = vmatprep.subr.bf16.mxu0 %v6240_v11 }
 0x2e5   :  { %v1292_v61 = vpop.permute.xlu0 %1291  ;;  %5077 = vmatmul.mubr.msk.f32.gmra.mrb[22].mxu0 %vm376_vm4, %v666_v34 }
 0x2e6   :  { %5079 = vmatprep.mubr.msk.f32.mxu0 %vm6239_vm1, %v6238_v6 }
 0x2e7   :  { %v1274_v62 = vpop.permute.xlu1 %1273 }
 0x2e9   :  { %v1276_v0 = vpop.permute.xlu0 %1275  ;;  %5080 = vmatmul.mubr.msk.f32.gmra.mrb[24].mxu0 %vm376_vm4, %v668_v37 }
 0x2ea   :  { %5667 = vmatpush3.bf16.xpose.msk.msra.mxu0 %vm6552_vm5, %v5665_v63  ;;  %5082 = vmatprep.mubr.msk.f32.mxu0 %vm6239_vm1, %v6238_v6 }
 0x2eb   :  { %v1278_v1 = vpop.permute.xlu1 %1277  ;;  %5121 = vmatprep.subr.mxu0 %v6238_v6 }
 0x2ed   :  { %v1280_v2 = vpop.permute.xlu0 %1279  ;;  %5083 = vmatmul.mubr.msk.f32.gmra.mrb[26].mxu0 %vm376_vm4, %v670_v40  ;;  %v6689_v40 = vld [vmem:[%s8183_s5 + $0x18] sm:$0xff] }
 0x2ee   :  { %5085 = vmatprep.mubr.msk.f32.mxu0 %vm6239_vm1, %v6238_v6 }
 0x2ef   :  { %v1282_v3 = vpop.permute.xlu1 %1281 }
 0x2f1   :  { %v5878_v8 = vpop.permute.xlu0 %5877  ;;  %5086 = vmatmul.mubr.msk.f32.gmra.mrb[28].mxu0 %vm376_vm4, %v672_v41 }
 0x2f2   :  { %v5880_v9 = vunpack.i.h.bf16 %v5878_v8  ;;  %v5879_v10 = vunpack.i.l.bf16 %v5878_v8  ;;  %5122 = vmatpush3.xpose.msk.msra.mxu0 %vm376_vm4, %v987_v44  ;;  %5123 = vmatprep.mubr.msk.f32.mxu0 %vm6239_vm1, %v6238_v6 }
 0x2f3   :  { %v5883_v12 = vpop.permute.xlu1 %5882  ;;  %5674 = vmatprep.subr.bf16.mxu0 %v6240_v11 }
 0x2f4   :  { %v5641_v16 = vpack.c.bf16 %v5880_v9, %v5879_v10  ;;  %v5885_v17 = vunpack.i.h.bf16 %v5883_v12  ;;  %v5884_v18 = vunpack.i.l.bf16 %v5883_v12 }
 0x2f5   :  { %5124 = vmatmul.mubr.msk.f32.vlgmr.msra.gmra.mrb[30].mxu0 %vm376_vm4, %v969_v46  ;;  %v6618_v19 = vpop.permute.xlu0 %5892  ;;  %v6699_v46 = vld [vmem:[%s8183_s5 + $0x20] sm:$0xff] }
 0x2f6   :  { %5642 = vmatpush3.bf16.msra.mxu1 %v5641_v16  ;;  %5677 = vmatpush3.bf16.xpose.msk.msra.mxu0 %vm6552_vm5, %v5675_v14  ;;  %v5644_v23 = vpack.c.bf16 %v5885_v17, %v5884_v18 }
 0x2f7   :  { %5126 = vmatprep.mubr.msk.f32.mxu0 %vm6239_vm1, %v6238_v6  ;;  %5643 = vmatprep.subr.bf16.mxu1 %v6240_v11 }
 0x2f8   :  { %5678 = vmatprep.subr.bf16.mxu0 %v6240_v11 }
 0x2f9   :  { %5127 = vmatmul.mubr.msk.f32.gmra.mrb[32].mxu0 %vm376_vm4, %v971_v48  ;;  %v552_v25 = vpop.permute.xlu0 %551 }
 0x2fa   :  { %5645 = vmatpush3.bf16.msra.mxu1 %v5644_v23  ;;  %5129 = vmatprep.mubr.msk.f32.mxu0 %vm6239_vm1, %v6238_v6 }
 0x2fb   :  { %5046 = vmatprep.subr.mxu1 %v6238_v6 }
 0x2fd   :  { %5130 = vmatmul.mubr.msk.f32.gmra.mrb[34].mxu0 %vm376_vm4, %v973_v53 }
 0x2fe   :  { %5047 = vmatpush3.msra.mxu1 %v552_v25  ;;  %5681 = vmatpush3.bf16.xpose.msk.msra.mxu0 %vm6552_vm5, %v5679_v24 }
 0x2ff   :  { %5132 = vmatprep.mubr.msk.f32.mxu0 %vm6239_vm1, %v6238_v6  ;;  %5171 = vmatprep.subr.mxu0 %v6238_v6 }
 0x300   :  { %5654 = vmatprep.subr.bf16.mxu1 %v6240_v11 }
 0x301   :  { %5133 = vmatmul.mubr.msk.f32.gmra.mrb[36].mxu0 %vm376_vm4, %v975_v56 }
 0x302   :  { %5135 = vmatprep.mubr.msk.f32.mxu0 %vm6239_vm1, %v6238_v6 }
 0x305   :  { %5136 = vmatmul.mubr.msk.f32.gmra.mrb[38].mxu0 %vm376_vm4, %v977_v57 }
 0x306   :  { %5172 = vmatpush3.xpose.msk.msra.mxu0 %vm376_vm4, %v1292_v61  ;;  %5173 = vmatprep.mubr.msk.f32.mxu0 %vm6239_vm1, %v6238_v6 }
 0x307   :  { %5688 = vmatprep.subr.bf16.mxu0 %v6240_v11 }
 0x309   :  { %5174 = vmatmul.mubr.msk.f32.vlgmr.msra.gmra.mrb[40].mxu0 %vm376_vm4, %v1274_v62 }
 0x30a   :  { %5176 = vmatprep.mubr.msk.f32.mxu0 %vm6239_vm1, %v6238_v6 }
 0x30d   :  { %5177 = vmatmul.mubr.msk.f32.gmra.mrb[42].mxu0 %vm376_vm4, %v1276_v0 }
 0x30e   :  { %5179 = vmatprep.mubr.msk.f32.mxu0 %vm6239_vm1, %v6238_v6 }
 0x311   :  { %5180 = vmatmul.mubr.msk.f32.gmra.mrb[44].mxu0 %vm376_vm4, %v1278_v1 }
 0x312   :  { %5182 = vmatprep.mubr.msk.f32.mxu0 %vm6239_vm1, %v6238_v6 }
 0x315   :  { %5183 = vmatmul.mubr.msk.f32.gmra.mrb[46].mxu0 %vm376_vm4, %v1280_v2 }
 0x316   :  { %5185 = vmatprep.mubr.msk.f32.mxu0 %vm6239_vm1, %v6238_v6 }
 0x319   :  { %5186 = vmatmul.mubr.msk.f32.gmra.mrb[48].mxu0 %vm376_vm4, %v1282_v3 }
 0x31a   :  { %5221 = vmatprep.mubr.msk.f32.mxu0 %vm6239_vm1, %v6238_v6 }
 0x3a0   :  { %v463_v27 = vpop.f32.mrb[10].mxu0 }
 0x3a1   :  { %v6664_v28 = vadd.f32 %v463_v27, %v6661_v26  ;;  %v5025_v29 = vpop.f32.mrb[11].mxu0 }
 0x3a3   :  { %v488_v31 = vsel %vm487_vm6, %v6664_v28, -inf }
 0x3a4   :  { %489 = vmax.xlane.f32.xlu0 %v488_v31  ;;  %v468_v32 = vpop.f32.mrb[12].mxu0 }
 0x3a5   :  { %v6674_v33 = vadd.f32 %v468_v32, %v6669_v30  ;;  %v5028_v34 = vpop.f32.mrb[13].mxu0 }
 0x3a7   :  { %v491_v36 = vsel %vm487_vm6, %v6674_v33, -inf }
 0x3a8   :  { %492 = vmax.xlane.f32.xlu1 %v491_v36  ;;  %v473_v37 = vpop.f32.mrb[14].mxu0 }
 0x3a9   :  { %v6684_v38 = vadd.f32 %v473_v37, %v6679_v35  ;;  %v5031_v39 = vpop.f32.mrb[15].mxu0 }
 0x3ab   :  { %v494_v41 = vsel %vm487_vm6, %v6684_v38, -inf }
 0x3ac   :  { %495 = vmax.xlane.f32.xlu0 %v494_v41  ;;  %v478_v42 = vpop.f32.mrb[16].mxu0 }
 0x3ad   :  { %v6694_v44 = vadd.f32 %v478_v42, %v6689_v40  ;;  %v5034_v45 = vpop.f32.mrb[17].mxu0 }
 0x3af   :  { %v497_v48 = vsel %vm487_vm6, %v6694_v44, -inf }
 0x3b0   :  { %498 = vmax.xlane.f32.xlu0 %v497_v48  ;;  %v483_v49 = vpop.f32.mrb[18].mxu0 }
 0x3b1   :  { %v6704_v50 = vadd.f32 %v483_v49, %v6699_v46  ;;  %v5037_v52 = vpop.f32.mrb[19].mxu0 }
 0x3b3   :  { %v500_v53 = vsel %vm487_vm6, %v6704_v50, -inf }
 0x3b4   :  { %501 = vmax.xlane.f32.xlu1 %v500_v53  ;;  %v769_v54 = vpop.f32.mrb[20].mxu0 }
 0x3b5   :  { %v5075_v56 = vpop.f32.mrb[21].mxu0  ;;  %v6736_v36 = vadd.f32 %v769_v54, %v6661_v26 }
 0x3b7   :  { %v793_v49 = vsel %vm487_vm6, %v6736_v36, -inf }
 0x3b8   :  { %v774_v57 = vpop.f32.mrb[22].mxu0 }
 0x3b9   :  { %v6709_v58 = vadd.f32 %v774_v57, %v6669_v30  ;;  %v5078_v60 = vpop.f32.mrb[23].mxu0 }
 0x3bb   :  { %v796_v61 = vsel %vm487_vm6, %v6709_v58, -inf }
 0x3bc   :  { %797 = vmax.xlane.f32.xlu1 %v796_v61  ;;  %v779_v62 = vpop.f32.mrb[24].mxu0 }
 0x3bd   :  { %v5081_v63 = vpop.f32.mrb[25].mxu0  ;;  %v6744_v45 = vadd.f32 %v779_v62, %v6679_v35 }
 0x3bf   :  { %v799_v56 = vsel %vm487_vm6, %v6744_v45, -inf }
 0x3c0   :  { %v784_v0 = vpop.f32.mrb[26].mxu0 }
 0x3c1   :  { %v6714_v1 = vadd.f32 %v784_v0, %v6689_v40  ;;  %v5084_v2 = vpop.f32.mrb[27].mxu0 }
 0x3c3   :  { %v802_v3 = vsel %vm487_vm6, %v6714_v1, -inf }
 0x3c4   :  { %803 = vmax.xlane.f32.xlu1 %v802_v3  ;;  %v789_v5 = vpop.f32.mrb[28].mxu0 }
 0x3c5   :  { %v5087_v7 = vpop.f32.mrb[29].mxu0  ;;  %v6749_v53 = vadd.f32 %v789_v5, %v6699_v46 }
 0x3c6   :  { %5902 = vrot.lane.b32.xlu0 %v6480_v13, %s8200_s28 }
 0x3c7   :  { %v805_v0 = vsel %vm487_vm6, %v6749_v53, -inf }
 0x3c8   :  { %v1074_v8 = vpop.f32.mrb[30].mxu0 }
 0x3c9   :  { %v6721_v9 = vadd.f32 %v1074_v8, %v6661_v26  ;;  %v5125_v10 = vpop.f32.mrb[31].mxu0 }
 0x3cb   :  { %v1098_v12 = vsel %vm487_vm6, %v6721_v9, -inf }
 0x3cc   :  { %1099 = vmax.xlane.f32.xlu1 %v1098_v12  ;;  %v1079_v14 = vpop.f32.mrb[32].mxu0 }
 0x3cd   :  { %v5128_v16 = vpop.f32.mrb[33].mxu0  ;;  %v6759_v62 = vadd.f32 %v1079_v14, %v6669_v30  ;;  %v6785_v14 = vpop.permute.xlu1 %5887 }
 0x3ce   :  { %v6787_v16 = vpop.permute.xlu0 %856 }
 0x3cf   :  { %v1101_v5 = vsel %vm487_vm6, %v6759_v62, -inf }
 0x3d0   :  { %v1084_v17 = vpop.f32.mrb[34].mxu0 }
 0x3d1   :  { %v6726_v18 = vadd.f32 %v1084_v17, %v6679_v35  ;;  %v5131_v21 = vpop.f32.mrb[35].mxu0 }
 0x3d3   :  { %v1104_v22 = vsel %vm487_vm6, %v6726_v18, -inf }
 0x3d4   :  { %1105 = vmax.xlane.f32.xlu1 %v1104_v22  ;;  %v1089_v23 = vpop.f32.mrb[36].mxu0 }
 0x3d5   :  { %v5134_v24 = vpop.f32.mrb[37].mxu0  ;;  %v6764_v3 = vadd.f32 %v1089_v23, %v6689_v40 }
 0x3d8   :  { %v1094_v25 = vpop.f32.mrb[38].mxu0 }
 0x3d9   :  { %v6731_v27 = vadd.f32 %v1094_v25, %v6699_v46  ;;  %v5137_v29 = vpop.f32.mrb[39].mxu0 }
 0x3db   :  { %v1110_v31 = vsel %vm487_vm6, %v6731_v27, -inf }
 0x3dc   :  { %1111 = vmax.xlane.f32.xlu1 %v1110_v31  ;;  %v1379_v32 = vpop.f32.mrb[40].mxu0 }
 0x3dd   :  { %v5175_v34 = vpop.f32.mrb[41].mxu0  ;;  %v6769_v7 = vadd.f32 %v1379_v32, %v6661_v26 }
 0x3df   :  { %v1403_v10 = vsel %vm487_vm6, %v6769_v7, -inf }
 0x3e0   :  { %v1384_v37 = vpop.f32.mrb[42].mxu0 }
 0x3e1   :  { %v6739_v39 = vadd.f32 %v1384_v37, %v6669_v30  ;;  %v5178_v41 = vpop.f32.mrb[43].mxu0  ;;  %v1107_v30 = vsel %vm487_vm6, %v6764_v3, -inf }
 0x3e3   :  { %v1406_v42 = vsel %vm487_vm6, %v6739_v39, -inf }
 0x3e4   :  { %1407 = vmax.xlane.f32.xlu1 %v1406_v42  ;;  %v1389_v48 = vpop.f32.mrb[44].mxu0 }
 0x3e5   :  { %794 = vmax.xlane.f32.xlu0 %v793_v49  ;;  %v5181_v52 = vpop.f32.mrb[45].mxu0  ;;  %v6774_v8 = vadd.f32 %v1389_v48, %v6679_v35  ;;  %v6789_v35 = vpop.permute.xlu1 %5897 }
 0x3e7   :  { %v1409_v12 = vsel %vm487_vm6, %v6774_v8, -inf }
 0x3e8   :  { %v1394_v54 = vpop.f32.mrb[46].mxu0 }
 0x3e9   :  { %v6754_v57 = vadd.f32 %v1394_v54, %v6689_v40  ;;  %800 = vmax.xlane.f32.xlu0 %v799_v56  ;;  %v5184_v60 = vpop.f32.mrb[47].mxu0 }
 0x3eb   :  { %v1412_v61 = vsel %vm487_vm6, %v6754_v57, -inf }
 0x3ec   :  { %1413 = vmax.xlane.f32.xlu1 %v1412_v61  ;;  %v1399_v63 = vpop.f32.mrb[48].mxu0 }
 0x3ed   :  { %806 = vmax.xlane.f32.xlu0 %v805_v0  ;;  %v5187_v2 = vpop.f32.mrb[49].mxu0  ;;  %v6779_v40 = vadd.f32 %v1399_v63, %v6699_v46 }
 0x3ef   :  { %v1415_v26 = vsel %vm487_vm6, %v6779_v40, -inf }
 0x3f1   :  { %1102 = vmax.xlane.f32.xlu0 %v1101_v5 }
 0x3f5   :  { %1108 = vmax.xlane.f32.xlu0 %v1107_v30 }
 0x3f9   :  { %1404 = vmax.xlane.f32.xlu0 %v1403_v10 }
 0x3fd   :  { %1410 = vmax.xlane.f32.xlu0 %v1409_v12 }
 0x401   :  { %1416 = vmax.xlane.f32.xlu0 %v1415_v26 }
 0x431   :  { %v490_v17 = vpop.xlane.xlu0 %489 }
 0x432   :  { %v503_v21 = vsub.f32 %v6664_v28, %v490_v17 }
 0x434   :  { %v508_v22 = vmul.f32 1.442695, %v503_v21 }
 0x435   :  { %v493_v46 = vpop.xlane.xlu1 %492 }
 0x436   :  { %5997 = vpow2.f32 %v508_v22  ;;  %v504_v23 = vsub.f32 %v6674_v33, %v493_v46 }
 0x438   :  { %v510_v24 = vmul.f32 1.442695, %v504_v23 }
 0x439   :  { %v496_v25 = vpop.xlane.xlu0 %495 }
 0x43a   :  { %5999 = vpow2.f32 %v510_v24  ;;  %v505_v29 = vsub.f32 %v6684_v38, %v496_v25 }
 0x43c   :  { %v512_v31 = vmul.f32 1.442695, %v505_v29 }
 0x43d   :  { %v499_v32 = vpop.xlane.xlu0 %498 }
 0x43e   :  { %6001 = vpow2.f32 %v512_v31  ;;  %v506_v34 = vsub.f32 %v6694_v44, %v499_v32 }
 0x440   :  { %v6795_v37 = vpop.eup %5997  ;;  %v514_v41 = vmul.f32 1.442695, %v506_v34 }
 0x441   :  { %v502_v42 = vpop.xlane.xlu1 %501  ;;  %v518_v28 = vsel %vm487_vm6, %v6795_v37, 0.0  ;;  %v6819_v2 = vpop.permute.xlu0 %5902 }
 0x442   :  { %6003 = vpow2.f32 %v514_v41  ;;  %v507_v33 = vsub.f32 %v6704_v50, %v502_v42  ;;  %519 = vadd.xlane.f32.xlu1 %v518_v28 }
 0x444   :  { %v6800_v48 = vpop.eup %5999  ;;  %v516_v49 = vmul.f32 1.442695, %v507_v33 }
 0x445   :  { %v521_v38 = vsel %vm487_vm6, %v6800_v48, 0.0 }
 0x446   :  { %6005 = vpow2.f32 %v516_v49  ;;  %522 = vadd.xlane.f32.xlu0 %v521_v38 }
 0x448   :  { %v6804_v44 = vpop.eup %6001 }
 0x449   :  { %v524_v52 = vsel %vm487_vm6, %v6804_v44, 0.0  ;;  %v798_v61 = vpop.xlane.xlu1 %797 }
 0x44a   :  { %525 = vadd.xlane.f32.xlu1 %v524_v52  ;;  %v809_v0 = vsub.f32 %v6709_v58, %v798_v61 }
 0x44c   :  { %v6808_v54 = vpop.eup %6003  ;;  %v815_v30 = vmul.f32 1.442695, %v809_v0 }
 0x44d   :  { %v527_v50 = vsel %vm487_vm6, %v6808_v54, 0.0 }
 0x44e   :  { %528 = vadd.xlane.f32.xlu0 %v527_v50  ;;  %6007 = vpow2.f32 %v815_v30 }
 0x450   :  { %v6812_v56 = vpop.eup %6005 }
 0x451   :  { %v530_v60 = vsel %vm487_vm6, %v6812_v56, 0.0  ;;  %v804_v63 = vpop.xlane.xlu1 %803 }
 0x452   :  { %531 = vadd.xlane.f32.xlu1 %v530_v60  ;;  %v811_v17 = vsub.f32 %v6714_v1, %v804_v63 }
 0x454   :  { %v819_v24 = vmul.f32 1.442695, %v811_v17 }
 0x458   :  { %v6826_v32 = vpop.eup %6007 }
 0x459   :  { %v1100_v5 = vpop.xlane.xlu1 %1099 }
 0x45a   :  { %v1113_v10 = vsub.f32 %v6721_v9, %v1100_v5 }
 0x45c   :  { %v1118_v21 = vmul.f32 1.442695, %v1113_v10 }
 0x461   :  { %v1106_v31 = vpop.xlane.xlu1 %1105 }
 0x462   :  { %v1115_v41 = vsub.f32 %v6726_v18, %v1106_v31 }
 0x464   :  { %1161 = vrot.lane.b32.xlu0 %v6482_v15, %s8200_s28 }
 0x469   :  { %v1112_v18 = vpop.xlane.xlu1 %1111 }
 0x46a   :  { %v1117_v0 = vsub.f32 %v6731_v27, %v1112_v18 }
 0x472   :  { %v795_v12 = vpop.xlane.xlu0 %794 }
 0x473   :  { %v808_v26 = vsub.f32 %v6736_v36, %v795_v12  ;;  %v1126_v12 = vmul.f32 1.442695, %v1117_v0  ;;  %v5889_v0 = vunpack.i.l.bf16 %v6785_v14 }
 0x475   :  { %v813_v22 = vmul.f32 1.442695, %v808_v26 }
 0x476   :  { %v801_v46 = vpop.xlane.xlu0 %800 }
 0x477   :  { %6009 = vpow2.f32 %v813_v22  ;;  %v810_v23 = vsub.f32 %v6744_v45, %v801_v46 }
 0x478   :  { %6011 = vpow2.f32 %v1118_v21 }
 0x479   :  { %v817_v58 = vmul.f32 1.442695, %v810_v23 }
 0x47a   :  { %v807_v25 = vpop.xlane.xlu0 %806 }
 0x47b   :  { %6013 = vpow2.f32 %v817_v58  ;;  %v812_v29 = vsub.f32 %v6749_v53, %v807_v25  ;;  %v826_v53 = vsel %vm487_vm6, %v6826_v32, 0.0 }
 0x47c   :  { %6015 = vpow2.f32 %v819_v24 }
 0x47d   :  { %v821_v9 = vmul.f32 1.442695, %v812_v29 }
 0x47e   :  { %v1103_v36 = vpop.xlane.xlu0 %1102 }
 0x47f   :  { %v1114_v1 = vsub.f32 %v6759_v62, %v1103_v36  ;;  %6017 = vpow2.f32 %v821_v9  ;;  %v1122_v62 = vmul.f32 1.442695, %v1115_v41 }
 0x481   :  { %v6829_v34 = vpop.eup %6009  ;;  %v1120_v45 = vmul.f32 1.442695, %v1114_v1  ;;  %v1408_v1 = vpop.xlane.xlu1 %1407 }
 0x482   :  { %v1109_v42 = vpop.xlane.xlu0 %1108  ;;  %v823_v28 = vsel %vm487_vm6, %v6829_v34, 0.0  ;;  %v6836_v33 = vpop.eup %6011  ;;  %v1419_v41 = vsub.f32 %v6739_v39, %v1408_v1 }
 0x483   :  { %824 = vadd.xlane.f32.xlu1 %v823_v28  ;;  %827 = vadd.xlane.f32.xlu0 %v826_v53  ;;  %6019 = vpow2.f32 %v1120_v45  ;;  %v1116_v38 = vsub.f32 %v6764_v3, %v1109_v42  ;;  %v1128_v60 = vsel %vm487_vm6, %v6836_v33, 0.0 }
 0x484   :  { %6021 = vpow2.f32 %v1122_v62  ;;  %v1425_v45 = vmul.f32 1.442695, %v1419_v41  ;;  %v5900_v41 = vunpack.i.h.bf16 %v6789_v35 }
 0x485   :  { %v6838_v49 = vpop.eup %6013  ;;  %v1124_v5 = vmul.f32 1.442695, %v1116_v38  ;;  %v1414_v28 = vpop.xlane.xlu1 %1413 }
 0x486   :  { %v1405_v52 = vpop.xlane.xlu0 %1404  ;;  %v829_v50 = vsel %vm487_vm6, %v6838_v49, 0.0  ;;  %v6845_v61 = vpop.eup %6015  ;;  %v1421_v53 = vsub.f32 %v6754_v57, %v1414_v28 }
 0x487   :  { %v1418_v63 = vsub.f32 %v6769_v7, %v1405_v52  ;;  %830 = vadd.xlane.f32.xlu1 %v829_v50  ;;  %1129 = vadd.xlane.f32.xlu0 %v1128_v60  ;;  %v832_v3 = vsel %vm487_vm6, %v6845_v61, 0.0 }
 0x488   :  { %v1429_v38 = vmul.f32 1.442695, %v1421_v53 }
 0x489   :  { %v1423_v30 = vmul.f32 1.442695, %v1418_v63  ;;  %v6851_v10 = vpop.eup %6017  ;;  %v5890_v63 = vunpack.i.h.bf16 %v6785_v14 }
 0x48a   :  { %v835_v26 = vsel %vm487_vm6, %v6851_v10, 0.0  ;;  %v1411_v29 = vpop.xlane.xlu0 %1410 }
 0x48b   :  { %6023 = vpow2.f32 %v1423_v30  ;;  %833 = vadd.xlane.f32.xlu1 %v832_v3  ;;  %v1420_v42 = vsub.f32 %v6774_v8, %v1411_v29 }
 0x48c   :  { %6025 = vpow2.f32 %v1124_v5 }
 0x48d   :  { %v6855_v7 = vpop.eup %6019  ;;  %6027 = vpow2.f32 %v1126_v12  ;;  %v1427_v62 = vmul.f32 1.442695, %v1420_v42 }
 0x48e   :  { %v1131_v27 = vsel %vm487_vm6, %v6855_v7, 0.0  ;;  %v6859_v17 = vpop.eup %6021  ;;  %v1417_v9 = vpop.xlane.xlu0 %1416 }
 0x48f   :  { %836 = vadd.xlane.f32.xlu1 %v835_v26  ;;  %v1134_v22 = vsel %vm487_vm6, %v6859_v17, 0.0  ;;  %v1422_v31 = vsub.f32 %v6779_v40, %v1417_v9  ;;  %v5895_v26 = vunpack.i.h.bf16 %v6618_v19 }
 0x491   :  { %v1431_v36 = vmul.f32 1.442695, %v1422_v31 }
 0x493   :  { %1132 = vadd.xlane.f32.xlu1 %v1131_v27  ;;  %6029 = vpow2.f32 %v1431_v36  ;;  %v5894_v27 = vunpack.i.l.bf16 %v6618_v19 }
 0x494   :  { %6031 = vpow2.f32 %v1425_v45 }
 0x495   :  { %v6861_v21 = vpop.eup %6023  ;;  %6033 = vpow2.f32 %v1427_v62  ;;  %v5905_v62 = vunpack.i.h.bf16 %v6819_v2 }
 0x496   :  { %v1433_v46 = vsel %vm487_vm6, %v6861_v21, 0.0  ;;  %v6867_v23 = vpop.eup %6025  ;;  %6035 = vpow2.f32 %v1429_v38  ;;  %v5904_v38 = vunpack.i.l.bf16 %v6819_v2 }
 0x497   :  { %1135 = vadd.xlane.f32.xlu1 %v1134_v22  ;;  %1434 = vadd.xlane.f32.xlu0 %v1433_v46  ;;  %v1137_v24 = vsel %vm487_vm6, %v6867_v23, 0.0  ;;  %v6871_v58 = vpop.eup %6027  ;;  %v5655_v22 = vpack.c.bf16 %v5890_v63, %v5889_v0 }
 0x498   :  { %v1140_v25 = vsel %vm487_vm6, %v6871_v58, 0.0 }
 0x49b   :  { %1138 = vadd.xlane.f32.xlu1 %v1137_v24  ;;  %v5658_v24 = vpack.c.bf16 %v5895_v26, %v5894_v27 }
 0x49f   :  { %1141 = vadd.xlane.f32.xlu1 %v1140_v25 }
 0x4ad   :  { %5907 = vrot.lane.b32.xlu0 %v6470_v4, %s8198_s18  ;;  %v6883_v4 = vpop.eup %6029 }
 0x4ae   :  { %v6887_v39 = vpop.eup %6031 }
 0x4af   :  { %v1436_v8 = vsel %vm487_vm6, %v6887_v39, 0.0  ;;  %v6891_v52 = vpop.eup %6033 }
 0x4b0   :  { %5912 = vrot.lane.b32.xlu1 %v6480_v13, %s8198_s18  ;;  %v1445_v13 = vsel %vm487_vm6, %v6883_v4, 0.0  ;;  %v1439_v50 = vsel %vm487_vm6, %v6891_v52, 0.0  ;;  %v6895_v60 = vpop.eup %6035 }
 0x4b1   :  { %v1442_v12 = vsel %vm487_vm6, %v6895_v60, 0.0 }
 0x4cc   :  { %1446 = vadd.xlane.f32.xlu0 %v1445_v13 }
 0x4cf   :  { %v520_v40 = vpop.xlane.xlu1 %519 }
 0x4d0   :  { %6037 = vrcp.f32 %v520_v40 }
 0x4d3   :  { %v523_v18 = vpop.xlane.xlu0 %522 }
 0x4d4   :  { %6039 = vrcp.f32 %v523_v18  ;;  %1437 = vadd.xlane.f32.xlu1 %v1436_v8  ;;  %v5672_v18 = vpack.c.bf16 %v5905_v62, %v5904_v38 }
 0x4d7   :  { %v526_v57 = vpop.xlane.xlu1 %525 }
 0x4d8   :  { %6041 = vrcp.f32 %v526_v57  ;;  %1440 = vadd.xlane.f32.xlu1 %v1439_v50 }
 0x4da   :  { %v6038_v5 = vpop.eup %6037 }
 0x4db   :  { %v538_v30 = vmul.f32 %v6038_v5, %v6795_v37  ;;  %v529_v3 = vpop.xlane.xlu0 %528 }
 0x4dc   :  { %6043 = vrcp.f32 %v529_v3  ;;  %1443 = vadd.xlane.f32.xlu1 %v1442_v12 }
 0x4dd   :  { %5049 = vmatmul.mubr.msk.f32.vlgmr.msra.gmra.mrb[10].mxu1 %vm487_vm6, %v538_v30 }
 0x4de   :  { %v6040_v46 = vpop.eup %6039  ;;  %5656 = vmatpush3.bf16.msra.mxu1 %v5655_v22  ;;  %5051 = vmatprep.mubr.msk.f32.mxu1 %vm6239_vm1, %v6238_v6 }
 0x4df   :  { %v532_v14 = vpop.xlane.xlu1 %531  ;;  %5657 = vmatprep.subr.bf16.mxu1 %v6240_v11  ;;  %v539_v37 = vmul.f32 %v6040_v46, %v6800_v48 }
 0x4e0   :  { %6045 = vrcp.f32 %v532_v14 }
 0x4e1   :  { %5052 = vmatmul.mubr.msk.f32.gmra.mrb[12].mxu1 %vm487_vm6, %v539_v37 }
 0x4e2   :  { %v6042_v19 = vpop.eup %6041  ;;  %5659 = vmatpush3.bf16.msra.mxu1 %v5658_v24  ;;  %5054 = vmatprep.mubr.msk.f32.mxu1 %vm6239_vm1, %v6238_v6 }
 0x4e3   :  { %5096 = vmatprep.subr.mxu1 %v6238_v6  ;;  %v540_v25 = vmul.f32 %v6042_v19, %v6804_v44 }
 0x4e5   :  { %5055 = vmatmul.mubr.msk.f32.gmra.mrb[14].mxu1 %vm487_vm6, %v540_v25 }
 0x4e6   :  { %v6044_v29 = vpop.eup %6043  ;;  %5097 = vmatpush3.msra.mxu1 %v6787_v16  ;;  %5057 = vmatprep.mubr.msk.f32.mxu1 %vm6239_vm1, %v6238_v6  ;;  %v1162_v16 = vpop.permute.xlu0 %1161 }
 0x4e7   :  { %v541_v48 = vmul.f32 %v6044_v29, %v6808_v54  ;;  %5668 = vmatprep.subr.bf16.mxu1 %v6240_v11 }
 0x4e9   :  { %5058 = vmatmul.mubr.msk.f32.gmra.mrb[16].mxu1 %vm487_vm6, %v541_v48 }
 0x4ea   :  { %v6046_v9 = vpop.eup %6045  ;;  %5060 = vmatprep.mubr.msk.f32.mxu1 %vm6239_vm1, %v6238_v6 }
 0x4eb   :  { %v542_v44 = vmul.f32 %v6046_v9, %v6812_v56  ;;  %v5899_v56 = vunpack.i.l.bf16 %v6789_v35 }
 0x4ed   :  { %1466 = vrot.lane.b32.xlu1 %v6482_v15, %s8198_s18  ;;  %5061 = vmatmul.mubr.msk.f32.gmra.mrb[18].mxu1 %vm487_vm6, %v542_v44  ;;  %v5669_v53 = vpack.c.bf16 %v5900_v41, %v5899_v56  ;;  %s8223_s18 = smov 16  }
 0x4ee   :  { %5098 = vmatprep.mubr.msk.f32.mxu1 %vm6239_vm1, %v6238_v6 }
 0x510   :  { %v825_v54 = vpop.xlane.xlu1 %824  ;;  %v828_v31 = vpop.xlane.xlu0 %827 }
 0x511   :  { %6047 = vrcp.f32 %v825_v54 }
 0x512   :  { %6049 = vrcp.f32 %v828_v31 }
 0x514   :  { %v831_v36 = vpop.xlane.xlu1 %830  ;;  %v1130_v13 = vpop.xlane.xlu0 %1129 }
 0x515   :  { %6051 = vrcp.f32 %v831_v36 }
 0x518   :  { %v834_v1 = vpop.xlane.xlu1 %833 }
 0x519   :  { %6053 = vrcp.f32 %v834_v1 }
 0x51b   :  { %v6048_v45 = vpop.eup %6047 }
 0x51c   :  { %v843_v15 = vmul.f32 %v6048_v45, %v6829_v34  ;;  %v837_v42 = vpop.xlane.xlu1 %836  ;;  %v6050_v28 = vpop.eup %6049 }
 0x51d   :  { %6055 = vrcp.f32 %v837_v42  ;;  %v844_v34 = vmul.f32 %v6050_v28, %v6826_v32 }
 0x51e   :  { %5099 = vmatmul.mubr.msk.f32.vlgmr.msra.gmra.mrb[20].mxu1 %vm487_vm6, %v843_v15  ;;  %6057 = vrcp.f32 %v1130_v13 }
 0x51f   :  { %5670 = vmatpush3.bf16.msra.mxu1 %v5669_v53  ;;  %5101 = vmatprep.mubr.msk.f32.mxu1 %vm6239_vm1, %v6238_v6  ;;  %v6052_v40 = vpop.eup %6051 }
 0x520   :  { %v1133_v35 = vpop.xlane.xlu1 %1132  ;;  %5671 = vmatprep.subr.bf16.mxu1 %v6240_v11  ;;  %v845_v57 = vmul.f32 %v6052_v40, %v6838_v49 }
 0x521   :  { %6059 = vrcp.f32 %v1133_v35 }
 0x522   :  { %5102 = vmatmul.mubr.msk.f32.gmra.mrb[22].mxu1 %vm487_vm6, %v844_v34 }
 0x523   :  { %5673 = vmatpush3.bf16.msra.mxu1 %v5672_v18  ;;  %5104 = vmatprep.mubr.msk.f32.mxu1 %vm6239_vm1, %v6238_v6  ;;  %v6054_v50 = vpop.eup %6053 }
 0x524   :  { %v1136_v2 = vpop.xlane.xlu1 %1135  ;;  %v1435_v8 = vpop.xlane.xlu0 %1434  ;;  %5146 = vmatprep.subr.mxu1 %v6238_v6  ;;  %v846_v63 = vmul.f32 %v6054_v50, %v6845_v61 }
 0x525   :  { %6061 = vrcp.f32 %v1136_v2 }
 0x526   :  { %5105 = vmatmul.mubr.msk.f32.gmra.mrb[24].mxu1 %vm487_vm6, %v845_v57 }
 0x527   :  { %5147 = vmatpush3.msra.mxu1 %v1162_v16  ;;  %5107 = vmatprep.mubr.msk.f32.mxu1 %vm6239_vm1, %v6238_v6  ;;  %v6056_v0 = vpop.eup %6055 }
 0x528   :  { %v1139_v32 = vpop.xlane.xlu1 %1138  ;;  %5682 = vmatprep.subr.bf16.mxu1 %v6240_v11  ;;  %v5908_v5 = vpop.permute.xlu0 %5907  ;;  %v847_v30 = vmul.f32 %v6056_v0, %v6851_v10 }
 0x529   :  { %v6058_v3 = vpop.eup %6057  ;;  %v5910_v12 = vunpack.i.h.bf16 %v5908_v5  ;;  %v5909_v26 = vunpack.i.l.bf16 %v5908_v5  ;;  %6063 = vrcp.f32 %v1139_v32 }
 0x52a   :  { %5108 = vmatmul.mubr.msk.f32.gmra.mrb[26].mxu1 %vm487_vm6, %v846_v63  ;;  %v1148_v61 = vmul.f32 %v6058_v3, %v6836_v33  ;;  %v1656_v3 = vld [vmem:[%s8186_s8 + $0x8] sm:$0xff] }
 0x52b   :  { %5110 = vmatprep.mubr.msk.f32.mxu1 %vm6239_vm1, %v6238_v6  ;;  %v6060_v22 = vpop.eup %6059  ;;  %v5683_v46 = vpack.c.bf16 %v5910_v12, %v5909_v26  ;;  %v1657_v12 = vld [vmem:[%s8186_s8 + $0x10] sm:$0xff] }
 0x52c   :  { %v1142_v49 = vpop.xlane.xlu1 %1141  ;;  %v1149_v24 = vmul.f32 %v6060_v22, %v6855_v7 }
 0x52d   :  { %6065 = vrcp.f32 %v1142_v49 }
 0x52e   :  { %5111 = vmatmul.mubr.msk.f32.gmra.mrb[28].mxu1 %vm487_vm6, %v847_v30  ;;  %6067 = vrcp.f32 %v1435_v8  ;;  %v1655_v30 = vld [vmem:[%s8186_s8] sm:$0xff] }
 0x52f   :  { %5148 = vmatprep.mubr.msk.f32.mxu1 %vm6239_vm1, %v6238_v6  ;;  %v6062_v19 = vpop.eup %6061 }
 0x530   :  { %v5913_v27 = vpop.permute.xlu1 %5912  ;;  %v1150_v33 = vmul.f32 %v6062_v19, %v6859_v17 }
 0x531   :  { %v5915_v14 = vunpack.i.h.bf16 %v5913_v27  ;;  %v5914_v37 = vunpack.i.l.bf16 %v5913_v27  ;;  %v1658_v27 = vld [vmem:[%s8186_s8 + $0x18] sm:$0xff] }
 0x532   :  { %5149 = vmatmul.mubr.msk.f32.vlgmr.msra.gmra.mrb[30].mxu1 %vm487_vm6, %v1148_v61  ;;  %v5689_v61 = vpack.c.bf16 %v1656_v3, %v1655_v30  ;;  %v5692_v22 = vpack.c.bf16 %v1658_v27, %v1657_v12 }
 0x533   :  { %v5686_v10 = vpack.c.bf16 %v5915_v14, %v5914_v37  ;;  %5684 = vmatpush3.bf16.msra.mxu1 %v5683_v46  ;;  %5151 = vmatprep.mubr.msk.f32.mxu1 %vm6239_vm1, %v6238_v6  ;;  %v6064_v25 = vpop.eup %6063 }
 0x534   :  { %5685 = vmatprep.subr.bf16.mxu1 %v6240_v11  ;;  %v1151_v29 = vmul.f32 %v6064_v25, %v6867_v23  ;;  %5690 = vmatpush3.bf16.msra.mxu0 %v5689_v61 }
 0x535   :  { %5691 = vmatprep.subr.bf16.mxu0 %v6240_v11 }
 0x536   :  { %5152 = vmatmul.mubr.msk.f32.gmra.mrb[32].mxu1 %vm487_vm6, %v1149_v24 }
 0x537   :  { %5687 = vmatpush3.bf16.msra.mxu1 %v5686_v10  ;;  %5154 = vmatprep.mubr.msk.f32.mxu1 %vm6239_vm1, %v6238_v6  ;;  %v6066_v7 = vpop.eup %6065 }
 0x538   :  { %5196 = vmatprep.subr.mxu1 %v6238_v6  ;;  %v1152_v48 = vmul.f32 %v6066_v7, %v6871_v58  ;;  %v6068_v23 = vpop.eup %6067  ;;  %5693 = vmatpush3.bf16.msra.mxu0 %v5692_v22 }
 0x539   :  { %v1453_v16 = vmul.f32 %v6068_v23, %v6861_v21  ;;  %5700 = vmatprep.subr.bf16.mxu0 %v6240_v11 }
 0x53a   :  { %5155 = vmatmul.mubr.msk.f32.gmra.mrb[34].mxu1 %vm487_vm6, %v1150_v33 }
 0x53b   :  { %5157 = vmatprep.mubr.msk.f32.mxu1 %vm6239_vm1, %v6238_v6 }
 0x53e   :  { %5158 = vmatmul.mubr.msk.f32.gmra.mrb[36].mxu1 %vm487_vm6, %v1151_v29 }
 0x53f   :  { %5160 = vmatprep.mubr.msk.f32.mxu1 %vm6239_vm1, %v6238_v6 }
 0x542   :  { %5161 = vmatmul.mubr.msk.f32.gmra.mrb[38].mxu1 %vm487_vm6, %v1152_v48 }
 0x543   :  { %5198 = vmatprep.mubr.msk.f32.mxu1 %vm6239_vm1, %v6238_v6 }
 0x559   :  { %v1447_v54 = vpop.xlane.xlu0 %1446 }
 0x561   :  { %v1438_v17 = vpop.xlane.xlu1 %1437 }
 0x562   :  { %6069 = vrcp.f32 %v1438_v17 }
 0x565   :  { %v1441_v9 = vpop.xlane.xlu1 %1440 }
 0x566   :  { %6071 = vrcp.f32 %v1441_v9 }
 0x569   :  { %v1444_v44 = vpop.xlane.xlu1 %1443 }
 0x56a   :  { %6073 = vrcp.f32 %v1444_v44 }
 0x56b   :  { %6075 = vrcp.f32 %v1447_v54 }
 0x56c   :  { %v6070_v36 = vpop.eup %6069 }
 0x56d   :  { %v1467_v31 = vpop.permute.xlu1 %1466  ;;  %v1454_v58 = vmul.f32 %v6070_v36, %v6887_v39 }
 0x56e   :  { %5197 = vmatpush3.msra.mxu1 %v1467_v31 }
 0x56f   :  { %5199 = vmatmul.mubr.msk.f32.vlgmr.msra.gmra.mrb[40].mxu1 %vm487_vm6, %v1453_v16  ;;  %5694 = vmatprep.subr.bf16.mxu1 %v6240_v11 }
 0x570   :  { %5201 = vmatprep.mubr.msk.f32.mxu1 %vm6239_vm1, %v6238_v6  ;;  %v6072_v1 = vpop.eup %6071 }
 0x571   :  { %v1455_v21 = vmul.f32 %v6072_v1, %v6891_v52 }
 0x573   :  { %5202 = vmatmul.mubr.msk.f32.gmra.mrb[42].mxu1 %vm487_vm6, %v1454_v58 }
 0x574   :  { %5204 = vmatprep.mubr.msk.f32.mxu1 %vm6239_vm1, %v6238_v6  ;;  %v6074_v41 = vpop.eup %6073 }
 0x575   :  { %v1456_v56 = vmul.f32 %v6074_v41, %v6895_v60  ;;  %v6076_v45 = vpop.eup %6075 }
 0x576   :  { %v1457_v39 = vmul.f32 %v6076_v45, %v6883_v4 }
 0x577   :  { %5205 = vmatmul.mubr.msk.f32.gmra.mrb[44].mxu1 %vm487_vm6, %v1455_v21 }
 0x578   :  { %5207 = vmatprep.mubr.msk.f32.mxu1 %vm6239_vm1, %v6238_v6 }
 0x57b   :  { %5208 = vmatmul.mubr.msk.f32.gmra.mrb[46].mxu1 %vm487_vm6, %v1456_v56 }
 0x57c   :  { %5210 = vmatprep.mubr.msk.f32.mxu1 %vm6239_vm1, %v6238_v6 }
 0x57f   :  { %5211 = vmatmul.mubr.msk.f32.gmra.mrb[48].mxu1 %vm487_vm6, %v1457_v39 }
 0x580   :  { %5244 = vmatprep.mubr.msk.f32.mxu1 %vm6239_vm1, %v6238_v6 }
 0x5b0   :  { %v6999_v52 = vpop.f32.mrb[10].mxu1 }
 0x5b1   :  { %v5050_v15 = vpop.f32.mrb[11].mxu1 }
 0x5b4   :  { %v7001_v42 = vpop.f32.mrb[12].mxu1 }
 0x5b5   :  { %v5053_v28 = vpop.f32.mrb[13].mxu1 }
 0x5b8   :  { %v7003_v60 = vpop.f32.mrb[14].mxu1 }
 0x5b9   :  { %v5056_v53 = vpop.f32.mrb[15].mxu1 }
 0x5bc   :  { %v7005_v62 = vpop.f32.mrb[16].mxu1 }
 0x5bd   :  { %v5059_v38 = vpop.f32.mrb[17].mxu1 }
 0x5c0   :  { %v7007_v13 = vpop.f32.mrb[18].mxu1 }
 0x5c1   :  { %v5062_v4 = vpop.f32.mrb[19].mxu1 }
 0x5f1   :  { %v944_v35 = vpop.f32.mrb[20].mxu1 }
 0x5f2   :  { %1583 = vrot.lane.b32.xlu1 %v944_v35, %s8210_s3  ;;  %v5100_v34 = vpop.f32.mrb[21].mxu1 }
 0x5f5   :  { %v949_v40 = vpop.f32.mrb[22].mxu1 }
 0x5f6   :  { %1585 = vrot.lane.b32.xlu0 %v949_v40, %s8210_s3  ;;  %v5103_v18 = vpop.f32.mrb[23].mxu1 }
 0x5f9   :  { %v954_v2 = vpop.f32.mrb[24].mxu1 }
 0x5fa   :  { %1587 = vrot.lane.b32.xlu1 %v954_v2, %s8210_s3  ;;  %v5106_v8 = vpop.f32.mrb[25].mxu1 }
 0x5fd   :  { %v959_v57 = vpop.f32.mrb[26].mxu1 }
 0x5fe   :  { %1589 = vrot.lane.b32.xlu1 %v959_v57, %s8210_s3  ;;  %v5109_v50 = vpop.f32.mrb[27].mxu1 }
 0x601   :  { %v964_v32 = vpop.f32.mrb[28].mxu1 }
 0x602   :  { %v5112_v63 = vpop.f32.mrb[29].mxu1 }
 0x605   :  { %v1249_v0 = vpop.f32.mrb[30].mxu1 }
 0x606   :  { %1603 = vrot.lane.b32.xlu1 %v1249_v0, %s8208_s19  ;;  %v5150_v5 = vpop.f32.mrb[31].mxu1 }
 0x607   :  { %v1659_v5 = vlaneseq }
 0x609   :  { %v1254_v49 = vpop.f32.mrb[32].mxu1 }
 0x60a   :  { %1605 = vrot.lane.b32.xlu1 %v1254_v49, %s8208_s19  ;;  %v5153_v26 = vpop.f32.mrb[33].mxu1  ;;  %v7073_v49 = vshrl.u32 %v1659_v5, 7  ;;  %v1978_v5 = vld [vmem:[%s8189_s11] sm:$0xff] }
 0x60c   :  { %v7076_v30 = vsub.s32 0, %v7073_v49 }
 0x60d   :  { %v1259_v46 = vpop.f32.mrb[34].mxu1 }
 0x60e   :  { %1607 = vrot.lane.b32.xlu1 %v1259_v46, %s8208_s19  ;;  %v5156_v14 = vpop.f32.mrb[35].mxu1 }
 0x611   :  { %v1264_v37 = vpop.f32.mrb[36].mxu1 }
 0x612   :  { %1609 = vrot.lane.b32.xlu0 %v1264_v37, %s8208_s19  ;;  %v5159_v10 = vpop.f32.mrb[37].mxu1 }
 0x615   :  { %v1269_v24 = vpop.f32.mrb[38].mxu1 }
 0x616   :  { %1591 = vrot.lane.b32.xlu0 %v964_v32, %s8210_s3  ;;  %v5162_v19 = vpop.f32.mrb[39].mxu1 }
 0x642   :  { %v1554_v33 = vpop.f32.mrb[40].mxu1 }
 0x643   :  { %1623 = vrot.lane.b32.xlu1 %v1554_v33, %s8206_s26  ;;  %v5200_v25 = vpop.f32.mrb[41].mxu1 }
 0x646   :  { %v1559_v29 = vpop.f32.mrb[42].mxu1 }
 0x647   :  { %1625 = vrot.lane.b32.xlu1 %v1559_v29, %s8206_s26  ;;  %v5203_v7 = vpop.f32.mrb[43].mxu1 }
 0x64a   :  { %v1564_v48 = vpop.f32.mrb[44].mxu1 }
 0x64b   :  { %1627 = vrot.lane.b32.xlu1 %v1564_v48, %s8206_s26  ;;  %v5206_v17 = vpop.f32.mrb[45].mxu1 }
 0x64e   :  { %v1569_v9 = vpop.f32.mrb[46].mxu1 }
 0x64f   :  { %1629 = vrot.lane.b32.xlu1 %v1569_v9, %s8206_s26  ;;  %v5209_v44 = vpop.f32.mrb[47].mxu1 }
 0x652   :  { %v1574_v23 = vpop.f32.mrb[48].mxu1 }
 0x653   :  { %1611 = vrot.lane.b32.xlu1 %v1269_v24, %s8208_s19  ;;  %1631 = vrot.lane.b32.xlu0 %v1574_v23, %s8206_s26  ;;  %v5212_v16 = vpop.f32.mrb[49].mxu1 }
 0x664   :  { %v1584_v54 = vpop.permute.xlu1 %1583 }
 0x665   :  { %v1638_v41 = vsel %vm376_vm4, %v6999_v52, %v1584_v54 }
 0x668   :  { %v1586_v56 = vpop.permute.xlu0 %1585 }
 0x669   :  { %v1639_v28 = vsel %vm376_vm4, %v7001_v42, %v1586_v56 }
 0x66c   :  { %v1588_v31 = vpop.permute.xlu1 %1587 }
 0x66d   :  { %v1640_v35 = vsel %vm376_vm4, %v7003_v60, %v1588_v31 }
 0x670   :  { %v1590_v36 = vpop.permute.xlu1 %1589 }
 0x671   :  { %v1641_v18 = vsel %vm376_vm4, %v7005_v62, %v1590_v36 }
 0x678   :  { %v1604_v58 = vpop.permute.xlu1 %1603 }
 0x679   :  { %v1644_v45 = vsel %vm1643_vm7, %v1638_v41, %v1604_v58 }
 0x67c   :  { %v1606_v1 = vpop.permute.xlu1 %1605 }
 0x67d   :  { %v1645_v53 = vsel %vm1643_vm7, %v1639_v28, %v1606_v1 }
 0x680   :  { %v1608_v21 = vpop.permute.xlu1 %1607 }
 0x681   :  { %v1646_v34 = vsel %vm1643_vm7, %v1640_v35, %v1608_v21 }
 0x684   :  { %v1610_v52 = vpop.permute.xlu0 %1609 }
 0x685   :  { %v1647_v2 = vsel %vm1643_vm7, %v1641_v18, %v1610_v52 }
 0x688   :  { %v1592_v8 = vpop.permute.xlu0 %1591 }
 0x689   :  { %v1642_v50 = vsel %vm376_vm4, %v7007_v13, %v1592_v8  ;;  %v7081_v13 = vld [vmem:[%s8190_s12] sm:$0x3f] }
 0x68a   :  { %v1662_v3 = vrot.slane %v7081_v13, %v7076_v30 }
 0x6b5   :  { %v1624_v39 = vpop.permute.xlu1 %1623 }
 0x6b6   :  { %v1650_v15 = vsel %vm1649_vm8, %v1644_v45, %v1624_v39 }
 0x6b7   :  { %5222 = vmatmul.mubr.msk.f32.vlgmr.msra.gmra.mrb[50].mxu0 %vm255_vm3, %v1650_v15 }
 0x6b8   :  { %5224 = vmatprep.mubr.msk.f32.mxu0 %vm6239_vm1, %v6238_v6 }
 0x6b9   :  { %v1626_v38 = vpop.permute.xlu1 %1625 }
 0x6ba   :  { %v1651_v4 = vsel %vm1649_vm8, %v1645_v53, %v1626_v38 }
 0x6bb   :  { %5225 = vmatmul.mubr.msk.f32.gmra.mrb[52].mxu0 %vm255_vm3, %v1651_v4 }
 0x6bc   :  { %5227 = vmatprep.mubr.msk.f32.mxu0 %vm6239_vm1, %v6238_v6 }
 0x6bd   :  { %v1628_v42 = vpop.permute.xlu1 %1627 }
 0x6be   :  { %v1652_v40 = vsel %vm1649_vm8, %v1646_v34, %v1628_v42 }
 0x6bf   :  { %5228 = vmatmul.mubr.msk.f32.gmra.mrb[54].mxu0 %vm255_vm3, %v1652_v40 }
 0x6c0   :  { %5230 = vmatprep.mubr.msk.f32.mxu0 %vm6239_vm1, %v6238_v6 }
 0x6c1   :  { %v1630_v60 = vpop.permute.xlu1 %1629 }
 0x6c2   :  { %v1653_v57 = vsel %vm1649_vm8, %v1647_v2, %v1630_v60 }
 0x6c3   :  { %5231 = vmatmul.mubr.msk.f32.gmra.mrb[56].mxu0 %vm255_vm3, %v1653_v57  ;;  %v1857_v57 = vld [vmem:[%s8187_s9] sm:$0xff] }
 0x6c4   :  { %5233 = vmatprep.mubr.msk.f32.mxu0 %vm6239_vm1, %v6238_v6 }
 0x6c5   :  { %v1612_v32 = vpop.permute.xlu1 %1611  ;;  %v1632_v63 = vpop.permute.xlu0 %1631 }
 0x6c6   :  { %v1648_v62 = vsel %vm1643_vm7, %v1642_v50, %v1612_v32  ;;  %v1858_v50 = vld [vmem:[%s8187_s9 + $0x8] sm:$0xff] }
 0x6c7   :  { %v1654_v0 = vsel %vm1649_vm8, %v1648_v62, %v1632_v63  ;;  %v5695_v32 = vpack.c.bf16 %v1858_v50, %v1857_v57  ;;  %v1859_v63 = vld [vmem:[%s8187_s9 + $0x10] sm:$0xff]  ;;  %v1860_v62 = vld [vmem:[%s8187_s9 + $0x18] sm:$0xff] }
 0x6c8   :  { %5234 = vmatmul.mubr.msk.f32.gmra.mrb[58].mxu0 %vm255_vm3, %v1654_v0  ;;  %v5698_v0 = vpack.c.bf16 %v1860_v62, %v1859_v63 }
 0x6c9   :  { %5275 = vmatprep.mubr.msk.f32.mxu0 %vm6239_vm1, %v6238_v6  ;;  %5696 = vmatpush3.bf16.msra.mxu1 %v5695_v32 }
 0x6ca   :  { %5697 = vmatprep.subr.bf16.mxu1 %v6240_v11 }
 0x6cd   :  { %5699 = vmatpush3.bf16.msra.mxu1 %v5698_v0 }
 0x6ce   :  { %5712 = vmatprep.subr.bf16.mxu1 %v6240_v11 }
 0x78a   :  { %v1744_v12 = vpop.f32.mrb[50].mxu0 }
 0x78b   :  { %v1745_v26 = vadd.f32 %v1744_v12, %v1662_v3  ;;  %v5223_v61 = vpop.f32.mrb[51].mxu0  ;;  %v1980_v12 = vld [vmem:[%s8189_s11 + $0x10] sm:$0xff] }
 0x78c   :  { %v1981_v61 = vld [vmem:[%s8189_s11 + $0x18] sm:$0xff] }
 0x78d   :  { %v1768_v27 = vadd.f32 %v1745_v26, %v6419_v43 }
 0x78e   :  { %v1749_v22 = vpop.f32.mrb[52].mxu0 }
 0x78f   :  { %v1750_v46 = vadd.f32 %v1749_v22, %v1662_v3  ;;  %v5226_v14 = vpop.f32.mrb[53].mxu0  ;;  %v1773_v37 = vsel %vm255_vm3, %v1768_v27, 0.0  ;;  %v1982_v22 = vld [vmem:[%s8189_s11 + $0x20] sm:$0xff] }
 0x790   :  { %1774 = vadd.xlane.f32.xlu1 %v1773_v37 }
 0x791   :  { %v1769_v10 = vadd.f32 %v1750_v46, %v6428_v47  ;;  %v1983_v46 = vld [vmem:[%s8189_s11 + $0x28] sm:$0xff] }
 0x792   :  { %v1754_v24 = vpop.f32.mrb[54].mxu0  ;;  %v5707_v14 = vpack.c.bf16 %v1983_v46, %v1982_v22 }
 0x793   :  { %v1755_v19 = vadd.f32 %v1754_v24, %v1662_v3  ;;  %v5229_v33 = vpop.f32.mrb[55].mxu0  ;;  %v1776_v25 = vsel %vm255_vm3, %v1769_v10, 0.0 }
 0x794   :  { %1777 = vadd.xlane.f32.xlu0 %v1776_v25 }
 0x795   :  { %v1770_v29 = vadd.f32 %v1755_v19, %v6437_v51 }
 0x796   :  { %v1759_v7 = vpop.f32.mrb[56].mxu0 }
 0x797   :  { %v1760_v48 = vadd.f32 %v1759_v7, %v1662_v3  ;;  %v5232_v17 = vpop.f32.mrb[57].mxu0  ;;  %v1779_v43 = vsel %vm255_vm3, %v1770_v29, 0.0 }
 0x798   :  { %1780 = vadd.xlane.f32.xlu0 %v1779_v43 }
 0x799   :  { %v1771_v9 = vadd.f32 %v1760_v48, %v6446_v55  ;;  %v1841_v48 = vsub.s32 2, %v7073_v49 }
 0x79b   :  { %v1764_v44 = vpop.f32.mrb[58].mxu0  ;;  %v1782_v23 = vsel %vm255_vm3, %v1771_v9, 0.0 }
 0x79c   :  { %v1765_v47 = vadd.f32 %v1764_v44, %v1662_v3  ;;  %1783 = vadd.xlane.f32.xlu0 %v1782_v23  ;;  %v5235_v16 = vpop.f32.mrb[59].mxu0  ;;  %v1979_v3 = vld [vmem:[%s8189_s11 + $0x8] sm:$0xff]  ;;  %v1842_v23 = vrot.slane %v7081_v13, %v1841_v48 }
 0x79d   :  { %v5701_v26 = vpack.c.bf16 %v1979_v3, %v1978_v5 }
 0x79e   :  { %v1772_v54 = vadd.f32 %v1765_v47, %v6455_v59 }
 0x79f   :  { %5702 = vmatpush3.bf16.msra.mxu0 %v5701_v26 }
 0x7a0   :  { %v1785_v31 = vsel %vm255_vm3, %v1772_v54, 0.0  ;;  %5703 = vmatprep.subr.bf16.mxu0 %v6240_v11 }
 0x7a1   :  { %1786 = vadd.xlane.f32.xlu1 %v1785_v31 }
 0x81d   :  { %v1775_v51 = vpop.xlane.xlu1 %1774 }
 0x81e   :  { %v1789_v36 = vmul.f32 0.03125, %v1775_v51 }
 0x820   :  { %v7095_v58 = vsub.f32 %v1768_v27, %v1789_v36  ;;  %v5704_v27 = vpack.c.bf16 %v1981_v61, %v1980_v12 }
 0x821   :  { %v1778_v1 = vpop.xlane.xlu0 %1777 }
 0x822   :  { %v1790_v21 = vmul.f32 0.03125, %v1778_v1  ;;  %v1799_v55 = vmul.f32 %v7095_v58, %v7095_v58  ;;  %5705 = vmatpush3.bf16.msra.mxu0 %v5704_v27 }
 0x823   :  { %5706 = vmatprep.subr.bf16.mxu0 %v6240_v11 }
 0x824   :  { %v7099_v41 = vsub.f32 %v1769_v10, %v1790_v21  ;;  %v1804_v56 = vsel %vm255_vm3, %v1799_v55, 0.0 }
 0x825   :  { %v1781_v45 = vpop.xlane.xlu0 %1780  ;;  %1805 = vadd.xlane.f32.xlu0 %v1804_v56 }
 0x826   :  { %v1791_v39 = vmul.f32 0.03125, %v1781_v45  ;;  %v1800_v59 = vmul.f32 %v7099_v41, %v7099_v41  ;;  %5708 = vmatpush3.bf16.msra.mxu0 %v5707_v14 }
 0x827   :  { %5709 = vmatprep.subr.bf16.mxu0 %v6240_v11 }
 0x828   :  { %v7104_v15 = vsub.f32 %v1770_v29, %v1791_v39  ;;  %v1807_v28 = vsel %vm255_vm3, %v1800_v59, 0.0 }
 0x829   :  { %v1784_v53 = vpop.xlane.xlu0 %1783  ;;  %1808 = vadd.xlane.f32.xlu1 %v1807_v28 }
 0x82a   :  { %v1792_v38 = vmul.f32 0.03125, %v1784_v53  ;;  %v1801_v4 = vmul.f32 %v7104_v15, %v7104_v15 }
 0x82c   :  { %v7109_v52 = vsub.f32 %v1771_v9, %v1792_v38  ;;  %v1810_v35 = vsel %vm255_vm3, %v1801_v4, 0.0  ;;  %v1850_v9 = vsub.s32 3, %v7073_v49 }
 0x82d   :  { %1811 = vadd.xlane.f32.xlu0 %v1810_v35 }
 0x82e   :  { %v1787_v34 = vpop.xlane.xlu1 %1786  ;;  %v1802_v42 = vmul.f32 %v7109_v52, %v7109_v52  ;;  %v1851_v31 = vrot.slane %v7081_v13, %v1850_v9 }
 0x82f   :  { %v1793_v40 = vmul.f32 0.03125, %v1787_v34 }
 0x830   :  { %v1813_v18 = vsel %vm255_vm3, %v1802_v42, 0.0 }
 0x831   :  { %v7115_v2 = vsub.f32 %v1772_v54, %v1793_v40  ;;  %1814 = vadd.xlane.f32.xlu1 %v1813_v18  ;;  %v1984_v18 = vld [vmem:[%s8189_s11 + $0x30] sm:$0xff] }
 0x833   :  { %v1803_v8 = vmul.f32 %v7115_v2, %v7115_v2 }
 0x835   :  { %v1816_v60 = vsel %vm255_vm3, %v1803_v8, 0.0 }
 0x836   :  { %1817 = vadd.xlane.f32.xlu0 %v1816_v60  ;;  %v4590_v60 = vld [vmem:[%s8188_s10] ss:$0 sm:$0xff] }
 0x8b2   :  { %v1806_v37 = vpop.xlane.xlu0 %1805 }
 0x8b3   :  { %v1819_v10 = vmul.f32 0.03125, %v1806_v37 }
 0x8b5   :  { %v1824_v24 = vadd.f32 1e-05, %v1819_v10 }
 0x8b6   :  { %v1809_v19 = vpop.xlane.xlu1 %1808 }
 0x8b7   :  { %6077 = vrsqrt.f32 %v1824_v24  ;;  %v1820_v33 = vmul.f32 0.03125, %v1809_v19 }
 0x8b9   :  { %v1825_v25 = vadd.f32 1e-05, %v1820_v33 }
 0x8ba   :  { %v1812_v29 = vpop.xlane.xlu0 %1811 }
 0x8bb   :  { %6079 = vrsqrt.f32 %v1825_v25  ;;  %v1821_v7 = vmul.f32 0.03125, %v1812_v29  ;;  %v7224_v25 = vsub.s32 1, %v7073_v49 }
 0x8bd   :  { %v1826_v17 = vadd.f32 1e-05, %v1821_v7  ;;  %v1989_v29 = vrot.slane %v7081_v13, %v7224_v25 }
 0x8be   :  { %v1815_v43 = vpop.xlane.xlu1 %1814 }
 0x8bf   :  { %6081 = vrsqrt.f32 %v1826_v17  ;;  %v1822_v44 = vmul.f32 0.03125, %v1815_v43 }
 0x8c1   :  { %v6078_v47 = vpop.eup %6077  ;;  %v1827_v16 = vadd.f32 1e-05, %v1822_v44 }
 0x8c2   :  { %v1834_v54 = vmul.f32 %v6078_v47, %v7095_v58 }
 0x8c3   :  { %6083 = vrsqrt.f32 %v1827_v16  ;;  %v1818_v51 = vpop.xlane.xlu0 %1817 }
 0x8c4   :  { %v1843_v36 = vmul.f32 %v1842_v23, %v1834_v54  ;;  %v1823_v1 = vmul.f32 0.03125, %v1818_v51 }
 0x8c5   :  { %v6080_v21 = vpop.eup %6079 }
 0x8c6   :  { %v1828_v55 = vadd.f32 1e-05, %v1823_v1  ;;  %v7164_v56 = vadd.f32 %v1851_v31, %v1843_v36  ;;  %v1835_v45 = vmul.f32 %v6080_v21, %v7099_v41 }
 0x8c8   :  { %6085 = vrsqrt.f32 %v1828_v55  ;;  %5245 = vmatmul.mubr.msk.f32.vlgmr.msra.gmra.mrb[50].mxu1 %vm255_vm3, %v7164_v56  ;;  %v1844_v39 = vmul.f32 %v1842_v23, %v1835_v45 }
 0x8c9   :  { %v6082_v58 = vpop.eup %6081  ;;  %5247 = vmatprep.mubr.msk.f32.mxu1 %vm6239_vm1, %v6238_v6 }
 0x8ca   :  { %v7171_v59 = vadd.f32 %v1851_v31, %v1844_v39  ;;  %v1836_v28 = vmul.f32 %v6082_v58, %v7104_v15 }
 0x8cc   :  { %5248 = vmatmul.mubr.msk.f32.gmra.mrb[52].mxu1 %vm255_vm3, %v7171_v59  ;;  %v1845_v53 = vmul.f32 %v1842_v23, %v1836_v28 }
 0x8cd   :  { %v6084_v38 = vpop.eup %6083  ;;  %5250 = vmatprep.mubr.msk.f32.mxu1 %vm6239_vm1, %v6238_v6 }
 0x8ce   :  { %v7178_v41 = vadd.f32 %v1851_v31, %v1845_v53  ;;  %v1837_v4 = vmul.f32 %v6084_v38, %v7109_v52 }
 0x8d0   :  { %5251 = vmatmul.mubr.msk.f32.gmra.mrb[54].mxu1 %vm255_vm3, %v7178_v41  ;;  %v1846_v35 = vmul.f32 %v1842_v23, %v1837_v4 }
 0x8d1   :  { %5253 = vmatprep.mubr.msk.f32.mxu1 %vm6239_vm1, %v6238_v6 }
 0x8d2   :  { %v6086_v15 = vpop.eup %6085  ;;  %v7185_v34 = vadd.f32 %v1851_v31, %v1846_v35 }
 0x8d3   :  { %v1838_v42 = vmul.f32 %v6086_v15, %v7115_v2  ;;  %v1985_v2 = vld [vmem:[%s8189_s11 + $0x38] sm:$0xff] }
 0x8d4   :  { %5254 = vmatmul.mubr.msk.f32.gmra.mrb[56].mxu1 %vm255_vm3, %v7185_v34  ;;  %v5710_v8 = vpack.c.bf16 %v1985_v2, %v1984_v18 }
 0x8d5   :  { %5256 = vmatprep.mubr.msk.f32.mxu1 %vm6239_vm1, %v6238_v6  ;;  %v1847_v40 = vmul.f32 %v1842_v23, %v1838_v42 }
 0x8d6   :  { %5711 = vmatpush3.bf16.msra.mxu0 %v5710_v8 }
 0x8d7   :  { %v7192_v52 = vadd.f32 %v1851_v31, %v1847_v40  ;;  %5718 = vmatprep.subr.bf16.mxu0 %v6240_v11 }
 0x8d9   :  { %5257 = vmatmul.mubr.msk.f32.gmra.mrb[58].mxu1 %vm255_vm3, %v7192_v52 }
 0x8da   :  { %5298 = vmatprep.mubr.msk.f32.mxu1 %vm6239_vm1, %v6238_v6 }
 0x99b   :  { %v1949_v57 = vpop.f32.mrb[50].mxu1 }
 0x99c   :  { %v1950_v50 = vadd.f32 %v4590_v60, %v1949_v57  ;;  %v5246_v32 = vpop.f32.mrb[51].mxu1 }
 0x99e   :  { %v1973_v63 = vmax.f32 %v1950_v50, 0.0 }
 0x99f   :  { %v1954_v62 = vpop.f32.mrb[52].mxu1 }
 0x9a0   :  { %v1955_v0 = vadd.f32 %v4590_v60, %v1954_v62  ;;  %v5249_v5 = vpop.f32.mrb[53].mxu1  ;;  %5276 = vmatmul.mubr.msk.f32.vlgmr.msra.gmra.mrb[60].mxu0 %vm1990_vm9, %v1973_v63 }
 0x9a1   :  { %5278 = vmatprep.mubr.msk.f32.mxu0 %vm6239_vm1, %v6238_v6 }
 0x9a2   :  { %v1974_v3 = vmax.f32 %v1955_v0, 0.0 }
 0x9a3   :  { %v1959_v12 = vpop.f32.mrb[54].mxu1 }
 0x9a4   :  { %v1960_v26 = vadd.f32 %v4590_v60, %v1959_v12  ;;  %v5252_v61 = vpop.f32.mrb[55].mxu1  ;;  %5279 = vmatmul.mubr.msk.f32.gmra.mrb[62].mxu0 %vm1990_vm9, %v1974_v3 }
 0x9a5   :  { %5281 = vmatprep.mubr.msk.f32.mxu0 %vm6239_vm1, %v6238_v6 }
 0x9a6   :  { %v1975_v27 = vmax.f32 %v1960_v26, 0.0 }
 0x9a7   :  { %v1964_v22 = vpop.f32.mrb[56].mxu1 }
 0x9a8   :  { %v1965_v46 = vadd.f32 %v4590_v60, %v1964_v22  ;;  %v5255_v14 = vpop.f32.mrb[57].mxu1  ;;  %5282 = vmatmul.mubr.msk.f32.gmra.mrb[64].mxu0 %vm1990_vm9, %v1975_v27 }
 0x9a9   :  { %5284 = vmatprep.mubr.msk.f32.mxu0 %vm6239_vm1, %v6238_v6 }
 0x9aa   :  { %v1976_v37 = vmax.f32 %v1965_v46, 0.0 }
 0x9ac   :  { %v1969_v10 = vpop.f32.mrb[58].mxu1  ;;  %5285 = vmatmul.mubr.msk.f32.gmra.mrb[66].mxu0 %vm1990_vm9, %v1976_v37 }
 0x9ad   :  { %v1970_v24 = vadd.f32 %v4590_v60, %v1969_v10  ;;  %v5258_v19 = vpop.f32.mrb[59].mxu1  ;;  %5287 = vmatprep.mubr.msk.f32.mxu0 %vm6239_vm1, %v6238_v6  ;;  %v4602_v10 = vld [vmem:[%s8184_s6 + $0x20] sm:$0xff] }
 0x9af   :  { %v1977_v33 = vmax.f32 %v1970_v24, 0.0  ;;  %v4603_v24 = vld [vmem:[%s8184_s6 + $0x28] sm:$0xff] }
 0x9b0   :  { %v5713_v19 = vpack.c.bf16 %v4603_v24, %v4602_v10 }
 0x9b1   :  { %5288 = vmatmul.mubr.msk.f32.gmra.mrb[68].mxu0 %vm1990_vm9, %v1977_v33  ;;  %v4604_v33 = vld [vmem:[%s8184_s6 + $0x30] sm:$0xff] }
 0x9b2   :  { %5323 = vmatprep.mubr.msk.f32.mxu0 %vm6239_vm1, %v6238_v6  ;;  %5714 = vmatpush3.bf16.msra.mxu1 %v5713_v19 }
 0x9b3   :  { %5715 = vmatprep.subr.bf16.mxu1 %v6240_v11 }
 0xa73   :  { %v2072_v7 = vpop.f32.mrb[60].mxu0 }
 0xa74   :  { %v2073_v17 = vadd.f32 %v2072_v7, %v1989_v29  ;;  %v5277_v43 = vpop.f32.mrb[61].mxu0 }
 0xa76   :  { %v2096_v44 = vadd.f32 %v2073_v17, %v7164_v56 }
 0xa77   :  { %v2077_v23 = vpop.f32.mrb[62].mxu0 }
 0xa78   :  { %v2078_v47 = vadd.f32 %v2077_v23, %v1989_v29  ;;  %v5280_v16 = vpop.f32.mrb[63].mxu0  ;;  %v2101_v54 = vsel %vm255_vm3, %v2096_v44, 0.0 }
 0xa79   :  { %2102 = vadd.xlane.f32.xlu1 %v2101_v54 }
 0xa7a   :  { %v2097_v31 = vadd.f32 %v2078_v47, %v7171_v59 }
 0xa7b   :  { %v2082_v51 = vpop.f32.mrb[64].mxu0 }
 0xa7c   :  { %v2083_v36 = vadd.f32 %v2082_v51, %v1989_v29  ;;  %v5283_v1 = vpop.f32.mrb[65].mxu0  ;;  %v2104_v21 = vsel %vm255_vm3, %v2097_v31, 0.0  ;;  %v2168_v51 = vsub.s32 4, %v7073_v49 }
 0xa7d   :  { %2105 = vadd.xlane.f32.xlu0 %v2104_v21  ;;  %v2177_v21 = vsub.s32 5, %v7073_v49 }
 0xa7e   :  { %v2098_v55 = vadd.f32 %v2083_v36, %v7178_v41 }
 0xa7f   :  { %v2087_v45 = vpop.f32.mrb[66].mxu0 }
 0xa80   :  { %v2088_v39 = vadd.f32 %v2087_v45, %v1989_v29  ;;  %v5286_v58 = vpop.f32.mrb[67].mxu0  ;;  %v2107_v56 = vsel %vm255_vm3, %v2098_v55, 0.0  ;;  %v2169_v45 = vrot.slane %v7081_v13, %v2168_v51 }
 0xa81   :  { %2108 = vadd.xlane.f32.xlu1 %v2107_v56 }
 0xa82   :  { %v2099_v28 = vadd.f32 %v2088_v39, %v7185_v34 }
 0xa84   :  { %v2092_v53 = vpop.f32.mrb[68].mxu0  ;;  %v2110_v38 = vsel %vm255_vm3, %v2099_v28, 0.0 }
 0xa85   :  { %v2093_v59 = vadd.f32 %v2092_v53, %v1989_v29  ;;  %2111 = vadd.xlane.f32.xlu0 %v2110_v38  ;;  %v5289_v4 = vpop.f32.mrb[69].mxu0  ;;  %v4605_v29 = vld [vmem:[%s8184_s6 + $0x38] sm:$0xff]  ;;  %s8222_s6 = smov 8  }
 0xa86   :  { %v5716_v7 = vpack.c.bf16 %v4605_v29, %v4604_v33 }
 0xa87   :  { %v2100_v35 = vadd.f32 %v2093_v59, %v7192_v52 }
 0xa88   :  { %5717 = vmatpush3.bf16.msra.mxu1 %v5716_v7 }
 0xa89   :  { %v2113_v15 = vsel %vm255_vm3, %v2100_v35, 0.0  ;;  %5726 = vmatprep.subr.bf16.mxu1 %v6240_v11 }
 0xa8a   :  { %2114 = vadd.xlane.f32.xlu1 %v2113_v15 }
 0xb06   :  { %v2103_v41 = vpop.xlane.xlu1 %2102 }
 0xb07   :  { %v2116_v42 = vmul.f32 0.03125, %v2103_v41 }
 0xb09   :  { %v2121_v40 = vsub.f32 %v2096_v44, %v2116_v42 }
 0xb0a   :  { %v2106_v18 = vpop.xlane.xlu0 %2105 }
 0xb0b   :  { %v2117_v2 = vmul.f32 0.03125, %v2106_v18  ;;  %v2126_v8 = vmul.f32 %v2121_v40, %v2121_v40 }
 0xb0d   :  { %v2122_v60 = vsub.f32 %v2097_v31, %v2117_v2  ;;  %v2131_v34 = vsel %vm255_vm3, %v2126_v8, 0.0 }
 0xb0e   :  { %v2109_v57 = vpop.xlane.xlu1 %2108  ;;  %2132 = vadd.xlane.f32.xlu0 %v2131_v34 }
 0xb0f   :  { %v2118_v50 = vmul.f32 0.03125, %v2109_v57  ;;  %v2127_v32 = vmul.f32 %v2122_v60, %v2122_v60 }
 0xb11   :  { %v7239_v63 = vsub.f32 %v2098_v55, %v2118_v50  ;;  %v2134_v52 = vsel %vm255_vm3, %v2127_v32, 0.0 }
 0xb12   :  { %v2112_v62 = vpop.xlane.xlu0 %2111  ;;  %2135 = vadd.xlane.f32.xlu1 %v2134_v52 }
 0xb13   :  { %v2119_v0 = vmul.f32 0.03125, %v2112_v62  ;;  %v2128_v5 = vmul.f32 %v7239_v63, %v7239_v63 }
 0xb15   :  { %v7244_v3 = vsub.f32 %v2099_v28, %v2119_v0  ;;  %v2137_v12 = vsel %vm255_vm3, %v2128_v5, 0.0  ;;  %v2178_v28 = vrot.slane %v7081_v13, %v2177_v21 }
 0xb16   :  { %2138 = vadd.xlane.f32.xlu0 %v2137_v12 }
 0xb17   :  { %v2115_v26 = vpop.xlane.xlu1 %2114  ;;  %v2129_v61 = vmul.f32 %v7244_v3, %v7244_v3 }
 0xb18   :  { %v2120_v27 = vmul.f32 0.03125, %v2115_v26 }
 0xb19   :  { %v2140_v22 = vsel %vm255_vm3, %v2129_v61, 0.0 }
 0xb1a   :  { %v2125_v46 = vsub.f32 %v2100_v35, %v2120_v27  ;;  %2141 = vadd.xlane.f32.xlu1 %v2140_v22 }
 0xb1c   :  { %v2130_v14 = vmul.f32 %v2125_v46, %v2125_v46 }
 0xb1e   :  { %v2143_v37 = vsel %vm255_vm3, %v2130_v14, 0.0 }
 0xb1f   :  { %2144 = vadd.xlane.f32.xlu0 %v2143_v37 }
 0xb9b   :  { %v2133_v17 = vpop.xlane.xlu0 %2132 }
 0xb9c   :  { %v2146_v43 = vmul.f32 0.03125, %v2133_v17 }
 0xb9e   :  { %v2151_v44 = vadd.f32 1e-05, %v2146_v43 }
 0xb9f   :  { %v2136_v23 = vpop.xlane.xlu1 %2135 }
 0xba0   :  { %6087 = vrsqrt.f32 %v2151_v44  ;;  %v2147_v47 = vmul.f32 0.03125, %v2136_v23 }
 0xba2   :  { %v2152_v16 = vadd.f32 1e-05, %v2147_v47 }
 0xba3   :  { %v2139_v54 = vpop.xlane.xlu0 %2138 }
 0xba4   :  { %6089 = vrsqrt.f32 %v2152_v16  ;;  %v2148_v31 = vmul.f32 0.03125, %v2139_v54 }
 0xba6   :  { %v2153_v36 = vadd.f32 1e-05, %v2148_v31 }
 0xba7   :  { %v2142_v1 = vpop.xlane.xlu1 %2141 }
 0xba8   :  { %6091 = vrsqrt.f32 %v2153_v36  ;;  %v2149_v55 = vmul.f32 0.03125, %v2142_v1 }
 0xbaa   :  { %v6088_v39 = vpop.eup %6087  ;;  %v2154_v58 = vadd.f32 1e-05, %v2149_v55 }
 0xbab   :  { %v2161_v56 = vmul.f32 %v6088_v39, %v2121_v40 }
 0xbac   :  { %6093 = vrsqrt.f32 %v2154_v58  ;;  %v2145_v53 = vpop.xlane.xlu0 %2144 }
 0xbad   :  { %v2170_v38 = vmul.f32 %v2169_v45, %v2161_v56  ;;  %v2150_v59 = vmul.f32 0.03125, %v2145_v53 }
 0xbae   :  { %v6090_v4 = vpop.eup %6089 }
 0xbaf   :  { %v2155_v35 = vadd.f32 1e-05, %v2150_v59  ;;  %v7273_v15 = vadd.f32 %v2178_v28, %v2170_v38  ;;  %v2162_v41 = vmul.f32 %v6090_v4, %v2122_v60 }
 0xbb1   :  { %6095 = vrsqrt.f32 %v2155_v35  ;;  %5299 = vmatmul.mubr.msk.f32.vlgmr.msra.gmra.mrb[60].mxu1 %vm255_vm3, %v7273_v15  ;;  %v2171_v42 = vmul.f32 %v2169_v45, %v2162_v41 }
 0xbb2   :  { %v6092_v18 = vpop.eup %6091  ;;  %5301 = vmatprep.mubr.msk.f32.mxu1 %vm6239_vm1, %v6238_v6 }
 0xbb3   :  { %v7279_v40 = vadd.f32 %v2178_v28, %v2171_v42  ;;  %v2163_v13 = vmul.f32 %v6092_v18, %v7239_v63 }
 0xbb5   :  { %5302 = vmatmul.mubr.msk.f32.gmra.mrb[62].mxu1 %vm255_vm3, %v7279_v40  ;;  %v2172_v2 = vmul.f32 %v2169_v45, %v2163_v13 }
 0xbb6   :  { %v6094_v8 = vpop.eup %6093  ;;  %5304 = vmatprep.mubr.msk.f32.mxu1 %vm6239_vm1, %v6238_v6 }
 0xbb7   :  { %v7286_v60 = vadd.f32 %v2178_v28, %v2172_v2  ;;  %v2164_v34 = vmul.f32 %v6094_v8, %v7244_v3  ;;  %v4607_v3 = vld [vmem:[%s8185_s7 + $0x1] ss:$0 sm:$0xff]  ;;  %s8218_s7 = smov 64  }
 0xbb9   :  { %5305 = vmatmul.mubr.msk.f32.gmra.mrb[64].mxu1 %vm255_vm3, %v7286_v60  ;;  %v2173_v57 = vmul.f32 %v2169_v45, %v2164_v34 }
 0xbba   :  { %5307 = vmatprep.mubr.msk.f32.mxu1 %vm6239_vm1, %v6238_v6 }
 0xbbb   :  { %v6096_v50 = vpop.eup %6095  ;;  %v7293_v32 = vadd.f32 %v2178_v28, %v2173_v57 }
 0xbbc   :  { %v2165_v63 = vmul.f32 %v6096_v50, %v2125_v46 }
 0xbbd   :  { %5308 = vmatmul.mubr.msk.f32.gmra.mrb[66].mxu1 %vm255_vm3, %v7293_v32 }
 0xbbe   :  { %5310 = vmatprep.mubr.msk.f32.mxu1 %vm6239_vm1, %v6238_v6  ;;  %v2174_v52 = vmul.f32 %v2169_v45, %v2165_v63 }
 0xbc0   :  { %v7299_v62 = vadd.f32 %v2178_v28, %v2174_v52 }
 0xbc2   :  { %5311 = vmatmul.mubr.msk.f32.gmra.mrb[68].mxu1 %vm255_vm3, %v7299_v62 }
 0xbc3   :  { %5348 = vmatprep.mubr.msk.f32.mxu1 %vm6239_vm1, %v6238_v6 }
 0xc84   :  { %v2280_v0 = vpop.f32.mrb[60].mxu1 }
 0xc85   :  { %v5300_v5 = vpop.f32.mrb[61].mxu1  ;;  %v7308_v26 = vadd.f32 %v4607_v3, %v2280_v0 }
 0xc88   :  { %v2285_v12 = vpop.f32.mrb[62].mxu1 }
 0xc89   :  { %v7310_v61 = vadd.f32 %v4607_v3, %v2285_v12  ;;  %v5303_v27 = vpop.f32.mrb[63].mxu1 }
 0xc8b   :  { %v7314_v22 = vpack.i.bf16 %v7310_v61, %v7308_v26 }
 0xc8c   :  { %v2290_v46 = vpop.f32.mrb[64].mxu1 }
 0xc8d   :  { %5917 = vrot.lane.b32.xlu1 %v7314_v22, %s6241_s1  ;;  %v5306_v14 = vpop.f32.mrb[65].mxu1  ;;  %v7318_v10 = vadd.f32 %v4607_v3, %v2290_v46 }
 0xc90   :  { %v2295_v37 = vpop.f32.mrb[66].mxu1 }
 0xc91   :  { %v7320_v24 = vadd.f32 %v4607_v3, %v2295_v37  ;;  %v5309_v19 = vpop.f32.mrb[67].mxu1 }
 0xc93   :  { %v7324_v33 = vpack.i.bf16 %v7320_v24, %v7318_v10 }
 0xc95   :  { %5922 = vrot.lane.b32.xlu0 %v7324_v33, %s6241_s1  ;;  %v2300_v29 = vpop.f32.mrb[68].mxu1 }
 0xc96   :  { %v7328_v7 = vadd.f32 %v4607_v3, %v2300_v29  ;;  %v5312_v17 = vpop.f32.mrb[69].mxu1 }
 0xc98   :  { %2317 = vrot.lane.b32.xlu1 %v7328_v7, %s6241_s1 }
 0xc99   :  { %2622 = vrot.lane.b32.xlu0 %v7328_v7, %s6242_s20 }
 0xc9c   :  { %5927 = vrot.lane.b32.xlu1 %v7314_v22, %s6242_s20 }
 0xc9d   :  { %2604 = vrot.lane.b32.xlu0 %v7308_v26, %s6244_s22 }
 0xca0   :  { %5932 = vrot.lane.b32.xlu1 %v7324_v33, %s6242_s20  ;;  %s8219_s20 = smov 56  }
 0xca1   :  { %5942 = vrot.lane.b32.xlu0 %v7324_v33, %s6243_s21 }
 0xca4   :  { %5937 = vrot.lane.b32.xlu1 %v7314_v22, %s6243_s21 }
 0xca5   :  { %2610 = vrot.lane.b32.xlu0 %v7320_v24, %s6244_s22 }
 0xca8   :  { %2606 = vrot.lane.b32.xlu1 %v7310_v61, %s6244_s22 }
 0xca9   :  { %2927 = vrot.lane.b32.xlu0 %v7328_v7, %s6243_s21 }
 0xcac   :  { %2608 = vrot.lane.b32.xlu1 %v7318_v10, %s6244_s22 }
 0xcad   :  { %2909 = vrot.lane.b32.xlu0 %v7308_v26, %s6246_s24 }
 0xcb0   :  { %2612 = vrot.lane.b32.xlu1 %v7328_v7, %s6244_s22 }
 0xcb1   :  { %5952 = vrot.lane.b32.xlu0 %v7324_v33, %s6245_s23 }
 0xcb4   :  { %5947 = vrot.lane.b32.xlu1 %v7314_v22, %s6245_s23 }
 0xcb5   :  { %2915 = vrot.lane.b32.xlu0 %v7320_v24, %s6246_s24 }
 0xcb8   :  { %2911 = vrot.lane.b32.xlu1 %v7310_v61, %s6246_s24 }
 0xcb9   :  { %3232 = vrot.lane.b32.xlu0 %v7328_v7, %s6245_s23 }
 0xcbc   :  { %2913 = vrot.lane.b32.xlu1 %v7318_v10, %s6246_s24 }
 0xcbd   :  { %3216 = vrot.lane.b32.xlu0 %v7310_v61, %s6247_s25 }
 0xcc0   :  { %2917 = vrot.lane.b32.xlu1 %v7328_v7, %s6246_s24 }
 0xcc1   :  { %3220 = vrot.lane.b32.xlu0 %v7320_v24, %s6247_s25 }
 0xcc4   :  { %3214 = vrot.lane.b32.xlu1 %v7308_v26, %s6247_s25 }
 0xcc5   :  { %5962 = vrot.lane.b32.xlu0 %v7324_v33, %s8218_s7 }
 0xcc8   :  { %3218 = vrot.lane.b32.xlu1 %v7318_v10, %s6247_s25 }
 0xcc9   :  { %5967 = vrot.lane.b32.xlu0 %v7314_v22, %s8219_s20 }
 0xccc   :  { %3222 = vrot.lane.b32.xlu1 %v7328_v7, %s6247_s25 }
 0xcd0   :  { %5957 = vrot.lane.b32.xlu1 %v7314_v22, %s8218_s7 }
 0xcd4   :  { %5972 = vrot.lane.b32.xlu1 %v7324_v33, %s8219_s20 }
 0xcd8   :  { %2492 = vrot.lane.b32.xlu1 %v7328_v7, %s8218_s7 }
 0xcff   :  { %v5918_v43 = vpop.permute.xlu1 %5917 }
 0xd00   :  { %v5920_v44 = vunpack.i.h.bf16 %v5918_v43  ;;  %v5919_v23 = vunpack.i.l.bf16 %v5918_v43 }
 0xd02   :  { %v5719_v47 = vpack.c.bf16 %v5920_v44, %v5919_v23 }
 0xd04   :  { %5721 = vmatpush3.bf16.xpose.msk.msra.mxu0 %vm6552_vm5, %v5719_v47 }
 0xd05   :  { %5722 = vmatprep.subr.bf16.mxu0 %v6240_v11 }
 0xd07   :  { %v5923_v16 = vpop.permute.xlu0 %5922 }
 0xd08   :  { %v5925_v54 = vunpack.i.h.bf16 %v5923_v16  ;;  %v5924_v31 = vunpack.i.l.bf16 %v5923_v16 }
 0xd0a   :  { %v5723_v36 = vpack.c.bf16 %v5925_v54, %v5924_v31  ;;  %v2318_v1 = vpop.permute.xlu1 %2317 }
 0xd0b   :  { %v2623_v55 = vpop.permute.xlu0 %2622 }
 0xd0c   :  { %5725 = vmatpush3.bf16.xpose.msk.msra.mxu0 %vm6552_vm5, %v5723_v36 }
 0xd0d   :  { %5321 = vmatprep.subr.mxu0 %v6238_v6 }
 0xd0e   :  { %v5928_v45 = vpop.permute.xlu1 %5927 }
 0xd0f   :  { %v2605_v39 = vpop.permute.xlu0 %2604  ;;  %v5930_v58 = vunpack.i.h.bf16 %v5928_v45  ;;  %v5929_v56 = vunpack.i.l.bf16 %v5928_v45 }
 0xd11   :  { %v5733_v38 = vpack.c.bf16 %v5930_v58, %v5929_v56 }
 0xd12   :  { %v5933_v28 = vpop.permute.xlu1 %5932 }
 0xd13   :  { %v5943_v53 = vpop.permute.xlu0 %5942  ;;  %v5935_v35 = vunpack.i.h.bf16 %v5933_v28  ;;  %v5934_v41 = vunpack.i.l.bf16 %v5933_v28 }
 0xd14   :  { %5322 = vmatpush3.xpose.msk.msra.mxu0 %vm376_vm4, %v2318_v1  ;;  %v5945_v12 = vunpack.i.h.bf16 %v5943_v53 }
 0xd15   :  { %5732 = vmatprep.subr.bf16.mxu0 %v6240_v11  ;;  %v5737_v13 = vpack.c.bf16 %v5935_v35, %v5934_v41  ;;  %v7505_v41 = vld [vmem:[%s8183_s5 + $0x8] sm:$0xff] }
 0xd16   :  { %v5938_v59 = vpop.permute.xlu1 %5937 }
 0xd17   :  { %v2611_v4 = vpop.permute.xlu0 %2610  ;;  %5324 = vmatmul.mubr.msk.f32.vlgmr.msra.gmra.mrb[70].mxu0 %vm376_vm4, %v7308_v26  ;;  %v5940_v50 = vunpack.i.h.bf16 %v5938_v59  ;;  %v5939_v63 = vunpack.i.l.bf16 %v5938_v59  ;;  %v5944_v26 = vunpack.i.l.bf16 %v5943_v53  ;;  %v7495_v53 = vld [vmem:[%s8183_s5] sm:$0xff] }
 0xd18   :  { %5735 = vmatpush3.bf16.xpose.msk.msra.mxu0 %vm6552_vm5, %v5733_v38  ;;  %5326 = vmatprep.mubr.msk.f32.mxu0 %vm6239_vm1, %v6238_v6 }
 0xd19   :  { %5736 = vmatprep.subr.bf16.mxu0 %v6240_v11  ;;  %v5747_v0 = vpack.c.bf16 %v5940_v50, %v5939_v63  ;;  %v5751_v46 = vpack.c.bf16 %v5945_v12, %v5944_v26  ;;  %v7535_v26 = vld [vmem:[%s8183_s5 + $0x20] sm:$0xff] }
 0xd1a   :  { %v2607_v42 = vpop.permute.xlu1 %2606 }
 0xd1b   :  { %v2928_v18 = vpop.permute.xlu0 %2927  ;;  %5327 = vmatmul.mubr.msk.f32.gmra.mrb[72].mxu0 %vm376_vm4, %v7310_v61 }
 0xd1c   :  { %5329 = vmatprep.mubr.msk.f32.mxu0 %vm6239_vm1, %v6238_v6 }
 0xd1e   :  { %v2609_v2 = vpop.permute.xlu1 %2608 }
 0xd1f   :  { %v2910_v8 = vpop.permute.xlu0 %2909  ;;  %5330 = vmatmul.mubr.msk.f32.gmra.mrb[74].mxu0 %vm376_vm4, %v7318_v10 }
 0xd20   :  { %5739 = vmatpush3.bf16.xpose.msk.msra.mxu0 %vm6552_vm5, %v5737_v13  ;;  %5332 = vmatprep.mubr.msk.f32.mxu0 %vm6239_vm1, %v6238_v6 }
 0xd21   :  { %5371 = vmatprep.subr.mxu0 %v6238_v6 }
 0xd22   :  { %v2613_v34 = vpop.permute.xlu1 %2612 }
 0xd23   :  { %5333 = vmatmul.mubr.msk.f32.gmra.mrb[76].mxu0 %vm376_vm4, %v7320_v24  ;;  %v5953_v57 = vpop.permute.xlu0 %5952 }
 0xd24   :  { %5335 = vmatprep.mubr.msk.f32.mxu0 %vm6239_vm1, %v6238_v6  ;;  %v5955_v23 = vunpack.i.h.bf16 %v5953_v57  ;;  %v5954_v47 = vunpack.i.l.bf16 %v5953_v57 }
 0xd26   :  { %v5948_v52 = vpop.permute.xlu1 %5947 }
 0xd27   :  { %5336 = vmatmul.mubr.msk.f32.gmra.mrb[78].mxu0 %vm376_vm4, %v7328_v7  ;;  %v2916_v5 = vpop.permute.xlu0 %2915  ;;  %v5950_v24 = vunpack.i.h.bf16 %v5948_v52  ;;  %v5949_v19 = vunpack.i.l.bf16 %v5948_v52  ;;  %v7525_v52 = vld [vmem:[%s8183_s5 + $0x18] sm:$0xff] }
 0xd28   :  { %5372 = vmatpush3.xpose.msk.msra.mxu0 %vm376_vm4, %v2623_v55  ;;  %5373 = vmatprep.mubr.msk.f32.mxu0 %vm6239_vm1, %v6238_v6 }
 0xd29   :  { %5746 = vmatprep.subr.bf16.mxu0 %v6240_v11  ;;  %v5761_v43 = vpack.c.bf16 %v5950_v24, %v5949_v19 }
 0xd2a   :  { %v2912_v3 = vpop.permute.xlu1 %2911 }
 0xd2b   :  { %5374 = vmatmul.mubr.msk.f32.vlgmr.msra.gmra.mrb[80].mxu0 %vm376_vm4, %v2605_v39  ;;  %v3233_v27 = vpop.permute.xlu0 %3232  ;;  %v5765_v39 = vpack.c.bf16 %v5955_v23, %v5954_v47 }
 0xd2c   :  { %5749 = vmatpush3.bf16.xpose.msk.msra.mxu0 %vm6552_vm5, %v5747_v0  ;;  %5376 = vmatprep.mubr.msk.f32.mxu0 %vm6239_vm1, %v6238_v6 }
 0xd2d   :  { %5750 = vmatprep.subr.bf16.mxu0 %v6240_v11 }
 0xd2e   :  { %v2914_v61 = vpop.permute.xlu1 %2913 }
 0xd2f   :  { %5377 = vmatmul.mubr.msk.f32.gmra.mrb[82].mxu0 %vm376_vm4, %v2607_v42  ;;  %v3217_v37 = vpop.permute.xlu0 %3216 }
 0xd30   :  { %5379 = vmatprep.mubr.msk.f32.mxu0 %vm6239_vm1, %v6238_v6 }
 0xd32   :  { %v2918_v14 = vpop.permute.xlu1 %2917 }
 0xd33   :  { %5380 = vmatmul.mubr.msk.f32.gmra.mrb[84].mxu0 %vm376_vm4, %v2609_v2  ;;  %v3221_v17 = vpop.permute.xlu0 %3220 }
 0xd34   :  { %5753 = vmatpush3.bf16.xpose.msk.msra.mxu0 %vm6552_vm5, %v5751_v46  ;;  %5382 = vmatprep.mubr.msk.f32.mxu0 %vm6239_vm1, %v6238_v6 }
 0xd35   :  { %5421 = vmatprep.subr.mxu0 %v6238_v6 }
 0xd36   :  { %v3215_v10 = vpop.permute.xlu1 %3214 }
 0xd37   :  { %5383 = vmatmul.mubr.msk.f32.gmra.mrb[86].mxu0 %vm376_vm4, %v2611_v4  ;;  %v5963_v16 = vpop.permute.xlu0 %5962 }
 0xd38   :  { %5385 = vmatprep.mubr.msk.f32.mxu0 %vm6239_vm1, %v6238_v6  ;;  %v5965_v1 = vunpack.i.h.bf16 %v5963_v16  ;;  %v5964_v55 = vunpack.i.l.bf16 %v5963_v16 }
 0xd3a   :  { %v3219_v29 = vpop.permute.xlu1 %3218  ;;  %v5730_v56 = vpack.c.bf16 %v5965_v1, %v5964_v55 }
 0xd3b   :  { %5386 = vmatmul.mubr.msk.f32.gmra.mrb[88].mxu0 %vm376_vm4, %v2613_v34 }
 0xd3c   :  { %5422 = vmatpush3.xpose.msk.msra.mxu0 %vm376_vm4, %v2928_v18  ;;  %5423 = vmatprep.mubr.msk.f32.mxu0 %vm6239_vm1, %v6238_v6 }
 0xd3d   :  { %5760 = vmatprep.subr.bf16.mxu0 %v6240_v11 }
 0xd3e   :  { %v3223_v44 = vpop.permute.xlu1 %3222 }
 0xd3f   :  { %5424 = vmatmul.mubr.msk.f32.vlgmr.msra.gmra.mrb[90].mxu0 %vm376_vm4, %v2910_v8  ;;  %v7515_v8 = vld [vmem:[%s8183_s5 + $0x10] sm:$0xff]  ;;  %s8220_s5 = smov 48  }
 0xd40   :  { %5763 = vmatpush3.bf16.xpose.msk.msra.mxu0 %vm6552_vm5, %v5761_v43  ;;  %5426 = vmatprep.mubr.msk.f32.mxu0 %vm6239_vm1, %v6238_v6 }
 0xd41   :  { %5764 = vmatprep.subr.bf16.mxu0 %v6240_v11 }
 0xd42   :  { %v5958_v54 = vpop.permute.xlu1 %5957 }
 0xd43   :  { %v5960_v31 = vunpack.i.h.bf16 %v5958_v54  ;;  %v5959_v36 = vunpack.i.l.bf16 %v5958_v54  ;;  %5427 = vmatmul.mubr.msk.f32.gmra.mrb[92].mxu0 %vm376_vm4, %v2912_v3 }
 0xd44   :  { %5429 = vmatprep.mubr.msk.f32.mxu0 %vm6239_vm1, %v6238_v6 }
 0xd45   :  { %v5727_v45 = vpack.c.bf16 %v5960_v31, %v5959_v36 }
 0xd46   :  { %v7459_v58 = vpop.permute.xlu1 %5972 }
 0xd47   :  { %5728 = vmatpush3.bf16.msra.mxu1 %v5727_v45  ;;  %5430 = vmatmul.mubr.msk.f32.gmra.mrb[94].mxu0 %vm376_vm4, %v2914_v61 }
 0xd48   :  { %5767 = vmatpush3.bf16.xpose.msk.msra.mxu0 %vm6552_vm5, %v5765_v39  ;;  %5729 = vmatprep.subr.bf16.mxu1 %v6240_v11 }
 0xd49   :  { %5432 = vmatprep.mubr.msk.f32.mxu0 %vm6239_vm1, %v6238_v6  ;;  %5471 = vmatprep.subr.mxu0 %v6238_v6 }
 0xd4a   :  { %v2493_v28 = vpop.permute.xlu1 %2492 }
 0xd4b   :  { %5731 = vmatpush3.bf16.msra.mxu1 %v5730_v56  ;;  %5433 = vmatmul.mubr.msk.f32.gmra.mrb[96].mxu0 %vm376_vm4, %v2916_v5 }
 0xd4c   :  { %5346 = vmatprep.subr.mxu1 %v6238_v6  ;;  %5435 = vmatprep.mubr.msk.f32.mxu0 %vm6239_vm1, %v6238_v6 }
 0xd4f   :  { %5347 = vmatpush3.msra.mxu1 %v2493_v28  ;;  %5436 = vmatmul.mubr.msk.f32.gmra.mrb[98].mxu0 %vm376_vm4, %v2918_v14 }
 0xd50   :  { %5472 = vmatpush3.xpose.msk.msra.mxu0 %vm376_vm4, %v3233_v27  ;;  %5473 = vmatprep.mubr.msk.f32.mxu0 %vm6239_vm1, %v6238_v6 }
 0xd51   :  { %5740 = vmatprep.subr.bf16.mxu1 %v6240_v11  ;;  %5774 = vmatprep.subr.bf16.mxu0 %v6240_v11 }
 0xd53   :  { %5474 = vmatmul.mubr.msk.f32.vlgmr.msra.gmra.mrb[100].mxu0 %vm376_vm4, %v3215_v10 }
 0xd54   :  { %5476 = vmatprep.mubr.msk.f32.mxu0 %vm6239_vm1, %v6238_v6 }
 0xd57   :  { %5477 = vmatmul.mubr.msk.f32.gmra.mrb[102].mxu0 %vm376_vm4, %v3217_v37 }
 0xd58   :  { %5479 = vmatprep.mubr.msk.f32.mxu0 %vm6239_vm1, %v6238_v6 }
 0xd5b   :  { %5480 = vmatmul.mubr.msk.f32.gmra.mrb[104].mxu0 %vm376_vm4, %v3219_v29 }
 0xd5c   :  { %5482 = vmatprep.mubr.msk.f32.mxu0 %vm6239_vm1, %v6238_v6 }
 0xd5f   :  { %5483 = vmatmul.mubr.msk.f32.gmra.mrb[106].mxu0 %vm376_vm4, %v3221_v17 }
 0xd60   :  { %5485 = vmatprep.mubr.msk.f32.mxu0 %vm6239_vm1, %v6238_v6 }
 0xd63   :  { %5486 = vmatmul.mubr.msk.f32.gmra.mrb[108].mxu0 %vm376_vm4, %v3223_v44 }
 0xd64   :  { %5521 = vmatprep.mubr.msk.f32.mxu0 %vm6239_vm1, %v6238_v6 }
 0xdea   :  { %v2405_v20 = vpop.f32.mrb[70].mxu0 }
 0xdeb   :  { %v7498_v38 = vadd.f32 %v7495_v53, %v2405_v20  ;;  %v5325_v59 = vpop.f32.mrb[71].mxu0 }
 0xded   :  { %v2429_v4 = vsel %vm487_vm6, %v7498_v38, -inf }
 0xdee   :  { %2430 = vmax.xlane.f32.xlu0 %v2429_v4  ;;  %v2410_v35 = vpop.f32.mrb[72].mxu0 }
 0xdef   :  { %v7508_v42 = vadd.f32 %v7505_v41, %v2410_v35  ;;  %v5328_v18 = vpop.f32.mrb[73].mxu0 }
 0xdf1   :  { %v2432_v13 = vsel %vm487_vm6, %v7508_v42, -inf }
 0xdf2   :  { %2433 = vmax.xlane.f32.xlu1 %v2432_v13  ;;  %v2415_v2 = vpop.f32.mrb[74].mxu0 }
 0xdf3   :  { %v7518_v34 = vadd.f32 %v7515_v8, %v2415_v2  ;;  %v5331_v57 = vpop.f32.mrb[75].mxu0 }
 0xdf5   :  { %v2435_v50 = vsel %vm487_vm6, %v7518_v34, -inf }
 0xdf6   :  { %2436 = vmax.xlane.f32.xlu0 %v2435_v50  ;;  %v2420_v63 = vpop.f32.mrb[76].mxu0 }
 0xdf7   :  { %v7528_v0 = vadd.f32 %v7525_v52, %v2420_v63  ;;  %v5334_v5 = vpop.f32.mrb[77].mxu0 }
 0xdf9   :  { %v2438_v3 = vsel %vm487_vm6, %v7528_v0, -inf }
 0xdfa   :  { %2439 = vmax.xlane.f32.xlu0 %v2438_v3  ;;  %v2425_v12 = vpop.f32.mrb[78].mxu0 }
 0xdfb   :  { %v7538_v61 = vadd.f32 %v7535_v26, %v2425_v12  ;;  %v5337_v27 = vpop.f32.mrb[79].mxu0 }
 0xdfd   :  { %v2441_v46 = vsel %vm487_vm6, %v7538_v61, -inf }
 0xdfe   :  { %2442 = vmax.xlane.f32.xlu0 %v2441_v46  ;;  %v2710_v14 = vpop.f32.mrb[80].mxu0 }
 0xdff   :  { %v7543_v37 = vadd.f32 %v7495_v53, %v2710_v14  ;;  %v5375_v10 = vpop.f32.mrb[81].mxu0 }
 0xe01   :  { %v2734_v24 = vsel %vm487_vm6, %v7543_v37, -inf }
 0xe02   :  { %2735 = vmax.xlane.f32.xlu1 %v2734_v24  ;;  %v2715_v19 = vpop.f32.mrb[82].mxu0 }
 0xe03   :  { %v7548_v29 = vadd.f32 %v7505_v41, %v2715_v19  ;;  %v5378_v17 = vpop.f32.mrb[83].mxu0 }
 0xe05   :  { %v2737_v43 = vsel %vm487_vm6, %v7548_v29, -inf }
 0xe06   :  { %2738 = vmax.xlane.f32.xlu0 %v2737_v43  ;;  %v2720_v44 = vpop.f32.mrb[84].mxu0 }
 0xe07   :  { %v7553_v23 = vadd.f32 %v7515_v8, %v2720_v44  ;;  %v5381_v47 = vpop.f32.mrb[85].mxu0 }
 0xe09   :  { %v2740_v16 = vsel %vm487_vm6, %v7553_v23, -inf }
 0xe0a   :  { %2741 = vmax.xlane.f32.xlu1 %v2740_v16  ;;  %v2725_v54 = vpop.f32.mrb[86].mxu0 }
 0xe0b   :  { %v5384_v31 = vpop.f32.mrb[87].mxu0  ;;  %v7562_v27 = vadd.f32 %v7525_v52, %v2725_v54 }
 0xe0d   :  { %v2743_v19 = vsel %vm487_vm6, %v7562_v27, -inf }
 0xe0e   :  { %v2730_v36 = vpop.f32.mrb[88].mxu0 }
 0xe0f   :  { %v5387_v1 = vpop.f32.mrb[89].mxu0  ;;  %v7565_v10 = vadd.f32 %v7535_v26, %v2730_v36 }
 0xe11   :  { %v2746_v44 = vsel %vm487_vm6, %v7565_v10, -inf }
 0xe12   :  { %v3015_v55 = vpop.f32.mrb[90].mxu0 }
 0xe13   :  { %v5425_v45 = vpop.f32.mrb[91].mxu0  ;;  %v7568_v24 = vadd.f32 %v7495_v53, %v3015_v55 }
 0xe15   :  { %v3039_v47 = vsel %vm487_vm6, %v7568_v24, -inf }
 0xe16   :  { %v3020_v39 = vpop.f32.mrb[92].mxu0 }
 0xe17   :  { %v5428_v56 = vpop.f32.mrb[93].mxu0  ;;  %v7573_v17 = vadd.f32 %v7505_v41, %v3020_v39 }
 0xe19   :  { %v3042_v31 = vsel %vm487_vm6, %v7573_v17, -inf }
 0xe1a   :  { %v3025_v28 = vpop.f32.mrb[94].mxu0 }
 0xe1b   :  { %2797 = vrot.lane.b32.xlu1 %v7328_v7, %s8219_s20  ;;  %v5431_v20 = vpop.f32.mrb[95].mxu0  ;;  %v7576_v43 = vadd.f32 %v7515_v8, %v3025_v28 }
 0xe1c   :  { %5977 = vrot.lane.b32.xlu0 %v7314_v22, %s8220_s5 }
 0xe1d   :  { %v3045_v36 = vsel %vm487_vm6, %v7576_v43, -inf }
 0xe1e   :  { %v3030_v59 = vpop.f32.mrb[96].mxu0 }
 0xe1f   :  { %v5434_v4 = vpop.f32.mrb[97].mxu0  ;;  %v7583_v16 = vadd.f32 %v7525_v52, %v3030_v59 }
 0xe21   :  { %v3048_v55 = vsel %vm487_vm6, %v7583_v16, -inf }
 0xe22   :  { %v3035_v35 = vpop.f32.mrb[98].mxu0 }
 0xe23   :  { %v5437_v18 = vpop.f32.mrb[99].mxu0  ;;  %v7586_v54 = vadd.f32 %v7535_v26, %v3035_v35 }
 0xe25   :  { %v3051_v45 = vsel %vm487_vm6, %v7586_v54, -inf }
 0xe26   :  { %v3320_v13 = vpop.f32.mrb[100].mxu0 }
 0xe27   :  { %v5475_v2 = vpop.f32.mrb[101].mxu0  ;;  %v7593_v1 = vadd.f32 %v7495_v53, %v3320_v13 }
 0xe29   :  { %v3344_v56 = vsel %vm487_vm6, %v7593_v1, -inf }
 0xe2a   :  { %v3325_v57 = vpop.f32.mrb[102].mxu0 }
 0xe2b   :  { %v5478_v50 = vpop.f32.mrb[103].mxu0  ;;  %v7616_v59 = vadd.f32 %v7505_v41, %v3325_v57 }
 0xe2d   :  { %v3347_v35 = vsel %vm487_vm6, %v7616_v59, -inf }
 0xe2e   :  { %v3330_v63 = vpop.f32.mrb[104].mxu0 }
 0xe2f   :  { %v5481_v5 = vpop.f32.mrb[105].mxu0  ;;  %v7600_v39 = vadd.f32 %v7515_v8, %v3330_v63  ;;  %v7613_v8 = vpop.permute.xlu0 %5967 }
 0xe31   :  { %v3350_v53 = vsel %vm487_vm6, %v7600_v39, -inf }
 0xe32   :  { %v3335_v3 = vpop.f32.mrb[106].mxu0 }
 0xe33   :  { %v5484_v12 = vpop.f32.mrb[107].mxu0  ;;  %v7619_v4 = vadd.f32 %v7525_v52, %v3335_v3 }
 0xe35   :  { %v3353_v50 = vsel %vm487_vm6, %v7619_v4, -inf }
 0xe36   :  { %v3340_v46 = vpop.f32.mrb[108].mxu0 }
 0xe37   :  { %v5487_v14 = vpop.f32.mrb[109].mxu0  ;;  %v7605_v28 = vadd.f32 %v7535_v26, %v3340_v46 }
 0xe39   :  { %v3356_v20 = vsel %vm487_vm6, %v7605_v28, -inf }
 0xe3b   :  { %2744 = vmax.xlane.f32.xlu0 %v2743_v19 }
 0xe3f   :  { %2747 = vmax.xlane.f32.xlu1 %v2746_v44  ;;  %3040 = vmax.xlane.f32.xlu0 %v3039_v47 }
 0xe43   :  { %3043 = vmax.xlane.f32.xlu1 %v3042_v31  ;;  %3046 = vmax.xlane.f32.xlu0 %v3045_v36 }
 0xe47   :  { %3049 = vmax.xlane.f32.xlu1 %v3048_v55  ;;  %3052 = vmax.xlane.f32.xlu0 %v3051_v45 }
 0xe4b   :  { %3345 = vmax.xlane.f32.xlu1 %v3344_v56 }
 0xe4f   :  { %3351 = vmax.xlane.f32.xlu1 %v3350_v53 }
 0xe53   :  { %3357 = vmax.xlane.f32.xlu1 %v3356_v20 }
 0xe5d   :  { %5982 = vrot.lane.b32.xlu0 %v7324_v33, %s8220_s5 }
 0xe7b   :  { %v2431_v26 = vpop.xlane.xlu0 %2430 }
 0xe7c   :  { %v2444_v18 = vsub.f32 %v7498_v38, %v2431_v26  ;;  %3348 = vmax.xlane.f32.xlu0 %v3347_v35 }
 0xe7e   :  { %v2449_v13 = vmul.f32 1.442695, %v2444_v18 }
 0xe7f   :  { %v2434_v2 = vpop.xlane.xlu1 %2433 }
 0xe80   :  { %6097 = vpow2.f32 %v2449_v13  ;;  %v2445_v63 = vsub.f32 %v7508_v42, %v2434_v2  ;;  %3354 = vmax.xlane.f32.xlu0 %v3353_v50 }
 0xe82   :  { %v2451_v41 = vmul.f32 1.442695, %v2445_v63 }
 0xe83   :  { %v2437_v57 = vpop.xlane.xlu0 %2436 }
 0xe84   :  { %6099 = vpow2.f32 %v2451_v41  ;;  %v2446_v52 = vsub.f32 %v7518_v34, %v2437_v57 }
 0xe86   :  { %v2453_v5 = vmul.f32 1.442695, %v2446_v52 }
 0xe87   :  { %v2440_v3 = vpop.xlane.xlu0 %2439 }
 0xe88   :  { %6101 = vpow2.f32 %v2453_v5  ;;  %v2447_v38 = vsub.f32 %v7528_v0, %v2440_v3 }
 0xe8a   :  { %v7629_v12 = vpop.eup %6097  ;;  %v2455_v46 = vmul.f32 1.442695, %v2447_v38 }
 0xe8b   :  { %v2443_v14 = vpop.xlane.xlu0 %2442  ;;  %v2459_v19 = vsel %vm487_vm6, %v7629_v12, 0.0 }
 0xe8c   :  { %6103 = vpow2.f32 %v2455_v46  ;;  %v2448_v42 = vsub.f32 %v7538_v61, %v2443_v14  ;;  %2460 = vadd.xlane.f32.xlu0 %v2459_v19 }
 0xe8e   :  { %v7634_v44 = vpop.eup %6099  ;;  %v2457_v47 = vmul.f32 1.442695, %v2448_v42 }
 0xe8f   :  { %v2736_v34 = vpop.xlane.xlu1 %2735  ;;  %v2462_v31 = vsel %vm487_vm6, %v7634_v44, 0.0 }
 0xe90   :  { %6105 = vpow2.f32 %v2457_v47  ;;  %v2749_v0 = vsub.f32 %v7543_v37, %v2736_v34  ;;  %2463 = vadd.xlane.f32.xlu1 %v2462_v31 }
 0xe92   :  { %v7639_v36 = vpop.eup %6101  ;;  %v2754_v55 = vmul.f32 1.442695, %v2749_v0 }
 0xe93   :  { %v2739_v45 = vpop.xlane.xlu0 %2738  ;;  %v2465_v56 = vsel %vm487_vm6, %v7639_v36, 0.0 }
 0xe94   :  { %6107 = vpow2.f32 %v2754_v55  ;;  %v2750_v61 = vsub.f32 %v7548_v29, %v2739_v45  ;;  %2466 = vadd.xlane.f32.xlu0 %v2465_v56 }
 0xe96   :  { %v7644_v53 = vpop.eup %6103  ;;  %v2756_v20 = vmul.f32 1.442695, %v2750_v61 }
 0xe97   :  { %v2742_v26 = vpop.xlane.xlu1 %2741  ;;  %v2468_v35 = vsel %vm487_vm6, %v7644_v53, 0.0  ;;  %v7667_v52 = vpop.permute.xlu0 %5977 }
 0xe98   :  { %6109 = vpow2.f32 %v2756_v20  ;;  %v2751_v37 = vsub.f32 %v7553_v23, %v2742_v26  ;;  %2469 = vadd.xlane.f32.xlu1 %v2468_v35 }
 0xe9a   :  { %v7649_v18 = vpop.eup %6105  ;;  %v2758_v13 = vmul.f32 1.442695, %v2751_v37 }
 0xe9b   :  { %v2471_v2 = vsel %vm487_vm6, %v7649_v18, 0.0  ;;  %v7669_v5 = vpop.permute.xlu1 %2797 }
 0xe9c   :  { %6111 = vpow2.f32 %v2758_v13  ;;  %2472 = vadd.xlane.f32.xlu0 %v2471_v2 }
 0xe9e   :  { %v7653_v29 = vpop.eup %6107 }
 0xe9f   :  { %v2764_v50 = vsel %vm487_vm6, %v7653_v29, 0.0 }
 0xea0   :  { %2765 = vadd.xlane.f32.xlu1 %v2764_v50 }
 0xea2   :  { %v7657_v63 = vpop.eup %6109 }
 0xea3   :  { %v2767_v23 = vsel %vm487_vm6, %v7657_v63, 0.0 }
 0xea4   :  { %2768 = vadd.xlane.f32.xlu0 %v2767_v23 }
 0xea6   :  { %v7661_v41 = vpop.eup %6111 }
 0xea7   :  { %v2770_v57 = vsel %vm487_vm6, %v7661_v41, 0.0 }
 0xea8   :  { %2771 = vadd.xlane.f32.xlu0 %v2770_v57 }
 0xeb1   :  { %3102 = vrot.lane.b32.xlu1 %v7328_v7, %s8220_s5 }
 0xec8   :  { %v2745_v3 = vpop.xlane.xlu0 %2744 }
 0xec9   :  { %v2752_v38 = vsub.f32 %v7562_v27, %v2745_v3 }
 0xecb   :  { %v2760_v46 = vmul.f32 1.442695, %v2752_v38 }
 0xecc   :  { %v2748_v14 = vpop.xlane.xlu1 %2747  ;;  %v3041_v19 = vpop.xlane.xlu0 %3040 }
 0xecd   :  { %6113 = vpow2.f32 %v2760_v46  ;;  %v2753_v42 = vsub.f32 %v7565_v10, %v2748_v14  ;;  %v3054_v47 = vsub.f32 %v7568_v24, %v3041_v19 }
 0xecf   :  { %v2762_v34 = vmul.f32 1.442695, %v2753_v42  ;;  %v3059_v31 = vmul.f32 1.442695, %v3054_v47 }
 0xed0   :  { %v3044_v0 = vpop.xlane.xlu1 %3043  ;;  %v3047_v55 = vpop.xlane.xlu0 %3046 }
 0xed1   :  { %6115 = vpow2.f32 %v2762_v34  ;;  %v3055_v45 = vsub.f32 %v7573_v17, %v3044_v0  ;;  %v3056_v56 = vsub.f32 %v7576_v43, %v3047_v55 }
 0xed2   :  { %6117 = vpow2.f32 %v3059_v31 }
 0xed3   :  { %v3061_v61 = vmul.f32 1.442695, %v3055_v45  ;;  %v3063_v27 = vmul.f32 1.442695, %v3056_v56 }
 0xed4   :  { %v3050_v20 = vpop.xlane.xlu1 %3049  ;;  %v3053_v26 = vpop.xlane.xlu0 %3052 }
 0xed5   :  { %6119 = vpow2.f32 %v3061_v61  ;;  %v3057_v35 = vsub.f32 %v7583_v16, %v3050_v20  ;;  %v3058_v10 = vsub.f32 %v7586_v54, %v3053_v26 }
 0xed6   :  { %6121 = vpow2.f32 %v3063_v27 }
 0xed7   :  { %v7678_v24 = vpop.eup %6113  ;;  %v3065_v37 = vmul.f32 1.442695, %v3057_v35  ;;  %v3067_v13 = vmul.f32 1.442695, %v3058_v10 }
 0xed8   :  { %v3346_v2 = vpop.xlane.xlu1 %3345  ;;  %v2773_v17 = vsel %vm487_vm6, %v7678_v24, 0.0  ;;  %v7711_v0 = vpop.permute.xlu0 %5982 }
 0xed9   :  { %v3359_v43 = vsub.f32 %v7593_v1, %v3346_v2  ;;  %2774 = vadd.xlane.f32.xlu0 %v2773_v17  ;;  %6123 = vpow2.f32 %v3067_v13 }
 0xeda   :  { %6125 = vpow2.f32 %v3065_v37 }
 0xedb   :  { %v7683_v50 = vpop.eup %6115  ;;  %v3364_v23 = vmul.f32 1.442695, %v3359_v43 }
 0xedc   :  { %v7685_v16 = vpop.eup %6117  ;;  %v2776_v54 = vsel %vm487_vm6, %v7683_v50, 0.0  ;;  %v3352_v55 = vpop.xlane.xlu1 %3351 }
 0xedd   :  { %2777 = vadd.xlane.f32.xlu0 %v2776_v54  ;;  %v3069_v57 = vsel %vm487_vm6, %v7685_v16, 0.0  ;;  %6127 = vpow2.f32 %v3364_v23  ;;  %v3361_v45 = vsub.f32 %v7600_v39, %v3352_v55  ;;  %v5975_v55 = vunpack.i.h.bf16 %v7459_v58 }
 0xede   :  { %3070 = vadd.xlane.f32.xlu1 %v3069_v57  ;;  %v5970_v57 = vunpack.i.h.bf16 %v7613_v8 }
 0xedf   :  { %v7691_v3 = vpop.eup %6119  ;;  %v3368_v27 = vmul.f32 1.442695, %v3361_v45  ;;  %v5974_v45 = vunpack.i.l.bf16 %v7459_v58 }
 0xee0   :  { %v3072_v1 = vsel %vm487_vm6, %v7691_v3, 0.0  ;;  %v7695_v38 = vpop.eup %6121  ;;  %v7718_v13 = vpop.xlane.xlu1 %3357 }
 0xee1   :  { %3073 = vadd.xlane.f32.xlu0 %v3072_v1  ;;  %v3075_v14 = vsel %vm487_vm6, %v7695_v38, 0.0  ;;  %v5969_v1 = vunpack.i.l.bf16 %v7613_v8 }
 0xee3   :  { %v7697_v46 = vpop.eup %6123 }
 0xee4   :  { %v7701_v19 = vpop.eup %6125  ;;  %v3081_v42 = vsel %vm487_vm6, %v7697_v46, 0.0 }
 0xee5   :  { %3076 = vadd.xlane.f32.xlu0 %v3075_v14  ;;  %3082 = vadd.xlane.f32.xlu1 %v3081_v42  ;;  %v3078_v47 = vsel %vm487_vm6, %v7701_v19, 0.0 }
 0xee7   :  { %v7707_v34 = vpop.eup %6127 }
 0xee8   :  { %v3374_v31 = vsel %vm487_vm6, %v7707_v34, 0.0 }
 0xee9   :  { %3079 = vadd.xlane.f32.xlu0 %v3078_v47 }
 0xeed   :  { %3375 = vadd.xlane.f32.xlu0 %v3374_v31  ;;  %v5741_v31 = vpack.c.bf16 %v5970_v57, %v5969_v1 }
 0xf09   :  { %v3349_v56 = vpop.xlane.xlu0 %3348 }
 0xf0a   :  { %v3360_v61 = vsub.f32 %v7616_v59, %v3349_v56 }
 0xf0c   :  { %v3366_v20 = vmul.f32 1.442695, %v3360_v61 }
 0xf0d   :  { %v3355_v26 = vpop.xlane.xlu0 %3354 }
 0xf0e   :  { %6129 = vpow2.f32 %v3366_v20  ;;  %v3362_v35 = vsub.f32 %v7619_v4, %v3355_v26 }
 0xf0f   :  { %6131 = vpow2.f32 %v3368_v27 }
 0xf10   :  { %v3370_v10 = vmul.f32 1.442695, %v3362_v35 }
 0xf12   :  { %6133 = vpow2.f32 %v3370_v10  ;;  %v5979_v10 = vunpack.i.l.bf16 %v7667_v52 }
 0xf18   :  { %v7716_v37 = vpop.eup %6129 }
 0xf19   :  { %v2461_v2 = vpop.xlane.xlu0 %2460  ;;  %v3377_v39 = vsel %vm487_vm6, %v7716_v37, 0.0  ;;  %v7722_v17 = vpop.eup %6131 }
 0xf1a   :  { %6135 = vrcp.f32 %v2461_v2  ;;  %3378 = vadd.xlane.f32.xlu1 %v3377_v39  ;;  %v3380_v23 = vsel %vm487_vm6, %v7722_v17, 0.0  ;;  %v5985_v39 = vunpack.i.h.bf16 %v7711_v0 }
 0xf1c   :  { %v7724_v59 = vpop.eup %6133 }
 0xf1d   :  { %v2464_v43 = vpop.xlane.xlu1 %2463  ;;  %v3383_v4 = vsel %vm487_vm6, %v7724_v59, 0.0 }
 0xf1e   :  { %6137 = vrcp.f32 %v2464_v43  ;;  %3384 = vadd.xlane.f32.xlu0 %v3383_v4  ;;  %3381 = vadd.xlane.f32.xlu1 %v3380_v23  ;;  %v5984_v43 = vunpack.i.l.bf16 %v7711_v0 }
 0xf21   :  { %v2467_v54 = vpop.xlane.xlu0 %2466 }
 0xf22   :  { %6139 = vrcp.f32 %v2467_v54 }
 0xf24   :  { %v6136_v14 = vpop.eup %6135 }
 0xf25   :  { %v2479_v42 = vmul.f32 %v6136_v14, %v7629_v12  ;;  %v2470_v47 = vpop.xlane.xlu1 %2469  ;;  %v5744_v12 = vpack.c.bf16 %v5975_v55, %v5974_v45 }
 0xf26   :  { %6141 = vrcp.f32 %v2470_v47 }
 0xf27   :  { %5349 = vmatmul.mubr.msk.f32.vlgmr.msra.gmra.mrb[70].mxu1 %vm487_vm6, %v2479_v42 }
 0xf28   :  { %v6138_v56 = vpop.eup %6137  ;;  %5742 = vmatpush3.bf16.msra.mxu1 %v5741_v31  ;;  %5351 = vmatprep.mubr.msk.f32.mxu1 %vm6239_vm1, %v6238_v6 }
 0xf29   :  { %v2473_v61 = vpop.xlane.xlu0 %2472  ;;  %5743 = vmatprep.subr.bf16.mxu1 %v6240_v11  ;;  %v2480_v8 = vmul.f32 %v6138_v56, %v7634_v44 }
 0xf2a   :  { %6143 = vrcp.f32 %v2473_v61 }
 0xf2b   :  { %5352 = vmatmul.mubr.msk.f32.gmra.mrb[72].mxu1 %vm487_vm6, %v2480_v8 }
 0xf2c   :  { %v6140_v27 = vpop.eup %6139  ;;  %5745 = vmatpush3.bf16.msra.mxu1 %v5744_v12  ;;  %5354 = vmatprep.mubr.msk.f32.mxu1 %vm6239_vm1, %v6238_v6 }
 0xf2d   :  { %v2766_v58 = vpop.xlane.xlu1 %2765  ;;  %5396 = vmatprep.subr.mxu1 %v6238_v6  ;;  %v2481_v20 = vmul.f32 %v6140_v27, %v7639_v36 }
 0xf2e   :  { %6145 = vrcp.f32 %v2766_v58 }
 0xf2f   :  { %5992 = vrot.lane.b32.xlu1 %v7324_v33, %s8221_s0  ;;  %5355 = vmatmul.mubr.msk.f32.gmra.mrb[74].mxu1 %vm487_vm6, %v2481_v20 }
 0xf30   :  { %v6142_v44 = vpop.eup %6141  ;;  %5397 = vmatpush3.msra.mxu1 %v7669_v5  ;;  %5357 = vmatprep.mubr.msk.f32.mxu1 %vm6239_vm1, %v6238_v6 }
 0xf31   :  { %v2769_v26 = vpop.xlane.xlu0 %2768  ;;  %v2482_v35 = vmul.f32 %v6142_v44, %v7644_v53  ;;  %5754 = vmatprep.subr.bf16.mxu1 %v6240_v11  ;;  %v5980_v53 = vunpack.i.h.bf16 %v7667_v52  ;;  %v3363_v52 = vsub.f32 %v7605_v28, %v7718_v13  ;;  %v3103_v57 = vpop.permute.xlu1 %3102 }
 0xf32   :  { %6147 = vrcp.f32 %v2769_v26 }
 0xf33   :  { %3407 = vrot.lane.b32.xlu1 %v7328_v7, %s8221_s0  ;;  %5358 = vmatmul.mubr.msk.f32.gmra.mrb[76].mxu1 %vm487_vm6, %v2482_v35  ;;  %v3372_v0 = vmul.f32 1.442695, %v3363_v52 }
 0xf34   :  { %v6144_v33 = vpop.eup %6143  ;;  %5987 = vrot.lane.b32.xlu0 %v7314_v22, %s8221_s0  ;;  %5360 = vmatprep.mubr.msk.f32.mxu1 %vm6239_vm1, %v6238_v6  ;;  %v5755_v22 = vpack.c.bf16 %v5980_v53, %v5979_v10 }
 0xf35   :  { %v2772_v36 = vpop.xlane.xlu0 %2771  ;;  %v2483_v5 = vmul.f32 %v6144_v33, %v7649_v18 }
 0xf36   :  { %6149 = vrcp.f32 %v2772_v36 }
 0xf37   :  { %5361 = vmatmul.mubr.msk.f32.gmra.mrb[78].mxu1 %vm487_vm6, %v2483_v5  ;;  %6151 = vpow2.f32 %v3372_v0 }
 0xf38   :  { %v6146_v7 = vpop.eup %6145  ;;  %5398 = vmatprep.mubr.msk.f32.mxu1 %vm6239_vm1, %v6238_v6 }
 0xf39   :  { %v2784_v2 = vmul.f32 %v6146_v7, %v7653_v29  ;;  %v5758_v29 = vpack.c.bf16 %v5985_v39, %v5984_v43 }
 0xf3b   :  { %5399 = vmatmul.mubr.msk.f32.vlgmr.msra.gmra.mrb[80].mxu1 %vm487_vm6, %v2784_v2 }
 0xf3c   :  { %v6148_v18 = vpop.eup %6147  ;;  %5756 = vmatpush3.bf16.msra.mxu1 %v5755_v22  ;;  %5401 = vmatprep.mubr.msk.f32.mxu1 %vm6239_vm1, %v6238_v6 }
 0xf3d   :  { %5757 = vmatprep.subr.bf16.mxu1 %v6240_v11  ;;  %v2785_v4 = vmul.f32 %v6148_v18, %v7657_v63 }
 0xf3f   :  { %5402 = vmatmul.mubr.msk.f32.gmra.mrb[82].mxu1 %vm487_vm6, %v2785_v4 }
 0xf40   :  { %v6150_v23 = vpop.eup %6149  ;;  %5759 = vmatpush3.bf16.msra.mxu1 %v5758_v29  ;;  %5404 = vmatprep.mubr.msk.f32.mxu1 %vm6239_vm1, %v6238_v6 }
 0xf41   :  { %5446 = vmatprep.subr.mxu1 %v6238_v6  ;;  %v2786_v54 = vmul.f32 %v6150_v23, %v7661_v41  ;;  %v7785_v28 = vpop.eup %6151 }
 0xf42   :  { %v3386_v63 = vsel %vm487_vm6, %v7785_v28, 0.0 }
 0xf43   :  { %5405 = vmatmul.mubr.msk.f32.gmra.mrb[84].mxu1 %vm487_vm6, %v2786_v54 }
 0xf44   :  { %5447 = vmatpush3.msra.mxu1 %v3103_v57  ;;  %5407 = vmatprep.mubr.msk.f32.mxu1 %vm6239_vm1, %v6238_v6 }
 0xf45   :  { %5768 = vmatprep.subr.bf16.mxu1 %v6240_v11 }
 0xf53   :  { %3387 = vadd.xlane.f32.xlu0 %v3386_v63 }
 0xf66   :  { %v2775_v13 = vpop.xlane.xlu0 %2774 }
 0xf67   :  { %6153 = vrcp.f32 %v2775_v13 }
 0xf6a   :  { %v2778_v1 = vpop.xlane.xlu0 %2777 }
 0xf6b   :  { %6155 = vrcp.f32 %v2778_v1  ;;  %v3071_v41 = vpop.xlane.xlu1 %3070 }
 0xf6c   :  { %6157 = vrcp.f32 %v3071_v41 }
 0xf6e   :  { %v3074_v14 = vpop.xlane.xlu0 %3073 }
 0xf6f   :  { %6159 = vrcp.f32 %v3074_v14 }
 0xf71   :  { %v6154_v42 = vpop.eup %6153 }
 0xf72   :  { %v3077_v47 = vpop.xlane.xlu0 %3076  ;;  %v2787_v31 = vmul.f32 %v6154_v42, %v7678_v24  ;;  %v3083_v24 = vpop.xlane.xlu1 %3082 }
 0xf73   :  { %6161 = vrcp.f32 %v3077_v47 }
 0xf74   :  { %5408 = vmatmul.mubr.msk.f32.gmra.mrb[86].mxu1 %vm487_vm6, %v2787_v31 }
 0xf75   :  { %v6156_v55 = vpop.eup %6155  ;;  %5410 = vmatprep.mubr.msk.f32.mxu1 %vm6239_vm1, %v6238_v6 }
 0xf76   :  { %v3080_v45 = vpop.xlane.xlu0 %3079  ;;  %v2788_v56 = vmul.f32 %v6156_v55, %v7683_v50  ;;  %v6158_v61 = vpop.eup %6157 }
 0xf77   :  { %6163 = vrcp.f32 %v3080_v45  ;;  %v3089_v8 = vmul.f32 %v6158_v61, %v7685_v16 }
 0xf78   :  { %5411 = vmatmul.mubr.msk.f32.gmra.mrb[88].mxu1 %vm487_vm6, %v2788_v56  ;;  %6165 = vrcp.f32 %v3083_v24 }
 0xf79   :  { %5448 = vmatprep.mubr.msk.f32.mxu1 %vm6239_vm1, %v6238_v6  ;;  %v6160_v12 = vpop.eup %6159 }
 0xf7a   :  { %v3090_v27 = vmul.f32 %v6160_v12, %v7691_v3 }
 0xf7c   :  { %5449 = vmatmul.mubr.msk.f32.vlgmr.msra.gmra.mrb[90].mxu1 %vm487_vm6, %v3089_v8 }
 0xf7d   :  { %5451 = vmatprep.mubr.msk.f32.mxu1 %vm6239_vm1, %v6238_v6  ;;  %v6162_v50 = vpop.eup %6161 }
 0xf7e   :  { %v3091_v58 = vmul.f32 %v6162_v50, %v7695_v38  ;;  %v3376_v38 = vpop.xlane.xlu0 %3375  ;;  %v4674_v50 = vld [vmem:[%s8186_s8 + $0x28] sm:$0xff] }
 0xf7f   :  { %6167 = vrcp.f32 %v3376_v38 }
 0xf80   :  { %5452 = vmatmul.mubr.msk.f32.gmra.mrb[92].mxu1 %vm487_vm6, %v3090_v27  ;;  %v4673_v27 = vld [vmem:[%s8186_s8 + $0x20] sm:$0xff] }
 0xf81   :  { %5454 = vmatprep.mubr.msk.f32.mxu1 %vm6239_vm1, %v6238_v6  ;;  %v6164_v20 = vpop.eup %6163 }
 0xf82   :  { %v3092_v16 = vmul.f32 %v6164_v20, %v7701_v19  ;;  %v6166_v44 = vpop.eup %6165 }
 0xf83   :  { %v3093_v3 = vmul.f32 %v6166_v44, %v7697_v46  ;;  %v4676_v44 = vld [vmem:[%s8186_s8 + $0x38] sm:$0xff] }
 0xf84   :  { %5455 = vmatmul.mubr.msk.f32.gmra.mrb[94].mxu1 %vm487_vm6, %v3091_v58  ;;  %v4675_v58 = vld [vmem:[%s8186_s8 + $0x30] sm:$0xff]  ;;  %s8224_s8 = smov 24  }
 0xf85   :  { %5457 = vmatprep.mubr.msk.f32.mxu1 %vm6239_vm1, %v6238_v6 }
 0xf88   :  { %5458 = vmatmul.mubr.msk.f32.gmra.mrb[96].mxu1 %vm487_vm6, %v3092_v16  ;;  %v5775_v16 = vpack.c.bf16 %v4674_v50, %v4673_v27 }
 0xf89   :  { %5460 = vmatprep.mubr.msk.f32.mxu1 %vm6239_vm1, %v6238_v6  ;;  %v6168_v22 = vpop.eup %6167 }
 0xf8a   :  { %v3394_v39 = vmul.f32 %v6168_v22, %v7707_v34  ;;  %5776 = vmatpush3.bf16.msra.mxu0 %v5775_v16 }
 0xf8b   :  { %5777 = vmatprep.subr.bf16.mxu0 %v6240_v11 }
 0xf8c   :  { %5461 = vmatmul.mubr.msk.f32.gmra.mrb[98].mxu1 %vm487_vm6, %v3093_v3  ;;  %v5778_v3 = vpack.c.bf16 %v4676_v44, %v4675_v58 }
 0xf8d   :  { %5498 = vmatprep.mubr.msk.f32.mxu1 %vm6239_vm1, %v6238_v6 }
 0xf8e   :  { %5779 = vmatpush3.bf16.msra.mxu0 %v5778_v3 }
 0xf8f   :  { %5786 = vmatprep.subr.bf16.mxu0 %v6240_v11 }
 0xfa7   :  { %v3379_v26 = vpop.xlane.xlu1 %3378 }
 0xfa8   :  { %6169 = vrcp.f32 %v3379_v26 }
 0xfab   :  { %v3385_v35 = vpop.xlane.xlu0 %3384  ;;  %v3382_v33 = vpop.xlane.xlu1 %3381 }
 0xfac   :  { %6171 = vrcp.f32 %v3382_v33 }
 0xfad   :  { %6173 = vrcp.f32 %v3385_v35 }
 0xfaf   :  { %v5988_v36 = vpop.permute.xlu0 %5987  ;;  %v5993_v19 = vpop.permute.xlu1 %5992 }
 0xfb0   :  { %v5990_v5 = vunpack.i.h.bf16 %v5988_v36  ;;  %v5989_v53 = vunpack.i.l.bf16 %v5988_v36  ;;  %v5995_v7 = vunpack.i.h.bf16 %v5993_v19  ;;  %v5994_v2 = vunpack.i.l.bf16 %v5993_v19 }
 0xfb2   :  { %v5769_v10 = vpack.c.bf16 %v5990_v5, %v5989_v53  ;;  %v5772_v46 = vpack.c.bf16 %v5995_v7, %v5994_v2  ;;  %v6170_v18 = vpop.eup %6169 }
 0xfb3   :  { %v3408_v43 = vpop.permute.xlu1 %3407  ;;  %v3395_v52 = vmul.f32 %v6170_v18, %v7716_v37 }
 0xfb4   :  { %5770 = vmatpush3.bf16.msra.mxu1 %v5769_v10 }
 0xfb5   :  { %5771 = vmatprep.subr.bf16.mxu1 %v6240_v11 }
 0xfb6   :  { %v6172_v4 = vpop.eup %6171 }
 0xfb7   :  { %v3396_v34 = vmul.f32 %v6172_v4, %v7722_v17  ;;  %v6174_v29 = vpop.eup %6173 }
 0xfb8   :  { %5773 = vmatpush3.bf16.msra.mxu1 %v5772_v46  ;;  %v3397_v23 = vmul.f32 %v6174_v29, %v7724_v59 }
 0xfb9   :  { %5496 = vmatprep.subr.mxu1 %v6238_v6 }
 0xfbc   :  { %5497 = vmatpush3.msra.mxu1 %v3408_v43 }
 0xfbd   :  { %5499 = vmatmul.mubr.msk.f32.vlgmr.msra.gmra.mrb[100].mxu1 %vm487_vm6, %v3394_v39  ;;  %5780 = vmatprep.subr.bf16.mxu1 %v6240_v11 }
 0xfbe   :  { %5501 = vmatprep.mubr.msk.f32.mxu1 %vm6239_vm1, %v6238_v6 }
 0xfc1   :  { %5502 = vmatmul.mubr.msk.f32.gmra.mrb[102].mxu1 %vm487_vm6, %v3395_v52 }
 0xfc2   :  { %5504 = vmatprep.mubr.msk.f32.mxu1 %vm6239_vm1, %v6238_v6 }
 0xfc5   :  { %5505 = vmatmul.mubr.msk.f32.gmra.mrb[104].mxu1 %vm487_vm6, %v3396_v34 }
 0xfc6   :  { %5507 = vmatprep.mubr.msk.f32.mxu1 %vm6239_vm1, %v6238_v6 }
 0xfc9   :  { %5508 = vmatmul.mubr.msk.f32.gmra.mrb[106].mxu1 %vm487_vm6, %v3397_v23 }
 0xfca   :  { %5510 = vmatprep.mubr.msk.f32.mxu1 %vm6239_vm1, %v6238_v6 }
 0xfe0   :  { %v3388_v37 = vpop.xlane.xlu0 %3387 }
 0xfe1   :  { %6175 = vrcp.f32 %v3388_v37 }
 0xfeb   :  { %v6176_v0 = vpop.eup %6175 }
 0xfec   :  { %v3398_v54 = vmul.f32 %v6176_v0, %v7785_v28 }
 0xfee   :  { %5511 = vmatmul.mubr.msk.f32.gmra.mrb[108].mxu1 %vm487_vm6, %v3398_v54 }
 0xfef   :  { %5544 = vmatprep.mubr.msk.f32.mxu1 %vm6239_vm1, %v6238_v6 }
 0xffa   :  { %v7840_v17 = vpop.f32.mrb[70].mxu1 }
 0xffb   :  { %v5350_v57 = vpop.f32.mrb[71].mxu1 }
 0xffe   :  { %v7842_v63 = vpop.f32.mrb[72].mxu1 }
 0xfff   :  { %v5353_v59 = vpop.f32.mrb[73].mxu1 }
0x1002   :  { %v7844_v13 = vpop.f32.mrb[74].mxu1 }
0x1003   :  { %v5356_v1 = vpop.f32.mrb[75].mxu1 }
0x1006   :  { %v7846_v41 = vpop.f32.mrb[76].mxu1 }
0x1007   :  { %v5359_v14 = vpop.f32.mrb[77].mxu1 }
0x100a   :  { %v7848_v42 = vpop.f32.mrb[78].mxu1 }
0x100b   :  { %v5362_v28 = vpop.f32.mrb[79].mxu1 }
0x100e   :  { %v2885_v47 = vpop.f32.mrb[80].mxu1 }
0x100f   :  { %3524 = vrot.lane.b32.xlu1 %v2885_v47, %s8222_s6  ;;  %v5400_v31 = vpop.f32.mrb[81].mxu1 }
0x1012   :  { %v2890_v55 = vpop.f32.mrb[82].mxu1 }
0x1013   :  { %3526 = vrot.lane.b32.xlu1 %v2890_v55, %s8222_s6  ;;  %v5403_v45 = vpop.f32.mrb[83].mxu1 }
0x1016   :  { %v2895_v56 = vpop.f32.mrb[84].mxu1 }
0x1017   :  { %3528 = vrot.lane.b32.xlu1 %v2895_v56, %s8222_s6  ;;  %v5406_v61 = vpop.f32.mrb[85].mxu1 }
0x1047   :  { %v2900_v8 = vpop.f32.mrb[86].mxu1 }
0x1048   :  { %v5409_v24 = vpop.f32.mrb[87].mxu1 }
0x104b   :  { %v2905_v12 = vpop.f32.mrb[88].mxu1 }
0x104c   :  { %v5412_v20 = vpop.f32.mrb[89].mxu1 }
0x104f   :  { %v3190_v38 = vpop.f32.mrb[90].mxu1 }
0x1050   :  { %3544 = vrot.lane.b32.xlu0 %v3190_v38, %s8223_s18  ;;  %v5450_v26 = vpop.f32.mrb[91].mxu1 }
0x1051   :  { %v7917_v26 = vld [vmem:[%s8190_s12 + $0x8] sm:$0x3f] }
0x1053   :  { %v3195_v35 = vpop.f32.mrb[92].mxu1 }
0x1054   :  { %3546 = vrot.lane.b32.xlu1 %v3195_v35, %s8223_s18  ;;  %v5453_v33 = vpop.f32.mrb[93].mxu1  ;;  %v3602_v35 = vrot.slane %v7917_v26, %v7076_v30 }
0x1057   :  { %v3200_v36 = vpop.f32.mrb[94].mxu1 }
0x1058   :  { %3548 = vrot.lane.b32.xlu1 %v3200_v36, %s8223_s18  ;;  %v5456_v19 = vpop.f32.mrb[95].mxu1 }
0x105b   :  { %v3205_v5 = vpop.f32.mrb[96].mxu1 }
0x105c   :  { %v5459_v53 = vpop.f32.mrb[97].mxu1 }
0x105f   :  { %v3210_v10 = vpop.f32.mrb[98].mxu1 }
0x1060   :  { %v5462_v7 = vpop.f32.mrb[99].mxu1 }
0x1081   :  { %v3525_v23 = vpop.permute.xlu1 %3524 }
0x1082   :  { %v3579_v1 = vsel %vm376_vm4, %v7840_v17, %v3525_v23 }
0x1085   :  { %v3527_v37 = vpop.permute.xlu1 %3526 }
0x1086   :  { %v3580_v31 = vsel %vm376_vm4, %v7842_v63, %v3527_v37 }
0x1089   :  { %v3529_v0 = vpop.permute.xlu1 %3528 }
0x108a   :  { %v3581_v17 = vsel %vm376_vm4, %v7844_v13, %v3529_v0 }
0x1090   :  { %v3495_v2 = vpop.f32.mrb[100].mxu1 }
0x1091   :  { %3564 = vrot.lane.b32.xlu1 %v3495_v2, %s8224_s8  ;;  %v5500_v46 = vpop.f32.mrb[101].mxu1 }
0x1094   :  { %v3500_v22 = vpop.f32.mrb[102].mxu1 }
0x1095   :  { %3566 = vrot.lane.b32.xlu1 %v3500_v22, %s8224_s8  ;;  %v5503_v39 = vpop.f32.mrb[103].mxu1 }
0x1098   :  { %v3505_v43 = vpop.f32.mrb[104].mxu1 }
0x1099   :  { %3530 = vrot.lane.b32.xlu1 %v2900_v8, %s8222_s6  ;;  %3568 = vrot.lane.b32.xlu0 %v3505_v43, %s8224_s8  ;;  %v5506_v18 = vpop.f32.mrb[105].mxu1 }
0x109c   :  { %v3510_v52 = vpop.f32.mrb[106].mxu1 }
0x109d   :  { %3550 = vrot.lane.b32.xlu0 %v3205_v5, %s8223_s18  ;;  %3570 = vrot.lane.b32.xlu1 %v3510_v52, %s8224_s8  ;;  %v5509_v4 = vpop.f32.mrb[107].mxu1 }
0x10a1   :  { %3532 = vrot.lane.b32.xlu0 %v2905_v12, %s8222_s6  ;;  %3552 = vrot.lane.b32.xlu1 %v3210_v10, %s8223_s18 }
0x10c1   :  { %v3515_v34 = vpop.f32.mrb[108].mxu1 }
0x10c2   :  { %3572 = vrot.lane.b32.xlu0 %v3515_v34, %s8224_s8  ;;  %v5512_v29 = vpop.f32.mrb[109].mxu1  ;;  %v3545_v59 = vpop.permute.xlu0 %3544 }
0x10c3   :  { %v3584_v14 = vsel %vm1643_vm7, %v3579_v1, %v3545_v59 }
0x10c6   :  { %v3547_v54 = vpop.permute.xlu1 %3546 }
0x10c7   :  { %v3585_v55 = vsel %vm1643_vm7, %v3580_v31, %v3547_v54 }
0x10ca   :  { %v3549_v57 = vpop.permute.xlu1 %3548 }
0x10cb   :  { %v3586_v61 = vsel %vm1643_vm7, %v3581_v17, %v3549_v57 }
0x1103   :  { %v3565_v28 = vpop.permute.xlu1 %3564 }
0x1104   :  { %v3589_v47 = vsel %vm1649_vm8, %v3584_v14, %v3565_v28 }
0x1105   :  { %5522 = vmatmul.mubr.msk.f32.vlgmr.msra.gmra.mrb[110].mxu0 %vm255_vm3, %v3589_v47 }
0x1106   :  { %5524 = vmatprep.mubr.msk.f32.mxu0 %vm6239_vm1, %v6238_v6 }
0x1107   :  { %v3567_v45 = vpop.permute.xlu1 %3566 }
0x1108   :  { %v3590_v56 = vsel %vm1649_vm8, %v3585_v55, %v3567_v45 }
0x1109   :  { %5525 = vmatmul.mubr.msk.f32.gmra.mrb[112].mxu0 %vm255_vm3, %v3590_v56 }
0x110a   :  { %5527 = vmatprep.mubr.msk.f32.mxu0 %vm6239_vm1, %v6238_v6 }
0x110b   :  { %v3531_v8 = vpop.permute.xlu1 %3530  ;;  %v3569_v63 = vpop.permute.xlu0 %3568 }
0x110c   :  { %v3591_v24 = vsel %vm1649_vm8, %v3586_v61, %v3569_v63  ;;  %v3582_v12 = vsel %vm376_vm4, %v7846_v41, %v3531_v8 }
0x110d   :  { %5528 = vmatmul.mubr.msk.f32.gmra.mrb[114].mxu0 %vm255_vm3, %v3591_v24 }
0x110e   :  { %5530 = vmatprep.mubr.msk.f32.mxu0 %vm6239_vm1, %v6238_v6 }
0x110f   :  { %v3551_v27 = vpop.permute.xlu0 %3550  ;;  %v3571_v50 = vpop.permute.xlu1 %3570 }
0x1110   :  { %v3587_v13 = vsel %vm1643_vm7, %v3582_v12, %v3551_v27 }
0x1111   :  { %v3592_v58 = vsel %vm1649_vm8, %v3587_v13, %v3571_v50  ;;  %v4682_v13 = vld [vmem:[%s8187_s9 + $0x20] sm:$0xff] }
0x1112   :  { %5531 = vmatmul.mubr.msk.f32.gmra.mrb[116].mxu0 %vm255_vm3, %v3592_v58  ;;  %v4683_v58 = vld [vmem:[%s8187_s9 + $0x28] sm:$0xff] }
0x1113   :  { %5533 = vmatprep.mubr.msk.f32.mxu0 %vm6239_vm1, %v6238_v6  ;;  %v3533_v20 = vpop.permute.xlu0 %3532  ;;  %v3553_v44 = vpop.permute.xlu1 %3552 }
0x1114   :  { %v3583_v16 = vsel %vm376_vm4, %v7848_v42, %v3533_v20  ;;  %v5781_v20 = vpack.c.bf16 %v4683_v58, %v4682_v13  ;;  %v4699_v58 = vld [vmem:[%s8189_s11 + $0x70] sm:$0xff] }
0x1115   :  { %v3588_v3 = vsel %vm1643_vm7, %v3583_v16, %v3553_v44  ;;  %v4684_v16 = vld [vmem:[%s8187_s9 + $0x30] sm:$0xff]  ;;  %v4685_v44 = vld [vmem:[%s8187_s9 + $0x38] sm:$0xff] }
0x1116   :  { %5782 = vmatpush3.bf16.msra.mxu1 %v5781_v20  ;;  %v4700_v20 = vld [vmem:[%s8189_s11 + $0x78] sm:$0xff] }
0x1117   :  { %5783 = vmatprep.subr.bf16.mxu1 %v6240_v11 }
0x1134   :  { %v3573_v38 = vpop.permute.xlu0 %3572 }
0x1135   :  { %v3593_v41 = vsel %vm1649_vm8, %v3588_v3, %v3573_v38  ;;  %v5784_v3 = vpack.c.bf16 %v4685_v44, %v4684_v16  ;;  %v5796_v16 = vpack.c.bf16 %v4700_v20, %v4699_v58  ;;  %v4687_v44 = vld [vmem:[%s8188_s10 + $0x1] ss:$0 sm:$0xff] }
0x1136   :  { %5534 = vmatmul.mubr.msk.f32.gmra.mrb[118].mxu0 %vm255_vm3, %v3593_v41 }
0x1137   :  { %5575 = vmatprep.mubr.msk.f32.mxu0 %vm6239_vm1, %v6238_v6  ;;  %5785 = vmatpush3.bf16.msra.mxu1 %v5784_v3 }
0x1138   :  { %5798 = vmatprep.subr.bf16.mxu1 %v6240_v11 }
0x11d8   :  { %v3684_v42 = vpop.f32.mrb[110].mxu0 }
0x11d9   :  { %v3685_v33 = vadd.f32 %v3684_v42, %v3602_v35  ;;  %v5523_v36 = vpop.f32.mrb[111].mxu0 }
0x11da   :  { %v4693_v36 = vld [vmem:[%s8189_s11 + $0x40] sm:$0xff] }
0x11db   :  { %v3708_v19 = vadd.f32 %v3685_v33, %v7273_v15 }
0x11dc   :  { %v3689_v5 = vpop.f32.mrb[112].mxu0 }
0x11dd   :  { %v3690_v53 = vadd.f32 %v3689_v5, %v3602_v35  ;;  %v5526_v10 = vpop.f32.mrb[113].mxu0  ;;  %v3713_v7 = vsel %vm255_vm3, %v3708_v19, 0.0  ;;  %v4695_v5 = vld [vmem:[%s8189_s11 + $0x50] sm:$0xff] }
0x11de   :  { %3714 = vadd.xlane.f32.xlu1 %v3713_v7  ;;  %v4696_v10 = vld [vmem:[%s8189_s11 + $0x58] sm:$0xff] }
0x11df   :  { %v3709_v2 = vadd.f32 %v3690_v53, %v7279_v40  ;;  %v5790_v7 = vpack.c.bf16 %v4696_v10, %v4695_v5 }
0x11e0   :  { %v3694_v46 = vpop.f32.mrb[114].mxu0 }
0x11e1   :  { %v3695_v22 = vadd.f32 %v3694_v46, %v3602_v35  ;;  %v5529_v39 = vpop.f32.mrb[115].mxu0  ;;  %v3716_v43 = vsel %vm255_vm3, %v3709_v2, 0.0  ;;  %v4698_v46 = vld [vmem:[%s8189_s11 + $0x68] sm:$0xff] }
0x11e2   :  { %3717 = vadd.xlane.f32.xlu0 %v3716_v43 }
0x11e3   :  { %v3710_v18 = vadd.f32 %v3695_v22, %v7286_v60 }
0x11e5   :  { %v3699_v52 = vpop.f32.mrb[116].mxu0  ;;  %v3719_v4 = vsel %vm255_vm3, %v3710_v18, 0.0 }
0x11e6   :  { %v3700_v15 = vadd.f32 %v3699_v52, %v3602_v35  ;;  %3720 = vadd.xlane.f32.xlu0 %v3719_v4  ;;  %v5532_v34 = vpop.f32.mrb[117].mxu0 }
0x11e8   :  { %v3711_v29 = vadd.f32 %v3700_v15, %v7293_v32 }
0x11ea   :  { %v3722_v23 = vsel %vm255_vm3, %v3711_v29, 0.0 }
0x11eb   :  { %3723 = vadd.xlane.f32.xlu0 %v3722_v23 }
0x1209   :  { %v3704_v40 = vpop.f32.mrb[118].mxu0 }
0x120a   :  { %v3705_v37 = vadd.f32 %v3704_v40, %v3602_v35  ;;  %v5535_v0 = vpop.f32.mrb[119].mxu0 }
0x120c   :  { %v3712_v54 = vadd.f32 %v3705_v37, %v7299_v62  ;;  %v3781_v37 = vrot.slane %v7917_v26, %v1841_v48 }
0x120e   :  { %v3725_v57 = vsel %vm255_vm3, %v3712_v54, 0.0 }
0x120f   :  { %3726 = vadd.xlane.f32.xlu1 %v3725_v57  ;;  %v3790_v57 = vrot.slane %v7917_v26, %v1850_v9 }
0x126b   :  { %v3715_v60 = vpop.xlane.xlu1 %3714 }
0x126c   :  { %v3728_v59 = vmul.f32 0.03125, %v3715_v60 }
0x126e   :  { %v7931_v1 = vsub.f32 %v3708_v19, %v3728_v59  ;;  %v4694_v19 = vld [vmem:[%s8189_s11 + $0x48] sm:$0xff] }
0x126f   :  { %v3718_v14 = vpop.xlane.xlu0 %3717  ;;  %v5787_v53 = vpack.c.bf16 %v4694_v19, %v4693_v36 }
0x1270   :  { %v3729_v28 = vmul.f32 0.03125, %v3718_v14  ;;  %v3738_v32 = vmul.f32 %v7931_v1, %v7931_v1 }
0x1271   :  { %5788 = vmatpush3.bf16.msra.mxu0 %v5787_v53 }
0x1272   :  { %v7935_v47 = vsub.f32 %v3709_v2, %v3729_v28  ;;  %v3743_v31 = vsel %vm255_vm3, %v3738_v32, 0.0  ;;  %5789 = vmatprep.subr.bf16.mxu0 %v6240_v11  ;;  %v4697_v2 = vld [vmem:[%s8189_s11 + $0x60] sm:$0xff] }
0x1273   :  { %v3721_v55 = vpop.xlane.xlu0 %3720  ;;  %3744 = vadd.xlane.f32.xlu0 %v3743_v31  ;;  %v5793_v22 = vpack.c.bf16 %v4698_v46, %v4697_v2 }
0x1274   :  { %v3730_v45 = vmul.f32 0.03125, %v3721_v55  ;;  %v3739_v62 = vmul.f32 %v7935_v47, %v7935_v47 }
0x1275   :  { %5791 = vmatpush3.bf16.msra.mxu0 %v5790_v7 }
0x1276   :  { %v7940_v56 = vsub.f32 %v3710_v18, %v3730_v45  ;;  %v3746_v17 = vsel %vm255_vm3, %v3739_v62, 0.0  ;;  %5792 = vmatprep.subr.bf16.mxu0 %v6240_v11 }
0x1277   :  { %3747 = vadd.xlane.f32.xlu1 %v3746_v17 }
0x1278   :  { %v3724_v61 = vpop.xlane.xlu0 %3723  ;;  %v3740_v8 = vmul.f32 %v7940_v56, %v7940_v56 }
0x1279   :  { %v3731_v63 = vmul.f32 0.03125, %v3724_v61  ;;  %5794 = vmatpush3.bf16.msra.mxu0 %v5793_v22 }
0x127a   :  { %v3749_v24 = vsel %vm255_vm3, %v3740_v8, 0.0  ;;  %5795 = vmatprep.subr.bf16.mxu0 %v6240_v11 }
0x127b   :  { %v7946_v12 = vsub.f32 %v3711_v29, %v3731_v63  ;;  %3750 = vadd.xlane.f32.xlu0 %v3749_v24 }
0x127d   :  { %v3741_v27 = vmul.f32 %v7946_v12, %v7946_v12  ;;  %5797 = vmatpush3.bf16.msra.mxu0 %v5796_v16 }
0x127e   :  { %5804 = vmatprep.subr.bf16.mxu0 %v6240_v11 }
0x127f   :  { %v3752_v50 = vsel %vm255_vm3, %v3741_v27, 0.0 }
0x1280   :  { %3753 = vadd.xlane.f32.xlu1 %v3752_v50 }
0x129c   :  { %v3727_v38 = vpop.xlane.xlu1 %3726 }
0x129d   :  { %v3732_v41 = vmul.f32 0.03125, %v3727_v38 }
0x129f   :  { %v7965_v35 = vsub.f32 %v3712_v54, %v3732_v41 }
0x12a1   :  { %v3742_v42 = vmul.f32 %v7965_v35, %v7965_v35 }
0x12a3   :  { %v3755_v33 = vsel %vm255_vm3, %v3742_v42, 0.0 }
0x12a4   :  { %3756 = vadd.xlane.f32.xlu0 %v3755_v33 }
0x1300   :  { %v3745_v39 = vpop.xlane.xlu0 %3744 }
0x1301   :  { %v3758_v43 = vmul.f32 0.03125, %v3745_v39 }
0x1303   :  { %v3763_v18 = vadd.f32 1e-05, %v3758_v43 }
0x1304   :  { %v3748_v52 = vpop.xlane.xlu1 %3747 }
0x1305   :  { %6177 = vrsqrt.f32 %v3763_v18  ;;  %v3759_v4 = vmul.f32 0.03125, %v3748_v52 }
0x1307   :  { %v3764_v15 = vadd.f32 1e-05, %v3759_v4 }
0x1308   :  { %v3751_v34 = vpop.xlane.xlu0 %3750 }
0x1309   :  { %6179 = vrsqrt.f32 %v3764_v15  ;;  %v3760_v29 = vmul.f32 0.03125, %v3751_v34  ;;  %v3931_v15 = vrot.slane %v7917_v26, %v7224_v25 }
0x130b   :  { %v3765_v23 = vadd.f32 1e-05, %v3760_v29 }
0x130d   :  { %6181 = vrsqrt.f32 %v3765_v23  ;;  %v3754_v40 = vpop.xlane.xlu1 %3753 }
0x130e   :  { %v3761_v0 = vmul.f32 0.03125, %v3754_v40 }
0x130f   :  { %v6178_v54 = vpop.eup %6177 }
0x1310   :  { %v3773_v60 = vmul.f32 %v6178_v54, %v7931_v1  ;;  %v3766_v59 = vadd.f32 1e-05, %v3761_v0 }
0x1312   :  { %v3782_v14 = vmul.f32 %v3781_v37, %v3773_v60  ;;  %6183 = vrsqrt.f32 %v3766_v59 }
0x1313   :  { %v6180_v28 = vpop.eup %6179 }
0x1314   :  { %v7998_v32 = vadd.f32 %v3790_v57, %v3782_v14  ;;  %v3774_v31 = vmul.f32 %v6180_v28, %v7935_v47 }
0x1316   :  { %5545 = vmatmul.mubr.msk.f32.vlgmr.msra.gmra.mrb[110].mxu1 %vm255_vm3, %v7998_v32  ;;  %v3783_v48 = vmul.f32 %v3781_v37, %v3774_v31 }
0x1317   :  { %v6182_v55 = vpop.eup %6181  ;;  %5547 = vmatprep.mubr.msk.f32.mxu1 %vm6239_vm1, %v6238_v6 }
0x1318   :  { %v8005_v45 = vadd.f32 %v3790_v57, %v3783_v48  ;;  %v3775_v9 = vmul.f32 %v6182_v55, %v7940_v56 }
0x131a   :  { %5548 = vmatmul.mubr.msk.f32.gmra.mrb[112].mxu1 %vm255_vm3, %v8005_v45  ;;  %v3784_v1 = vmul.f32 %v3781_v37, %v3775_v9 }
0x131b   :  { %5550 = vmatprep.mubr.msk.f32.mxu1 %vm6239_vm1, %v6238_v6 }
0x131c   :  { %v6184_v47 = vpop.eup %6183  ;;  %v8012_v62 = vadd.f32 %v3790_v57, %v3784_v1 }
0x131d   :  { %v3776_v17 = vmul.f32 %v6184_v47, %v7946_v12 }
0x131e   :  { %5551 = vmatmul.mubr.msk.f32.gmra.mrb[114].mxu1 %vm255_vm3, %v8012_v62 }
0x131f   :  { %5553 = vmatprep.mubr.msk.f32.mxu1 %vm6239_vm1, %v6238_v6  ;;  %v3785_v61 = vmul.f32 %v3781_v37, %v3776_v17 }
0x1321   :  { %v8019_v56 = vadd.f32 %v3790_v57, %v3785_v61 }
0x1323   :  { %5554 = vmatmul.mubr.msk.f32.gmra.mrb[116].mxu1 %vm255_vm3, %v8019_v56 }
0x1324   :  { %5556 = vmatprep.mubr.msk.f32.mxu1 %vm6239_vm1, %v6238_v6 }
0x1331   :  { %v3757_v8 = vpop.xlane.xlu0 %3756 }
0x1332   :  { %v3762_v63 = vmul.f32 0.03125, %v3757_v8 }
0x1334   :  { %v3767_v24 = vadd.f32 1e-05, %v3762_v63 }
0x1336   :  { %6185 = vrsqrt.f32 %v3767_v24 }
0x1340   :  { %v6186_v12 = vpop.eup %6185 }
0x1341   :  { %v3777_v27 = vmul.f32 %v6186_v12, %v7965_v35 }
0x1343   :  { %v3786_v50 = vmul.f32 %v3781_v37, %v3777_v27 }
0x1345   :  { %v8026_v13 = vadd.f32 %v3790_v57, %v3786_v50 }
0x1347   :  { %5557 = vmatmul.mubr.msk.f32.gmra.mrb[118].mxu1 %vm255_vm3, %v8026_v13 }
0x1348   :  { %5598 = vmatprep.mubr.msk.f32.mxu1 %vm6239_vm1, %v6238_v6 }
0x13e9   :  { %v3890_v3 = vpop.f32.mrb[110].mxu1 }
0x13ea   :  { %v3891_v38 = vadd.f32 %v4687_v44, %v3890_v3  ;;  %v5546_v41 = vpop.f32.mrb[111].mxu1 }
0x13ec   :  { %v3914_v35 = vmax.f32 %v3891_v38, 0.0 }
0x13ed   :  { %v3895_v42 = vpop.f32.mrb[112].mxu1 }
0x13ee   :  { %v3896_v33 = vadd.f32 %v4687_v44, %v3895_v42  ;;  %v5549_v36 = vpop.f32.mrb[113].mxu1  ;;  %5576 = vmatmul.mubr.msk.f32.vlgmr.msra.gmra.mrb[120].mxu0 %vm1990_vm9, %v3914_v35 }
0x13ef   :  { %5578 = vmatprep.mubr.msk.f32.mxu0 %vm6239_vm1, %v6238_v6 }
0x13f0   :  { %v3915_v19 = vmax.f32 %v3896_v33, 0.0 }
0x13f1   :  { %v3900_v5 = vpop.f32.mrb[114].mxu1 }
0x13f2   :  { %v3901_v53 = vadd.f32 %v4687_v44, %v3900_v5  ;;  %v5552_v10 = vpop.f32.mrb[115].mxu1  ;;  %5579 = vmatmul.mubr.msk.f32.gmra.mrb[122].mxu0 %vm1990_vm9, %v3915_v19 }
0x13f3   :  { %5581 = vmatprep.mubr.msk.f32.mxu0 %vm6239_vm1, %v6238_v6 }
0x13f4   :  { %v3916_v7 = vmax.f32 %v3901_v53, 0.0 }
0x13f6   :  { %v3905_v2 = vpop.f32.mrb[116].mxu1  ;;  %5582 = vmatmul.mubr.msk.f32.gmra.mrb[124].mxu0 %vm1990_vm9, %v3916_v7 }
0x13f7   :  { %v3906_v46 = vadd.f32 %v4687_v44, %v3905_v2  ;;  %v5555_v22 = vpop.f32.mrb[117].mxu1  ;;  %5584 = vmatprep.mubr.msk.f32.mxu0 %vm6239_vm1, %v6238_v6 }
0x13f9   :  { %v3917_v39 = vmax.f32 %v3906_v46, 0.0 }
0x13fb   :  { %5585 = vmatmul.mubr.msk.f32.gmra.mrb[126].mxu0 %vm1990_vm9, %v3917_v39 }
0x13fc   :  { %5587 = vmatprep.mubr.msk.f32.mxu0 %vm6239_vm1, %v6238_v6 }
0x141a   :  { %v3910_v43 = vpop.f32.mrb[118].mxu1 }
0x141b   :  { %v3911_v18 = vadd.f32 %v4687_v44, %v3910_v43  ;;  %v5558_v52 = vpop.f32.mrb[119].mxu1 }
0x141d   :  { %v3918_v4 = vmax.f32 %v3911_v18, 0.0 }
0x141f   :  { %5588 = vmatmul.mubr.msk.f32.gmra.mrb[128].mxu0 %vm1990_vm9, %v3918_v4 }
0x1420   :  { %5623 = vmatprep.mubr.msk.f32.mxu0 %vm6239_vm1, %v6238_v6 }
0x14c1   :  { %v4013_v34 = vpop.f32.mrb[120].mxu0 }
0x14c2   :  { %v4014_v29 = vadd.f32 %v4013_v34, %v3931_v15  ;;  %v5577_v23 = vpop.f32.mrb[121].mxu0 }
0x14c4   :  { %v4037_v40 = vadd.f32 %v4014_v29, %v7998_v32 }
0x14c5   :  { %v4018_v37 = vpop.f32.mrb[122].mxu0 }
0x14c6   :  { %v4019_v0 = vadd.f32 %v4018_v37, %v3931_v15  ;;  %v5580_v54 = vpop.f32.mrb[123].mxu0  ;;  %v4042_v57 = vsel %vm255_vm3, %v4037_v40, 0.0 }
0x14c7   :  { %4043 = vadd.xlane.f32.xlu1 %v4042_v57 }
0x14c8   :  { %v4038_v60 = vadd.f32 %v4019_v0, %v8005_v45  ;;  %v4110_v0 = vrot.slane %v7917_v26, %v2168_v51 }
0x14c9   :  { %v4023_v59 = vpop.f32.mrb[124].mxu0 }
0x14ca   :  { %v4024_v14 = vadd.f32 %v4023_v59, %v3931_v15  ;;  %v5583_v28 = vpop.f32.mrb[125].mxu0  ;;  %v4045_v31 = vsel %vm255_vm3, %v4038_v60, 0.0  ;;  %v4119_v59 = vrot.slane %v7917_v26, %v2177_v21 }
0x14cb   :  { %4046 = vadd.xlane.f32.xlu0 %v4045_v31 }
0x14cc   :  { %v4039_v48 = vadd.f32 %v4024_v14, %v8012_v62 }
0x14ce   :  { %v4028_v55 = vpop.f32.mrb[126].mxu0  ;;  %v4048_v9 = vsel %vm255_vm3, %v4039_v48, 0.0 }
0x14cf   :  { %v4029_v32 = vadd.f32 %v4028_v55, %v3931_v15  ;;  %4049 = vadd.xlane.f32.xlu1 %v4048_v9  ;;  %v5586_v1 = vpop.f32.mrb[127].mxu0 }
0x14d1   :  { %v4040_v47 = vadd.f32 %v4029_v32, %v8019_v56 }
0x14d3   :  { %v4051_v17 = vsel %vm255_vm3, %v4040_v47, 0.0 }
0x14d4   :  { %4052 = vadd.xlane.f32.xlu0 %v4051_v17 }
0x14f2   :  { %v4033_v45 = vpop.f32.mrb[128].mxu0 }
0x14f3   :  { %v4034_v61 = vadd.f32 %v4033_v45, %v3931_v15  ;;  %v5589_v8 = vpop.f32.mrb[129].mxu0 }
0x14f5   :  { %v4041_v63 = vadd.f32 %v4034_v61, %v8026_v13 }
0x14f7   :  { %v4054_v24 = vsel %vm255_vm3, %v4041_v63, 0.0 }
0x14f8   :  { %4055 = vadd.xlane.f32.xlu1 %v4054_v24 }
0x1554   :  { %v4044_v62 = vpop.xlane.xlu1 %4043 }
0x1555   :  { %v4057_v12 = vmul.f32 0.03125, %v4044_v62 }
0x1557   :  { %v4062_v27 = vsub.f32 %v4037_v40, %v4057_v12 }
0x1558   :  { %v4047_v50 = vpop.xlane.xlu0 %4046 }
0x1559   :  { %v4058_v58 = vmul.f32 0.03125, %v4047_v50  ;;  %v4067_v20 = vmul.f32 %v4062_v27, %v4062_v27 }
0x155b   :  { %v4063_v16 = vsub.f32 %v4038_v60, %v4058_v58  ;;  %v4072_v56 = vsel %vm255_vm3, %v4067_v20, 0.0 }
0x155c   :  { %v4050_v44 = vpop.xlane.xlu1 %4049  ;;  %4073 = vadd.xlane.f32.xlu0 %v4072_v56 }
0x155d   :  { %v4059_v3 = vmul.f32 0.03125, %v4050_v44  ;;  %v4068_v38 = vmul.f32 %v4063_v16, %v4063_v16 }
0x155f   :  { %v4064_v41 = vsub.f32 %v4039_v48, %v4059_v3  ;;  %v4075_v35 = vsel %vm255_vm3, %v4068_v38, 0.0 }
0x1560   :  { %4076 = vadd.xlane.f32.xlu1 %v4075_v35 }
0x1561   :  { %v4053_v13 = vpop.xlane.xlu0 %4052  ;;  %v4069_v42 = vmul.f32 %v4064_v41, %v4064_v41 }
0x1562   :  { %v4060_v33 = vmul.f32 0.03125, %v4053_v13 }
0x1563   :  { %v4078_v36 = vsel %vm255_vm3, %v4069_v42, 0.0 }
0x1564   :  { %v4065_v19 = vsub.f32 %v4040_v47, %v4060_v33  ;;  %4079 = vadd.xlane.f32.xlu0 %v4078_v36 }
0x1566   :  { %v4070_v5 = vmul.f32 %v4065_v19, %v4065_v19 }
0x1568   :  { %v4081_v53 = vsel %vm255_vm3, %v4070_v5, 0.0 }
0x1569   :  { %4082 = vadd.xlane.f32.xlu1 %v4081_v53 }
0x1585   :  { %v4056_v10 = vpop.xlane.xlu1 %4055 }
0x1586   :  { %v4061_v7 = vmul.f32 0.03125, %v4056_v10 }
0x1588   :  { %v4066_v2 = vsub.f32 %v4041_v63, %v4061_v7 }
0x158a   :  { %v4071_v46 = vmul.f32 %v4066_v2, %v4066_v2 }
0x158c   :  { %v4084_v22 = vsel %vm255_vm3, %v4071_v46, 0.0 }
0x158d   :  { %4085 = vadd.xlane.f32.xlu0 %v4084_v22 }
0x15e9   :  { %v4074_v39 = vpop.xlane.xlu0 %4073 }
0x15ea   :  { %v4087_v43 = vmul.f32 0.03125, %v4074_v39 }
0x15ec   :  { %v4092_v18 = vadd.f32 1e-05, %v4087_v43 }
0x15ed   :  { %v4077_v52 = vpop.xlane.xlu1 %4076 }
0x15ee   :  { %6187 = vrsqrt.f32 %v4092_v18  ;;  %v4088_v4 = vmul.f32 0.03125, %v4077_v52  ;;  %v4209_v18 = vld [vmem:[%s8192_s14] sm:$0xff]  ;;  %v4210_v52 = vld [vmem:[%s8192_s14 + $0x8] sm:$0xff] }
0x15f0   :  { %v4093_v15 = vadd.f32 1e-05, %v4088_v4  ;;  %v5799_v4 = vpack.c.bf16 %v4210_v52, %v4209_v18  ;;  %v4321_v52 = vld [vmem:[%s8193_s15 + $0x18] sm:$0xff] }
0x15f1   :  { %v4080_v34 = vpop.xlane.xlu0 %4079 }
0x15f2   :  { %6189 = vrsqrt.f32 %v4093_v15  ;;  %v4089_v29 = vmul.f32 0.03125, %v4080_v34  ;;  %5800 = vmatpush3.bf16.msra.mxu1 %v5799_v4  ;;  %v4211_v15 = vld [vmem:[%s8192_s14 + $0x10] sm:$0xff]  ;;  %v4212_v34 = vld [vmem:[%s8192_s14 + $0x18] sm:$0xff] }
0x15f3   :  { %5801 = vmatprep.subr.bf16.mxu1 %v6240_v11 }
0x15f4   :  { %v4094_v23 = vadd.f32 1e-05, %v4089_v29  ;;  %v5802_v29 = vpack.c.bf16 %v4212_v34, %v4211_v15  ;;  %v4322_v15 = vld [vmem:[%s8193_s15 + $0x20] sm:$0xff] }
0x15f6   :  { %6191 = vrsqrt.f32 %v4094_v23  ;;  %v4083_v40 = vpop.xlane.xlu1 %4082  ;;  %5803 = vmatpush3.bf16.msra.mxu1 %v5802_v29 }
0x15f7   :  { %v4090_v37 = vmul.f32 0.03125, %v4083_v40 }
0x15f8   :  { %v6188_v54 = vpop.eup %6187 }
0x15f9   :  { %v4095_v57 = vadd.f32 1e-05, %v4090_v37  ;;  %v4102_v60 = vmul.f32 %v6188_v54, %v4062_v27 }
0x15fb   :  { %6193 = vrsqrt.f32 %v4095_v57  ;;  %v4111_v14 = vmul.f32 %v4110_v0, %v4102_v60 }
0x15fc   :  { %v6190_v28 = vpop.eup %6189 }
0x15fd   :  { %v4120_v31 = vadd.f32 %v4119_v59, %v4111_v14  ;;  %v4103_v48 = vmul.f32 %v6190_v28, %v4063_v16 }
0x15ff   :  { %v4126_v55 = vsel %vm255_vm3, %v4120_v31, 0.0  ;;  %v4112_v9 = vmul.f32 %v4110_v0, %v4103_v48 }
0x1600   :  { %v6192_v32 = vpop.eup %6191  ;;  %4127 = vadd.xlane.f32.xlu1 %v4126_v55 }
0x1601   :  { %v4121_v1 = vadd.f32 %v4119_v59, %v4112_v9  ;;  %v4104_v47 = vmul.f32 %v6192_v32, %v4064_v41  ;;  %v4125_v9 = vld [vmem:[%s8191_s13] sm:$0x3] }
0x1603   :  { %v4129_v51 = vsel %vm255_vm3, %v4121_v1, 0.0  ;;  %v4113_v17 = vmul.f32 %v4110_v0, %v4104_v47  ;;  %v4194_v47 = vrot.slane %v4125_v9, %v7076_v30 }
0x1604   :  { %4130 = vadd.xlane.f32.xlu0 %v4129_v51 }
0x1605   :  { %v6194_v45 = vpop.eup %6193  ;;  %v4122_v49 = vadd.f32 %v4119_v59, %v4113_v17 }
0x1606   :  { %v4105_v61 = vmul.f32 %v6194_v45, %v4065_v19  ;;  %v4203_v45 = vrot.slane %v4125_v9, %v7224_v25 }
0x1607   :  { %v4132_v21 = vsel %vm255_vm3, %v4122_v49, 0.0 }
0x1608   :  { %4133 = vadd.xlane.f32.xlu1 %v4132_v21  ;;  %v4114_v26 = vmul.f32 %v4110_v0, %v4105_v61 }
0x160a   :  { %v4123_v8 = vadd.f32 %v4119_v59, %v4114_v26 }
0x160c   :  { %v4135_v63 = vsel %vm255_vm3, %v4123_v8, 0.0 }
0x160d   :  { %4136 = vadd.xlane.f32.xlu0 %v4135_v63 }
0x161a   :  { %v4086_v24 = vpop.xlane.xlu0 %4085 }
0x161b   :  { %v4091_v62 = vmul.f32 0.03125, %v4086_v24 }
0x161d   :  { %v4096_v12 = vadd.f32 1e-05, %v4091_v62 }
0x161f   :  { %6195 = vrsqrt.f32 %v4096_v12 }
0x1629   :  { %v6196_v27 = vpop.eup %6195 }
0x162a   :  { %v4106_v50 = vmul.f32 %v6196_v27, %v4066_v2 }
0x162c   :  { %v4115_v58 = vmul.f32 %v4110_v0, %v4106_v50 }
0x162e   :  { %v4124_v20 = vadd.f32 %v4119_v59, %v4115_v58 }
0x1630   :  { %v4138_v16 = vsel %vm255_vm3, %v4124_v20, 0.0 }
0x1631   :  { %4139 = vadd.xlane.f32.xlu1 %v4138_v16 }
0x168d   :  { %v4128_v56 = vpop.xlane.xlu1 %4127 }
0x168e   :  { %v4141_v44 = vmul.f32 0.03125, %v4128_v56 }
0x1690   :  { %v4146_v3 = vsub.f32 %v4120_v31, %v4141_v44 }
0x1691   :  { %v4131_v38 = vpop.xlane.xlu0 %4130 }
0x1692   :  { %v4142_v41 = vmul.f32 0.03125, %v4131_v38  ;;  %v4151_v35 = vmul.f32 %v4146_v3, %v4146_v3 }
0x1694   :  { %v4147_v13 = vsub.f32 %v4121_v1, %v4142_v41  ;;  %v4156_v42 = vsel %vm255_vm3, %v4151_v35, 0.0 }
0x1695   :  { %4157 = vadd.xlane.f32.xlu0 %v4156_v42  ;;  %v4134_v33 = vpop.xlane.xlu1 %4133  ;;  %v4318_v42 = vld [vmem:[%s8193_s15] sm:$0xff] }
0x1696   :  { %v4143_v36 = vmul.f32 0.03125, %v4134_v33  ;;  %v4152_v19 = vmul.f32 %v4147_v13, %v4147_v13 }
0x1698   :  { %v4148_v5 = vsub.f32 %v4122_v49, %v4143_v36  ;;  %v4159_v53 = vsel %vm255_vm3, %v4152_v19, 0.0 }
0x1699   :  { %4160 = vadd.xlane.f32.xlu1 %v4159_v53 }
0x169a   :  { %v4137_v10 = vpop.xlane.xlu0 %4136  ;;  %v4153_v7 = vmul.f32 %v4148_v5, %v4148_v5 }
0x169b   :  { %v4144_v2 = vmul.f32 0.03125, %v4137_v10 }
0x169c   :  { %v4162_v46 = vsel %vm255_vm3, %v4153_v7, 0.0 }
0x169d   :  { %v4149_v22 = vsub.f32 %v4123_v8, %v4144_v2  ;;  %4163 = vadd.xlane.f32.xlu0 %v4162_v46 }
0x169f   :  { %v4154_v39 = vmul.f32 %v4149_v22, %v4149_v22 }
0x16a1   :  { %v4165_v43 = vsel %vm255_vm3, %v4154_v39, 0.0  ;;  %v4320_v39 = vld [vmem:[%s8193_s15 + $0x10] sm:$0xff] }
0x16a2   :  { %4166 = vadd.xlane.f32.xlu1 %v4165_v43 }
0x16be   :  { %v4140_v23 = vpop.xlane.xlu1 %4139 }
0x16bf   :  { %v4145_v40 = vmul.f32 0.03125, %v4140_v23 }
0x16c1   :  { %v4150_v37 = vsub.f32 %v4124_v20, %v4145_v40  ;;  %v4487_v40 = vld [vmem:[%s8180_s2] sm:$0xff] }
0x16c3   :  { %v4155_v0 = vmul.f32 %v4150_v37, %v4150_v37 }
0x16c5   :  { %v4168_v54 = vsel %vm255_vm3, %v4155_v0, 0.0 }
0x16c6   :  { %4169 = vadd.xlane.f32.xlu0 %v4168_v54 }
0x1722   :  { %v4158_v57 = vpop.xlane.xlu0 %4157 }
0x1723   :  { %v4171_v60 = vmul.f32 0.03125, %v4158_v57 }
0x1725   :  { %v4176_v59 = vadd.f32 1e-05, %v4171_v60 }
0x1726   :  { %v4161_v14 = vpop.xlane.xlu1 %4160 }
0x1727   :  { %6197 = vrsqrt.f32 %v4176_v59  ;;  %v4172_v28 = vmul.f32 0.03125, %v4161_v14 }
0x1729   :  { %v4177_v31 = vadd.f32 1e-05, %v4172_v28 }
0x172a   :  { %v4164_v48 = vpop.xlane.xlu0 %4163 }
0x172b   :  { %6199 = vrsqrt.f32 %v4177_v31  ;;  %v4173_v55 = vmul.f32 0.03125, %v4164_v48 }
0x172d   :  { %v4178_v32 = vadd.f32 1e-05, %v4173_v55 }
0x172f   :  { %6201 = vrsqrt.f32 %v4178_v32  ;;  %v4167_v1 = vpop.xlane.xlu1 %4166 }
0x1730   :  { %v4174_v51 = vmul.f32 0.03125, %v4167_v1 }
0x1731   :  { %v6198_v17 = vpop.eup %6197 }
0x1732   :  { %v4186_v49 = vmul.f32 %v6198_v17, %v4146_v3  ;;  %v4179_v61 = vadd.f32 1e-05, %v4174_v51 }
0x1734   :  { %v4195_v21 = vmul.f32 %v4194_v47, %v4186_v49  ;;  %6203 = vrsqrt.f32 %v4179_v61 }
0x1735   :  { %v6200_v26 = vpop.eup %6199 }
0x1736   :  { %v4204_v8 = vadd.f32 %v4203_v45, %v4195_v21  ;;  %v4187_v63 = vmul.f32 %v6200_v26, %v4147_v13 }
0x1738   :  { %5599 = vmatmul.mubr.msk.f32.vlgmr.msra.gmra.mrb[120].mxu1 %vm255_vm3, %v4204_v8  ;;  %v4196_v24 = vmul.f32 %v4194_v47, %v4187_v63 }
0x1739   :  { %v6202_v62 = vpop.eup %6201  ;;  %5601 = vmatprep.mubr.msk.f32.mxu1 %vm6239_vm1, %v6238_v6 }
0x173a   :  { %v4205_v12 = vadd.f32 %v4203_v45, %v4196_v24  ;;  %v4188_v30 = vmul.f32 %v6202_v62, %v4148_v5  ;;  %v4319_v5 = vld [vmem:[%s8193_s15 + $0x8] sm:$0xff] }
0x173c   :  { %5602 = vmatmul.mubr.msk.f32.gmra.mrb[122].mxu1 %vm255_vm3, %v4205_v12  ;;  %v4197_v27 = vmul.f32 %v4194_v47, %v4188_v30 }
0x173d   :  { %5604 = vmatprep.mubr.msk.f32.mxu1 %vm6239_vm1, %v6238_v6 }
0x173e   :  { %v6204_v25 = vpop.eup %6203  ;;  %v4206_v50 = vadd.f32 %v4203_v45, %v4197_v27 }
0x173f   :  { %v4189_v58 = vmul.f32 %v6204_v25, %v4149_v22 }
0x1740   :  { %5605 = vmatmul.mubr.msk.f32.gmra.mrb[124].mxu1 %vm255_vm3, %v4206_v50 }
0x1741   :  { %5607 = vmatprep.mubr.msk.f32.mxu1 %vm6239_vm1, %v6238_v6  ;;  %v4198_v20 = vmul.f32 %v4194_v47, %v4189_v58 }
0x1743   :  { %v4207_v16 = vadd.f32 %v4203_v45, %v4198_v20 }
0x1745   :  { %5608 = vmatmul.mubr.msk.f32.gmra.mrb[126].mxu1 %vm255_vm3, %v4207_v16 }
0x1746   :  { %5610 = vmatprep.mubr.msk.f32.mxu1 %vm6239_vm1, %v6238_v6 }
0x1753   :  { %v4170_v56 = vpop.xlane.xlu0 %4169 }
0x1754   :  { %v4175_v44 = vmul.f32 0.03125, %v4170_v56 }
0x1756   :  { %v4180_v3 = vadd.f32 1e-05, %v4175_v44 }
0x1758   :  { %6205 = vrsqrt.f32 %v4180_v3 }
0x1762   :  { %v6206_v38 = vpop.eup %6205 }
0x1763   :  { %v4190_v41 = vmul.f32 %v6206_v38, %v4150_v37 }
0x1765   :  { %v4199_v35 = vmul.f32 %v4194_v47, %v4190_v41 }
0x1767   :  { %v4208_v13 = vadd.f32 %v4203_v45, %v4199_v35 }
0x1769   :  { %5611 = vmatmul.mubr.msk.f32.gmra.mrb[128].mxu1 %vm255_vm3, %v4208_v13 }
0x180b   :  { %v4294_v33 = vpop.f32.mrb[120].mxu1 }
0x180c   :  { %v4323_v36 = vmul.f32 %v4318_v42, %v4294_v33  ;;  %v5600_v19 = vpop.f32.mrb[121].mxu1  ;;  %v4413_v42 = vld [vmem:[%s8194_s16] sm:$0xff] }
0x180e   :  { %4333 = vrot.lane.b32.xlu1 %v4323_v36, %s6244_s22 }
0x180f   :  { %v4299_v53 = vpop.f32.mrb[122].mxu1 }
0x1810   :  { %v4324_v10 = vmul.f32 %v4319_v5, %v4299_v53  ;;  %v5603_v7 = vpop.f32.mrb[123].mxu1 }
0x1812   :  { %4353 = vrot.lane.b32.xlu1 %v4323_v36, %s6246_s24  ;;  %4335 = vrot.lane.b32.xlu0 %v4324_v10, %s6244_s22 }
0x1813   :  { %v4304_v2 = vpop.f32.mrb[124].mxu1 }
0x1814   :  { %v5606_v46 = vpop.f32.mrb[125].mxu1  ;;  %v4325_v18 = vmul.f32 %v4320_v39, %v4304_v2 }
0x1816   :  { %4373 = vrot.lane.b32.xlu1 %v4323_v36, %s6247_s25  ;;  %4375 = vrot.lane.b32.xlu0 %v4324_v10, %s6247_s25 }
0x1818   :  { %v4309_v22 = vpop.f32.mrb[126].mxu1 }
0x1819   :  { %v5609_v43 = vpop.f32.mrb[127].mxu1  ;;  %v4326_v4 = vmul.f32 %v4321_v52, %v4309_v22 }
0x181a   :  { %4393 = vrot.lane.b32.xlu1 %v4323_v36, %s6241_s1  ;;  %4395 = vrot.lane.b32.xlu0 %v4324_v10, %s6241_s1 }
0x181e   :  { %4355 = vrot.lane.b32.xlu1 %v4324_v10, %s6246_s24  ;;  %4397 = vrot.lane.b32.xlu0 %v4325_v18, %s6241_s1 }
0x1822   :  { %4337 = vrot.lane.b32.xlu1 %v4325_v18, %s6244_s22  ;;  %4339 = vrot.lane.b32.xlu0 %v4326_v4, %s6244_s22 }
0x1826   :  { %4357 = vrot.lane.b32.xlu1 %v4325_v18, %s6246_s24  ;;  %4359 = vrot.lane.b32.xlu0 %v4326_v4, %s6246_s24 }
0x182a   :  { %4377 = vrot.lane.b32.xlu1 %v4325_v18, %s6247_s25  ;;  %4379 = vrot.lane.b32.xlu0 %v4326_v4, %s6247_s25 }
0x182e   :  { %4399 = vrot.lane.b32.xlu1 %v4326_v4, %s6241_s1 }
0x183c   :  { %v4314_v34 = vpop.f32.mrb[128].mxu1 }
0x183d   :  { %v4327_v29 = vmul.f32 %v4322_v15, %v4314_v34  ;;  %v5612_v23 = vpop.f32.mrb[129].mxu1 }
0x183f   :  { %4361 = vrot.lane.b32.xlu0 %v4327_v29, %s6246_s24  ;;  %4341 = vrot.lane.b32.xlu1 %v4327_v29, %s6244_s22 }
0x1843   :  { %4401 = vrot.lane.b32.xlu0 %v4327_v29, %s6241_s1  ;;  %4381 = vrot.lane.b32.xlu1 %v4327_v29, %s6247_s25  ;;  %s6256_s1 = smov [#allocation2]  }
0x1844   :  { %s4505_s22 = sshll.u32 %s6256_s1, 4  ;;  %s4506_s22 = int_to_ptr.vmem [resolvable:$true] %s4505_s22 }
0x1845   :  { %s6212_s24 = scalar_lea.vmem %s4506_s22, 128  ;;  %p6217_p1 = scmp.lt.s32.totalorder %s4506_s22, %s4506_s22 }
0x1846   :  { %p6213_p0 = scmp.ne.s32.totalorder %s4506_s22, %s6212_s24  ;;  %p6218_p2 = scmp.lt.s32.totalorder %s6212_s24, %s6212_s24 }
0x1847   :  { %4490 = vperm.xlu1 %5835, %v4487_v40   ;;  %4494 = vrot.lane.b32.xlu0 %v4487_v40, %s6255_s30 }
0x1848   :  { %p6219_p3 = por %p6218_p2, %p6217_p1 }
0x184a   :  { %p6220_p4 = pnand %p6219_p3, %p6213_p0 }
0x1880   :  { %v4334_v37 = vpop.permute.xlu1 %4333 }
0x1881   :  { %v4348_v28 = vadd.f32 %v4334_v37, %v4323_v36 }
0x1884   :  { %v4336_v0 = vpop.permute.xlu0 %4335  ;;  %v4354_v54 = vpop.permute.xlu1 %4353 }
0x1885   :  { %v4349_v31 = vadd.f32 %v4336_v0, %v4324_v10  ;;  %v4368_v9 = vadd.f32 %v4354_v54, %v4348_v28 }
0x1888   :  { %v4376_v57 = vpop.permute.xlu0 %4375  ;;  %v4374_v60 = vpop.permute.xlu1 %4373 }
0x1889   :  { %v4388_v1 = vadd.f32 %v4374_v60, %v4368_v9 }
0x188c   :  { %v4396_v59 = vpop.permute.xlu0 %4395  ;;  %v4394_v14 = vpop.permute.xlu1 %4393 }
0x188d   :  { %v4408_v45 = vadd.f32 %v4394_v14, %v4388_v1 }
0x1890   :  { %v4398_v48 = vpop.permute.xlu0 %4397  ;;  %v4356_v55 = vpop.permute.xlu1 %4355 }
0x1891   :  { %v4369_v32 = vadd.f32 %v4356_v55, %v4349_v31 }
0x1893   :  { %v4389_v47 = vadd.f32 %v4376_v57, %v4369_v32 }
0x1894   :  { %v4340_v51 = vpop.permute.xlu0 %4339  ;;  %v4338_v17 = vpop.permute.xlu1 %4337 }
0x1895   :  { %v4409_v49 = vadd.f32 %v4396_v59, %v4389_v47  ;;  %v4350_v8 = vadd.f32 %v4338_v17, %v4325_v18  ;;  %v4351_v63 = vadd.f32 %v4340_v51, %v4326_v4 }
0x1897   :  { %v5805_v61 = vpack.c.bf16 %v4409_v49, %v4408_v45 }
0x1898   :  { %v4360_v21 = vpop.permute.xlu0 %4359  ;;  %v4358_v26 = vpop.permute.xlu1 %4357 }
0x1899   :  { %5806 = vmatpush3.bf16.msra.mxu0 %v5805_v61  ;;  %v4370_v24 = vadd.f32 %v4358_v26, %v4350_v8  ;;  %v4371_v30 = vadd.f32 %v4360_v21, %v4351_v63 }
0x189a   :  { %5807 = vmatprep.subr.bf16.mxu0 %v6240_v11 }
0x189c   :  { %v4380_v62 = vpop.permute.xlu0 %4379  ;;  %v4378_v12 = vpop.permute.xlu1 %4377 }
0x189d   :  { %v4390_v27 = vadd.f32 %v4378_v12, %v4370_v24  ;;  %v4391_v25 = vadd.f32 %v4380_v62, %v4371_v30 }
0x189f   :  { %v4410_v58 = vadd.f32 %v4398_v48, %v4390_v27 }
0x18a0   :  { %v4400_v50 = vpop.permute.xlu1 %4399 }
0x18a1   :  { %v4411_v20 = vadd.f32 %v4400_v50, %v4391_v25 }
0x18a3   :  { %v5808_v16 = vpack.c.bf16 %v4411_v20, %v4410_v58 }
0x18a5   :  { %5809 = vmatpush3.bf16.msra.mxu0 %v5808_v16 }
0x18a6   :  { %5621 = vmatprep.subr.mxu0 %v6238_v6 }
0x18b1   :  { %v4362_v56 = vpop.permute.xlu0 %4361  ;;  %v4342_v44 = vpop.permute.xlu1 %4341 }
0x18b2   :  { %v4352_v3 = vadd.f32 %v4342_v44, %v4327_v29 }
0x18b4   :  { %v4372_v38 = vadd.f32 %v4362_v56, %v4352_v3 }
0x18b5   :  { %v4382_v41 = vpop.permute.xlu1 %4381  ;;  %v4402_v35 = vpop.permute.xlu0 %4401 }
0x18b6   :  { %v4392_v11 = vadd.f32 %v4382_v41, %v4372_v38 }
0x18b8   :  { %v4412_v13 = vadd.f32 %v4402_v35, %v4392_v11 }
0x18b9   :  { %v4495_v19 = vpop.permute.xlu0 %4494 }
0x18ba   :  { %5622 = vmatpush3.msra.mxu0 %v4412_v13 }
0x18bb   :  { %5624 = vmatmul.mubr.msk.f32.vlgmr.msra.gmra.mrb[130].mxu0 %vm487_vm6, %v4413_v42 }
0x18c6   :  { %v4491_v33 = vpop.permute.xlu1 %4490 }
0x198e   :  { %v4483_v36 = vpop.f32.mrb[130].mxu0 }
0x198f   :  { %v4493_v6 = vmul.f32 %v4491_v33, %v4483_v36  ;;  %v5625_v5 = vpop.f32.mrb[131].mxu0 }
0x1991   :  { %v4497_v53 = vadd.f32 %v4495_v19, %v4493_v6 }
0x1993   :  { %4498 = vst.msk [vmem:[#allocation2] sm:$0xff] %vm376_vm4, %v4497_v53 }
0x1994   :  { %6223 = shalt.err (!%p6220_p4)
}
0x1995   :  { %s6224_s10 = scalar_lea.hbm %s8195_s17, 128 }
0x1996   :  { %p6225_p5 = scmp.ne.s32.totalorder %s8195_s17, %s6224_s10  ;;  %p6228_p6 = scmp.lt.u32.totalorder %s6224_s10, %s8195_s17 }
0x1998   :  { %p6230_p7 = pnand %p6228_p6, %p6225_p5 }
0x199a   :  { %6233 = shalt.err (!%p6230_p7)
}
0x199b   :  { %4508 = dma.vmem_to_hbm [thread:$0]  %s4506_s22, 128, %s8195_s17, [#allocation3]  }
0x199c   :  { %6234 = dma.done.wait [#allocation3], 128  }
0x199d   :  { %6235 = vsyncadd [#allocation3], 4294967168 }
0x199e   :  { %4512 = vsyncpa [#allocation3], 1 }

</bundles_post_ra>
